<compile_context>
chip_gen: v7x
topology: tpu7x:2x2x1
jax: 0.10.0
libtpu: 0.0.40
codegen_flags: <defaults>
</compile_context>

<pallas_src>
import functools

import jax
import jax.numpy as jnp
from jax.experimental import pallas as pl
from jax.experimental.pallas import tpu as pltpu


def _cross_attention_kernel(q_ref, kv_ref, wq_ref, wkv_ref, wp_ref, bp_ref,
                            o_ref, qp_ref, m_ref, l_ref, acc_ref, *,
                            num_heads, head_dim, scale, compute_dtype,
                            approx_recip):
    ki = pl.program_id(2)
    bn, tq, D = q_ref.shape
    tk = kv_ref.shape[1]
    H, hd = num_heads, head_dim
    cd = compute_dtype

    def split_heads(x, rows):
        # (bn*rows, D) -> (bn*H, rows, hd); heads-as-batch for the attention
        # einsums (trailing-dim contraction, no explicit K transpose).
        x = x.reshape(bn, rows, H, hd).transpose(0, 2, 1, 3)
        return x.reshape(bn * H, rows, hd)

    @pl.when(ki == 0)
    def _():
        # Project the resident Q tile once per (batch, q) grid point; fold in
        # the softmax scale 1/sqrt(embed_size) (StyTr scales by embed_size).
        q2 = q_ref[...].reshape(bn * tq, D).astype(cd)
        qp = jnp.dot(q2, wq_ref[...].astype(cd),
                     preferred_element_type=jnp.float32) * scale
        qp_ref[...] = split_heads(qp, tq).astype(cd)
        m_ref[...] = jnp.full(m_ref.shape, -jnp.inf, dtype=m_ref.dtype)
        l_ref[...] = jnp.zeros(l_ref.shape, dtype=l_ref.dtype)
        acc_ref[...] = jnp.zeros(acc_ref.shape, dtype=acc_ref.dtype)

    # Fused K/V projection of the current key chunk: one (bn*tk, D) @ (D, 2D)
    # MXU matmul.  The [:, :D] / [:, D:] split is lane-tile aligned whenever D
    # is a multiple of 128 (true for typical D = 512/768/1024).
    kv2 = kv_ref[...].reshape(bn * tk, D).astype(cd)
    kvp = jnp.dot(kv2, wkv_ref[...].astype(cd),
                  preferred_element_type=jnp.float32)
    kh = split_heads(kvp[:, :D], tk).astype(cd)
    vh = split_heads(kvp[:, D:], tk).astype(cd)

    qh = qp_ref[...]                                               # (bn*H, tq, hd)
    s = jnp.einsum('bqd,bkd->bqk', qh, kh,
                   preferred_element_type=jnp.float32)             # (bn*H, tq, tk)

    # Online-softmax update (all statistics kept in f32).
    m_prev = m_ref[...]
    m_new = jnp.maximum(m_prev, jnp.max(s, axis=-1, keepdims=True))
    alpha = jnp.exp(m_prev - m_new)
    p = jnp.exp(s - m_new)
    l_ref[...] = alpha * l_ref[...] + jnp.sum(p, axis=-1, keepdims=True)
    acc_ref[...] = alpha * acc_ref[...] + jnp.einsum(
        'bqk,bkd->bqd', p.astype(cd), vh, preferred_element_type=jnp.float32)
    m_ref[...] = m_new

    @pl.when(ki == pl.num_programs(2) - 1)
    def _():
        # Normalize once after PV accumulation (per-row reciprocal on the EUP
        # path in production), then output projection + bias.
        out = acc_ref[...] * pl.reciprocal(l_ref[...], approx=approx_recip)
        out = out.reshape(bn, H, tq, hd).transpose(0, 2, 1, 3).reshape(bn * tq, D)
        proj = jnp.dot(out.astype(cd), wp_ref[...].astype(cd),
                       preferred_element_type=jnp.float32)
        proj = proj + bp_ref[...].astype(jnp.float32)
        # TODO(synk): proj_drop with p > 0 would need pltpu.prng_* dropout masks.
        o_ref[...] = proj.reshape(bn, tq, D).astype(o_ref.dtype)


def _largest_tile(S, cap):
    """Largest divisor of S that is <= cap and sublane-friendly (multiple of 8
    or equal to S itself).  Falls back to S for awkward sequence lengths."""
    best = S
    for t in range(1, min(S, cap) + 1):
        if S % t == 0 and (t % 8 == 0 or t == S):
            best = t
    return best


def _pick_block_n(N, tq, target_rows=256):
    """Smallest batch tile whose (bn*tq, D) Q projection reaches the MXU row
    target (256 covers v6e/v7x; 128 is enough on v5e).  Falls back to the whole
    batch for tiny problems."""
    for bn in range(1, N + 1):
        if N % bn == 0 and bn * tq >= target_rows:
            return bn
    return N


def _vmem_limit_bytes(block_n, tq, tk, D, H, in_bytes, cd_bytes):
    """Rough per-step VMEM footprint (double-buffered seq tiles, single-buffered
    weights, flash scratch, transients) with 2x headroom, clamped to a range
    that is safe on v5e/v6e/v7x."""
    f32 = 4
    est = 0
    est += 2 * 2 * block_n * tq * D * in_bytes            # q in + out tiles (x2 buffers)
    est += 2 * block_n * tk * D * in_bytes                 # kv tile (x2 buffers)
    est += (2 * D * D + 2 * D * D + D) * cd_bytes          # wq + wkv + wp + bias
    est += block_n * tq * D * (f32 + cd_bytes)             # acc (f32) + projected-q scratch
    est += 2 * block_n * H * tq * f32                      # running m / l
    est += 3 * block_n * H * tq * tk * f32                 # score / prob transients
    est += 2 * block_n * tk * 2 * D * f32                  # fused kv-projection transients
    est += 2 * block_n * tq * D * f32                      # projection transients
    return int(min(max(2 * est, 32 << 20), 64 << 20))


def cross_attention(q, kv, wq_t, wk_t, wv_t, wp_t, bp, *, num_heads,
                    compute_dtype=jnp.bfloat16, block_n=None, block_q=None,
                    block_k=None, single_buffer_weights=True):
    """q, kv: (N, S, D); the module's view() requires seq_q == seq_kv."""
    N, S, D = q.shape
    assert kv.shape == (N, S, D), "module's view() requires seq_q == seq_kv"
    head_dim = D // num_heads
    assert head_dim * num_heads == D
    # NOTE: the StyTr baseline scales logits by 1/sqrt(embed_size) (not head_dim).
    scale = 1.0 / (float(D) ** 0.5)

    # Fuse K and V projection weights into one lane-dense (D, 2D) operand and
    # pre-cast all weight operands to the MXU compute dtype (halves their
    # DMA/VMEM footprint when compute_dtype is bf16).
    wq_c = wq_t.astype(compute_dtype)
    wkv_c = jnp.concatenate([wk_t, wv_t], axis=1).astype(compute_dtype)
    wp_c = wp_t.astype(compute_dtype)

    tq = block_q if block_q is not None else _largest_tile(S, 256)
    tk = block_k if block_k is not None else _largest_tile(S, 512)
    if block_n is None:
        block_n = _pick_block_n(N, tq)
    assert N % block_n == 0 and S % tq == 0 and S % tk == 0

    grid = (N // block_n, S // tq, S // tk)

    kernel = functools.partial(
        _cross_attention_kernel, num_heads=num_heads, head_dim=head_dim,
        scale=scale, compute_dtype=compute_dtype,
        approx_recip=(compute_dtype != jnp.float32))

    scratch = [
        pltpu.VMEM((block_n * num_heads, tq, head_dim), compute_dtype),  # projected Q
        pltpu.VMEM((block_n * num_heads, tq, 1), jnp.float32),           # running max
        pltpu.VMEM((block_n * num_heads, tq, 1), jnp.float32),           # running sum
        pltpu.VMEM((block_n * num_heads, tq, head_dim), jnp.float32),    # output acc
    ]

    vmem_limit = _vmem_limit_bytes(block_n, tq, tk, D, num_heads,
                                   q.dtype.itemsize,
                                   jnp.dtype(compute_dtype).itemsize)

    def run(use_single_buffer):
        wkw = {"pipeline_mode": pl.Buffered(1)} if use_single_buffer else {}
        seq_q_spec = pl.BlockSpec((block_n, tq, D), lambda n, qi, ki: (n, qi, 0))
        seq_kv_spec = pl.BlockSpec((block_n, tk, D), lambda n, qi, ki: (n, ki, 0))
        wq_spec = pl.BlockSpec((D, D), lambda n, qi, ki: (0, 0), **wkw)
        wkv_spec = pl.BlockSpec((D, 2 * D), lambda n, qi, ki: (0, 0), **wkw)
        wp_spec = pl.BlockSpec((D, D), lambda n, qi, ki: (0, 0), **wkw)
        b_spec = pl.BlockSpec((1, D), lambda n, qi, ki: (0, 0), **wkw)
        return pl.pallas_call(
            kernel,
            out_shape=jax.ShapeDtypeStruct((N, S, D), q.dtype),
            grid_spec=pltpu.PrefetchScalarGridSpec(
                num_scalar_prefetch=0,
                grid=grid,
                in_specs=[seq_q_spec, seq_kv_spec, wq_spec, wkv_spec, wp_spec,
                          b_spec],
                out_specs=seq_q_spec,
                scratch_shapes=scratch),
            compiler_params=pltpu.CompilerParams(
                dimension_semantics=("parallel", "parallel", "arbitrary"),
                vmem_limit_bytes=vmem_limit),
        )(q, kv, wq_c, wkv_c, wp_c, bp)

    if single_buffer_weights:
        try:
            return run(True)
        except Exception:
            # TODO(synk): pl.Buffered(1) rejected by this JAX/Mosaic build; fall
            # back to default double-buffered weight operands.
            pass
    return run(False)


def _reference(q, kv, wq_t, wk_t, wv_t, wp_t, bp, *, num_heads):
    """Pure-JAX mirror of the PyTorch forward, for verification."""
    N, S, D = q.shape
    hd = D // num_heads
    queries = q @ wq_t
    keys = kv @ wk_t
    values = kv @ wv_t

    def split(x):  # (N, S, D) -> (N, H, S, hd)
        return x.reshape(N, S, num_heads, hd).transpose(0, 2, 1, 3)

    qh, kh, vh = split(queries), split(keys), split(values)
    att = jnp.einsum('nhqd,nhkd->nhqk', qh, kh) / (float(D) ** 0.5)
    att = jax.nn.softmax(att, axis=-1)
    out = jnp.einsum('nhqk,nhkd->nhqd', att, vh)
    out = out.transpose(0, 2, 1, 3).reshape(N, S, D)
    return out @ wp_t + bp


if __name__ == "__main__":
    # Small shapes consistent with the module: dim divisible by num_heads.
    N, S, D, H = 2, 8, 32, 8

    key = jax.random.PRNGKey(0)
    k_q, k_kv, k_wq, k_wk, k_wv, k_wp, k_bp = jax.random.split(key, 7)

    q = jax.random.normal(k_q, (N, S, D), dtype=jnp.float32)
    kv = jax.random.normal(k_kv, (N, S, D), dtype=jnp.float32)

    # Deterministic synthetic parameters. PyTorch nn.Linear stores W as
    # (out, in) and computes x @ W.T; we initialize W that way and hand the
    # transposed matrices to the kernel.
    lim = 1.0 / (D ** 0.5)
    Wq = jax.random.uniform(k_wq, (D, D), jnp.float32, -lim, lim)
    Wk = jax.random.uniform(k_wk, (D, D), jnp.float32, -lim, lim)
    Wv = jax.random.uniform(k_wv, (D, D), jnp.float32, -lim, lim)
    Wp = jax.random.uniform(k_wp, (D, D), jnp.float32, -lim, lim)
    bp = jax.random.uniform(k_bp, (1, D), jnp.float32, -lim, lim)

    ref = _reference(q, kv, Wq.T, Wk.T, Wv.T, Wp.T, bp, num_heads=H)

    # Strict f32 parity check.
    out_f32 = cross_attention(q, kv, Wq.T, Wk.T, Wv.T, Wp.T, bp,
                              num_heads=H, compute_dtype=jnp.float32)
    out_f32 = jax.block_until_ready(out_f32)
    assert out_f32.shape == (N, S, D)
    assert jnp.allclose(out_f32, ref, atol=1e-4, rtol=1e-4), "f32 mismatch vs reference"

    # Production bf16-MXU configuration (f32 accumulation / softmax chain),
    # checked at a bf16-appropriate tolerance.
    out_bf16 = cross_attention(q, kv, Wq.T, Wk.T, Wv.T, Wp.T, bp,
                               num_heads=H, compute_dtype=jnp.bfloat16)
    out_bf16 = jax.block_until_ready(out_bf16)
    assert out_bf16.shape == (N, S, D)
    assert jnp.allclose(out_bf16, ref, atol=5e-2, rtol=5e-2), "bf16 mismatch vs reference"

    print("KERNEL_OK")
</pallas_src>

<mosaic_0001>
module attributes {stable_mosaic.version = 11 : i64} {
  func.func @_cross_attention_kernel(%arg0: i32, %arg1: i32, %arg2: i32, %arg3: memref<2x8x32xf32, #tpu.memory_space<vmem>>, %arg4: memref<2x8x32xf32, #tpu.memory_space<vmem>>, %arg5: memref<32x32xf32, #tpu.memory_space<vmem>>, %arg6: memref<32x64xf32, #tpu.memory_space<vmem>>, %arg7: memref<32x32xf32, #tpu.memory_space<vmem>>, %arg8: memref<1x32xf32, #tpu.memory_space<vmem>>, %arg9: memref<2x8x32xf32, #tpu.memory_space<vmem>>, %arg10: memref<16x8x4xf32, #tpu.memory_space<vmem>>, %arg11: memref<16x8x1xf32, #tpu.memory_space<vmem>>, %arg12: memref<16x8x1xf32, #tpu.memory_space<vmem>>, %arg13: memref<16x8x4xf32, #tpu.memory_space<vmem>>) attributes {dimension_semantics = [#tpu.dimension_semantics<parallel>, #tpu.dimension_semantics<parallel>, #tpu.dimension_semantics<arbitrary>], iteration_bounds = array<i64: 1, 1, 1>, scalar_prefetch = 0 : i64, scratch_operands = 4 : i64, tpu.core_type = #tpu.core_type<tc>, window_params = [{transform_indices = @transform_0, window_bounds = array<i64: 2, 8, 32>}, {transform_indices = @transform_1, window_bounds = array<i64: 2, 8, 32>}, {pipeline_mode = #tpu.pipeline_mode<synchronous>, transform_indices = @transform_2, window_bounds = array<i64: 32, 32>}, {pipeline_mode = #tpu.pipeline_mode<synchronous>, transform_indices = @transform_3, window_bounds = array<i64: 32, 64>}, {pipeline_mode = #tpu.pipeline_mode<synchronous>, transform_indices = @transform_4, window_bounds = array<i64: 32, 32>}, {pipeline_mode = #tpu.pipeline_mode<synchronous>, transform_indices = @transform_5, window_bounds = array<i64: 1, 32>}, {transform_indices = @transform_6, window_bounds = array<i64: 2, 8, 32>}]} {
    %c0_i32 = arith.constant 0 : i32
    %0 = arith.cmpi eq, %arg2, %c0_i32 : i32
    %1 = arith.extui %0 : i1 to i32
    %c0_i32_0 = arith.constant 0 : i32
    %2 = arith.cmpi ne, %1, %c0_i32_0 : i32
    scf.if %2 {
      %c0_32 = arith.constant 0 : index
      %c0_33 = arith.constant 0 : index
      %c0_34 = arith.constant 0 : index
      %42 = vector.load %arg3[%c0_32, %c0_33, %c0_34] : memref<2x8x32xf32, #tpu.memory_space<vmem>>, vector<2x8x32xf32>
      %43 = vector.shape_cast %42 : vector<2x8x32xf32> to vector<16x32xf32>
      %c0_35 = arith.constant 0 : index
      %c0_36 = arith.constant 0 : index
      %44 = vector.load %arg5[%c0_35, %c0_36] : memref<32x32xf32, #tpu.memory_space<vmem>>, vector<32x32xf32>
      %cst_37 = arith.constant dense<0.000000e+00> : vector<16x32xf32>
      %45 = tpu.matmul %43, %44, %cst_37 {dimension_numbers = #tpu.dot_dimension_numbers<[1], [0], [0], [1], [0, 0, 1, 1], [], []>} : vector<16x32xf32>, vector<32x32xf32>, vector<16x32xf32> -> vector<16x32xf32>
      %cst_38 = arith.constant 0.176776692 : f32
      %46 = vector.broadcast %cst_38 : f32 to vector<16x32xf32>
      %47 = arith.mulf %45, %46 : vector<16x32xf32>
      %48 = vector.shape_cast %47 : vector<16x32xf32> to vector<2x8x8x4xf32>
      %49 = tpu.transpose %48, [0, 2, 1, 3] : vector<2x8x8x4xf32> -> vector<2x8x8x4xf32>
      %50 = vector.shape_cast %49 : vector<2x8x8x4xf32> to vector<16x8x4xf32>
      %c0_39 = arith.constant 0 : index
      %c0_40 = arith.constant 0 : index
      %c0_41 = arith.constant 0 : index
      %51 = vector.load %arg10[%c0_39, %c0_40, %c0_41] : memref<16x8x4xf32, #tpu.memory_space<vmem>>, vector<16x8x4xf32>
      tpu.vector_store %arg10[%c0_39, %c0_40, %c0_41], %50 {strides = array<i32>} : memref<16x8x4xf32, #tpu.memory_space<vmem>>, vector<16x8x4xf32>,
      %cst_42 = arith.constant 0xFF800000 : f32
      %52 = vector.broadcast %cst_42 : f32 to vector<16x8x1xf32>
      %c0_43 = arith.constant 0 : index
      %c0_44 = arith.constant 0 : index
      %c0_45 = arith.constant 0 : index
      %53 = vector.load %arg11[%c0_43, %c0_44, %c0_45] : memref<16x8x1xf32, #tpu.memory_space<vmem>>, vector<16x8x1xf32>
      tpu.vector_store %arg11[%c0_43, %c0_44, %c0_45], %52 {strides = array<i32>} : memref<16x8x1xf32, #tpu.memory_space<vmem>>, vector<16x8x1xf32>,
      %cst_46 = arith.constant 0.000000e+00 : f32
      %54 = vector.broadcast %cst_46 : f32 to vector<16x8x1xf32>
      %c0_47 = arith.constant 0 : index
      %c0_48 = arith.constant 0 : index
      %c0_49 = arith.constant 0 : index
      %55 = vector.load %arg12[%c0_47, %c0_48, %c0_49] : memref<16x8x1xf32, #tpu.memory_space<vmem>>, vector<16x8x1xf32>
      tpu.vector_store %arg12[%c0_47, %c0_48, %c0_49], %54 {strides = array<i32>} : memref<16x8x1xf32, #tpu.memory_space<vmem>>, vector<16x8x1xf32>,
      %cst_50 = arith.constant 0.000000e+00 : f32
      %56 = vector.broadcast %cst_50 : f32 to vector<16x8x4xf32>
      %c0_51 = arith.constant 0 : index
      %c0_52 = arith.constant 0 : index
      %c0_53 = arith.constant 0 : index
      %57 = vector.load %arg13[%c0_51, %c0_52, %c0_53] : memref<16x8x4xf32, #tpu.memory_space<vmem>>, vector<16x8x4xf32>
      tpu.vector_store %arg13[%c0_51, %c0_52, %c0_53], %56 {strides = array<i32>} : memref<16x8x4xf32, #tpu.memory_space<vmem>>, vector<16x8x4xf32>,
    } else {
    }
    %c0 = arith.constant 0 : index
    %c0_1 = arith.constant 0 : index
    %c0_2 = arith.constant 0 : index
    %3 = vector.load %arg4[%c0, %c0_1, %c0_2] : memref<2x8x32xf32, #tpu.memory_space<vmem>>, vector<2x8x32xf32>
    %4 = vector.shape_cast %3 : vector<2x8x32xf32> to vector<16x32xf32>
    %c0_3 = arith.constant 0 : index
    %c0_4 = arith.constant 0 : index
    %5 = vector.load %arg6[%c0_3, %c0_4] : memref<32x64xf32, #tpu.memory_space<vmem>>, vector<32x64xf32>
    %cst = arith.constant dense<0.000000e+00> : vector<16x64xf32>
    %6 = tpu.matmul %4, %5, %cst {dimension_numbers = #tpu.dot_dimension_numbers<[1], [0], [0], [1], [0, 0, 1, 1], [], []>} : vector<16x32xf32>, vector<32x64xf32>, vector<16x64xf32> -> vector<16x64xf32>
    %7 = vector.extract_strided_slice %6 {offsets = [0, 0], sizes = [16, 32], strides = [1, 1]} : vector<16x64xf32> to vector<16x32xf32>
    %8 = vector.shape_cast %7 : vector<16x32xf32> to vector<2x8x8x4xf32>
    %9 = tpu.transpose %8, [0, 2, 1, 3] : vector<2x8x8x4xf32> -> vector<2x8x8x4xf32>
    %10 = vector.shape_cast %9 : vector<2x8x8x4xf32> to vector<16x8x4xf32>
    %11 = vector.extract_strided_slice %6 {offsets = [0, 32], sizes = [16, 32], strides = [1, 1]} : vector<16x64xf32> to vector<16x32xf32>
    %12 = vector.shape_cast %11 : vector<16x32xf32> to vector<2x8x8x4xf32>
    %13 = tpu.transpose %12, [0, 2, 1, 3] : vector<2x8x8x4xf32> -> vector<2x8x8x4xf32>
    %14 = vector.shape_cast %13 : vector<2x8x8x4xf32> to vector<16x8x4xf32>
    %c0_5 = arith.constant 0 : index
    %c0_6 = arith.constant 0 : index
    %c0_7 = arith.constant 0 : index
    %15 = vector.load %arg10[%c0_5, %c0_6, %c0_7] : memref<16x8x4xf32, #tpu.memory_space<vmem>>, vector<16x8x4xf32>
    "tpu.trace_start"() <{level = 10 : i32, message = "bqd,bkd->bqk"}> : () -> ()
    %cst_8 = arith.constant dense<0.000000e+00> : vector<16x8x8xf32>
    %16 = tpu.matmul %15, %10, %cst_8 {dimension_numbers = #tpu.dot_dimension_numbers<[2], [2], [1], [1], [0, 0, 0, 1, 1, 1], [0], [0]>} : vector<16x8x4xf32>, vector<16x8x4xf32>, vector<16x8x8xf32> -> vector<16x8x8xf32>
    "tpu.trace_stop"() : () -> ()
    %c0_9 = arith.constant 0 : index
    %c0_10 = arith.constant 0 : index
    %c0_11 = arith.constant 0 : index
    %17 = vector.load %arg11[%c0_9, %c0_10, %c0_11] : memref<16x8x1xf32, #tpu.memory_space<vmem>>, vector<16x8x1xf32>
    %cst_12 = arith.constant dense<0xFF800000> : vector<16x8xf32>
    %18 = vector.multi_reduction <maximumf>, %16, %cst_12 [2] : vector<16x8x8xf32> to vector<16x8xf32>
    %19 = vector.shape_cast %18 : vector<16x8xf32> to vector<16x8x1xf32>
    %20 = arith.maximumf %17, %19 : vector<16x8x1xf32>
    %21 = arith.subf %17, %20 : vector<16x8x1xf32>
    %22 = math.exp %21 : vector<16x8x1xf32>
    %23 = vector.broadcast %20 : vector<16x8x1xf32> to vector<16x8x8xf32>
    %24 = arith.subf %16, %23 : vector<16x8x8xf32>
    %25 = math.exp %24 : vector<16x8x8xf32>
    %c0_13 = arith.constant 0 : index
    %c0_14 = arith.constant 0 : index
    %c0_15 = arith.constant 0 : index
    %26 = vector.load %arg12[%c0_13, %c0_14, %c0_15] : memref<16x8x1xf32, #tpu.memory_space<vmem>>, vector<16x8x1xf32>
    %27 = arith.mulf %22, %26 : vector<16x8x1xf32>
    %cst_16 = arith.constant dense<0.000000e+00> : vector<16x8xf32>
    %28 = vector.multi_reduction <add>, %25, %cst_16 [2] : vector<16x8x8xf32> to vector<16x8xf32>
    %29 = vector.shape_cast %28 : vector<16x8xf32> to vector<16x8x1xf32>
    %30 = arith.addf %27, %29 : vector<16x8x1xf32>
    %c0_17 = arith.constant 0 : index
    %c0_18 = arith.constant 0 : index
    %c0_19 = arith.constant 0 : index
    %31 = vector.load %arg12[%c0_17, %c0_18, %c0_19] : memref<16x8x1xf32, #tpu.memory_space<vmem>>, vector<16x8x1xf32>
    tpu.vector_store %arg12[%c0_17, %c0_18, %c0_19], %30 {strides = array<i32>} : memref<16x8x1xf32, #tpu.memory_space<vmem>>, vector<16x8x1xf32>,
    %c0_20 = arith.constant 0 : index
    %c0_21 = arith.constant 0 : index
    %c0_22 = arith.constant 0 : index
    %32 = vector.load %arg13[%c0_20, %c0_21, %c0_22] : memref<16x8x4xf32, #tpu.memory_space<vmem>>, vector<16x8x4xf32>
    %33 = vector.broadcast %22 : vector<16x8x1xf32> to vector<16x8x4xf32>
    %34 = arith.mulf %33, %32 : vector<16x8x4xf32>
    "tpu.trace_start"() <{level = 10 : i32, message = "bqk,bkd->bqd"}> : () -> ()
    %cst_23 = arith.constant dense<0.000000e+00> : vector<16x8x4xf32>
    %35 = tpu.matmul %25, %14, %cst_23 {dimension_numbers = #tpu.dot_dimension_numbers<[2], [1], [1], [2], [0, 0, 0, 1, 1, 2], [0], [0]>} : vector<16x8x8xf32>, vector<16x8x4xf32>, vector<16x8x4xf32> -> vector<16x8x4xf32>
    "tpu.trace_stop"() : () -> ()
    %36 = arith.addf %34, %35 : vector<16x8x4xf32>
    %c0_24 = arith.constant 0 : index
    %c0_25 = arith.constant 0 : index
    %c0_26 = arith.constant 0 : index
    %37 = vector.load %arg13[%c0_24, %c0_25, %c0_26] : memref<16x8x4xf32, #tpu.memory_space<vmem>>, vector<16x8x4xf32>
    tpu.vector_store %arg13[%c0_24, %c0_25, %c0_26], %36 {strides = array<i32>} : memref<16x8x4xf32, #tpu.memory_space<vmem>>, vector<16x8x4xf32>,
    %c0_27 = arith.constant 0 : index
    %c0_28 = arith.constant 0 : index
    %c0_29 = arith.constant 0 : index
    %38 = vector.load %arg11[%c0_27, %c0_28, %c0_29] : memref<16x8x1xf32, #tpu.memory_space<vmem>>, vector<16x8x1xf32>
    tpu.vector_store %arg11[%c0_27, %c0_28, %c0_29], %20 {strides = array<i32>} : memref<16x8x1xf32, #tpu.memory_space<vmem>>, vector<16x8x1xf32>,
    %c0_i32_30 = arith.constant 0 : i32
    %39 = arith.cmpi eq, %arg2, %c0_i32_30 : i32
    %40 = arith.extui %39 : i1 to i32
    %c0_i32_31 = arith.constant 0 : i32
    %41 = arith.cmpi ne, %40, %c0_i32_31 : i32
    scf.if %41 {
      %c0_32 = arith.constant 0 : index
      %c0_33 = arith.constant 0 : index
      %c0_34 = arith.constant 0 : index
      %42 = vector.load %arg13[%c0_32, %c0_33, %c0_34] : memref<16x8x4xf32, #tpu.memory_space<vmem>>, vector<16x8x4xf32>
      %c0_35 = arith.constant 0 : index
      %c0_36 = arith.constant 0 : index
      %c0_37 = arith.constant 0 : index
      %43 = vector.load %arg12[%c0_35, %c0_36, %c0_37] : memref<16x8x1xf32, #tpu.memory_space<vmem>>, vector<16x8x1xf32>
      %44 = tpu.reciprocal %43 : vector<16x8x1xf32> -> vector<16x8x1xf32>
      %45 = vector.broadcast %44 : vector<16x8x1xf32> to vector<16x8x4xf32>
      %46 = arith.mulf %42, %45 : vector<16x8x4xf32>
      %47 = vector.shape_cast %46 : vector<16x8x4xf32> to vector<2x8x8x4xf32>
      %48 = tpu.transpose %47, [0, 2, 1, 3] : vector<2x8x8x4xf32> -> vector<2x8x8x4xf32>
      %49 = vector.shape_cast %48 : vector<2x8x8x4xf32> to vector<16x32xf32>
      %c0_38 = arith.constant 0 : index
      %c0_39 = arith.constant 0 : index
      %50 = vector.load %arg7[%c0_38, %c0_39] : memref<32x32xf32, #tpu.memory_space<vmem>>, vector<32x32xf32>
      %cst_40 = arith.constant dense<0.000000e+00> : vector<16x32xf32>
      %51 = tpu.matmul %49, %50, %cst_40 {dimension_numbers = #tpu.dot_dimension_numbers<[1], [0], [0], [1], [0, 0, 1, 1], [], []>} : vector<16x32xf32>, vector<32x32xf32>, vector<16x32xf32> -> vector<16x32xf32>
      %c0_41 = arith.constant 0 : index
      %c0_42 = arith.constant 0 : index
      %52 = vector.load %arg8[%c0_41, %c0_42] : memref<1x32xf32, #tpu.memory_space<vmem>>, vector<1x32xf32>
      %53 = vector.broadcast %52 : vector<1x32xf32> to vector<16x32xf32>
      %54 = arith.addf %51, %53 : vector<16x32xf32>
      %55 = vector.shape_cast %54 : vector<16x32xf32> to vector<2x8x32xf32>
      %c0_43 = arith.constant 0 : index
      %c0_44 = arith.constant 0 : index
      %c0_45 = arith.constant 0 : index
      %56 = vector.load %arg9[%c0_43, %c0_44, %c0_45] : memref<2x8x32xf32, #tpu.memory_space<vmem>>, vector<2x8x32xf32>
      tpu.vector_store %arg9[%c0_43, %c0_44, %c0_45], %55 {strides = array<i32>} : memref<2x8x32xf32, #tpu.memory_space<vmem>>, vector<2x8x32xf32>,
    } else {
    }
    return
  }
  func.func @transform_0(%arg0: i32, %arg1: i32, %arg2: i32) -> (i32, i32, i32) {
    %c0_i32 = arith.constant 0 : i32
    %c0_i32_0 = arith.constant 0 : i32
    return %arg0, %arg1, %c0_i32 : i32, i32, i32
  }
  func.func @transform_1(%arg0: i32, %arg1: i32, %arg2: i32) -> (i32, i32, i32) {
    %c0_i32 = arith.constant 0 : i32
    %c0_i32_0 = arith.constant 0 : i32
    return %arg0, %arg2, %c0_i32 : i32, i32, i32
  }
  func.func @transform_2(%arg0: i32, %arg1: i32, %arg2: i32) -> (i32, i32) {
    %c0_i32 = arith.constant 0 : i32
    %c0_i32_0 = arith.constant 0 : i32
    %c0_i32_1 = arith.constant 0 : i32
    return %c0_i32, %c0_i32_0 : i32, i32
  }
  func.func @transform_3(%arg0: i32, %arg1: i32, %arg2: i32) -> (i32, i32) {
    %c0_i32 = arith.constant 0 : i32
    %c0_i32_0 = arith.constant 0 : i32
    %c0_i32_1 = arith.constant 0 : i32
    return %c0_i32, %c0_i32_0 : i32, i32
  }
  func.func @transform_4(%arg0: i32, %arg1: i32, %arg2: i32) -> (i32, i32) {
    %c0_i32 = arith.constant 0 : i32
    %c0_i32_0 = arith.constant 0 : i32
    %c0_i32_1 = arith.constant 0 : i32
    return %c0_i32, %c0_i32_0 : i32, i32
  }
  func.func @transform_5(%arg0: i32, %arg1: i32, %arg2: i32) -> (i32, i32) {
    %c0_i32 = arith.constant 0 : i32
    %c0_i32_0 = arith.constant 0 : i32
    %c0_i32_1 = arith.constant 0 : i32
    return %c0_i32, %c0_i32_0 : i32, i32
  }
  func.func @transform_6(%arg0: i32, %arg1: i32, %arg2: i32) -> (i32, i32, i32) {
    %c0_i32 = arith.constant 0 : i32
    %c0_i32_0 = arith.constant 0 : i32
    return %arg0, %arg1, %c0_i32 : i32, i32, i32
  }
}

module attributes {stable_mosaic.version = 11 : i64} {
  func.func @_cross_attention_kernel(%arg0: i32, %arg1: i32, %arg2: i32, %arg3: memref<2x8x32xf32, #tpu.memory_space<vmem>>, %arg4: memref<2x8x32xf32, #tpu.memory_space<vmem>>, %arg5: memref<32x32xf32, #tpu.memory_space<vmem>>, %arg6: memref<32x64xf32, #tpu.memory_space<vmem>>, %arg7: memref<32x32xf32, #tpu.memory_space<vmem>>, %arg8: memref<1x32xf32, #tpu.memory_space<vmem>>, %arg9: memref<2x8x32xf32, #tpu.memory_space<vmem>>, %arg10: memref<16x8x4xf32, #tpu.memory_space<vmem>>, %arg11: memref<16x8x1xf32, #tpu.memory_space<vmem>>, %arg12: memref<16x8x1xf32, #tpu.memory_space<vmem>>, %arg13: memref<16x8x4xf32, #tpu.memory_space<vmem>>) attributes {dimension_semantics = [#tpu.dimension_semantics<parallel>, #tpu.dimension_semantics<parallel>, #tpu.dimension_semantics<arbitrary>], iteration_bounds = array<i64: 1, 1, 1>, scalar_prefetch = 0 : i64, scratch_operands = 4 : i64, tpu.core_type = #tpu.core_type<tc>, window_params = [{transform_indices = @transform_0, window_bounds = array<i64: 2, 8, 32>}, {transform_indices = @transform_1, window_bounds = array<i64: 2, 8, 32>}, {pipeline_mode = #tpu.pipeline_mode<synchronous>, transform_indices = @transform_2, window_bounds = array<i64: 32, 32>}, {pipeline_mode = #tpu.pipeline_mode<synchronous>, transform_indices = @transform_3, window_bounds = array<i64: 32, 64>}, {pipeline_mode = #tpu.pipeline_mode<synchronous>, transform_indices = @transform_4, window_bounds = array<i64: 32, 32>}, {pipeline_mode = #tpu.pipeline_mode<synchronous>, transform_indices = @transform_5, window_bounds = array<i64: 1, 32>}, {transform_indices = @transform_6, window_bounds = array<i64: 2, 8, 32>}]} {
    %c0_i32 = arith.constant 0 : i32
    %0 = arith.cmpi eq, %arg2, %c0_i32 : i32
    %1 = arith.extui %0 : i1 to i32
    %c0_i32_0 = arith.constant 0 : i32
    %2 = arith.cmpi ne, %1, %c0_i32_0 : i32
    scf.if %2 {
      %c0_32 = arith.constant 0 : index
      %c0_33 = arith.constant 0 : index
      %c0_34 = arith.constant 0 : index
      %42 = vector.load %arg3[%c0_32, %c0_33, %c0_34] : memref<2x8x32xf32, #tpu.memory_space<vmem>>, vector<2x8x32xf32>
      %43 = vector.shape_cast %42 : vector<2x8x32xf32> to vector<16x32xf32>
      %c0_35 = arith.constant 0 : index
      %c0_36 = arith.constant 0 : index
      %44 = vector.load %arg5[%c0_35, %c0_36] : memref<32x32xf32, #tpu.memory_space<vmem>>, vector<32x32xf32>
      %cst_37 = arith.constant dense<0.000000e+00> : vector<16x32xf32>
      %45 = tpu.matmul %43, %44, %cst_37 {dimension_numbers = #tpu.dot_dimension_numbers<[1], [0], [0], [1], [0, 0, 1, 1], [], []>} : vector<16x32xf32>, vector<32x32xf32>, vector<16x32xf32> -> vector<16x32xf32>
      %cst_38 = arith.constant 0.176776692 : f32
      %46 = vector.broadcast %cst_38 : f32 to vector<16x32xf32>
      %47 = arith.mulf %45, %46 : vector<16x32xf32>
      %48 = vector.shape_cast %47 : vector<16x32xf32> to vector<2x8x8x4xf32>
      %49 = tpu.transpose %48, [0, 2, 1, 3] : vector<2x8x8x4xf32> -> vector<2x8x8x4xf32>
      %50 = vector.shape_cast %49 : vector<2x8x8x4xf32> to vector<16x8x4xf32>
      %c0_39 = arith.constant 0 : index
      %c0_40 = arith.constant 0 : index
      %c0_41 = arith.constant 0 : index
      %51 = vector.load %arg10[%c0_39, %c0_40, %c0_41] : memref<16x8x4xf32, #tpu.memory_space<vmem>>, vector<16x8x4xf32>
      tpu.vector_store %arg10[%c0_39, %c0_40, %c0_41], %50 {strides = array<i32>} : memref<16x8x4xf32, #tpu.memory_space<vmem>>, vector<16x8x4xf32>,
      %cst_42 = arith.constant 0xFF800000 : f32
      %52 = vector.broadcast %cst_42 : f32 to vector<16x8x1xf32>
      %c0_43 = arith.constant 0 : index
      %c0_44 = arith.constant 0 : index
      %c0_45 = arith.constant 0 : index
      %53 = vector.load %arg11[%c0_43, %c0_44, %c0_45] : memref<16x8x1xf32, #tpu.memory_space<vmem>>, vector<16x8x1xf32>
      tpu.vector_store %arg11[%c0_43, %c0_44, %c0_45], %52 {strides = array<i32>} : memref<16x8x1xf32, #tpu.memory_space<vmem>>, vector<16x8x1xf32>,
      %cst_46 = arith.constant 0.000000e+00 : f32
      %54 = vector.broadcast %cst_46 : f32 to vector<16x8x1xf32>
      %c0_47 = arith.constant 0 : index
      %c0_48 = arith.constant 0 : index
      %c0_49 = arith.constant 0 : index
      %55 = vector.load %arg12[%c0_47, %c0_48, %c0_49] : memref<16x8x1xf32, #tpu.memory_space<vmem>>, vector<16x8x1xf32>
      tpu.vector_store %arg12[%c0_47, %c0_48, %c0_49], %54 {strides = array<i32>} : memref<16x8x1xf32, #tpu.memory_space<vmem>>, vector<16x8x1xf32>,
      %cst_50 = arith.constant 0.000000e+00 : f32
      %56 = vector.broadcast %cst_50 : f32 to vector<16x8x4xf32>
      %c0_51 = arith.constant 0 : index
      %c0_52 = arith.constant 0 : index
      %c0_53 = arith.constant 0 : index
      %57 = vector.load %arg13[%c0_51, %c0_52, %c0_53] : memref<16x8x4xf32, #tpu.memory_space<vmem>>, vector<16x8x4xf32>
      tpu.vector_store %arg13[%c0_51, %c0_52, %c0_53], %56 {strides = array<i32>} : memref<16x8x4xf32, #tpu.memory_space<vmem>>, vector<16x8x4xf32>,
    } else {
    }
    %c0 = arith.constant 0 : index
    %c0_1 = arith.constant 0 : index
    %c0_2 = arith.constant 0 : index
    %3 = vector.load %arg4[%c0, %c0_1, %c0_2] : memref<2x8x32xf32, #tpu.memory_space<vmem>>, vector<2x8x32xf32>
    %4 = vector.shape_cast %3 : vector<2x8x32xf32> to vector<16x32xf32>
    %c0_3 = arith.constant 0 : index
    %c0_4 = arith.constant 0 : index
    %5 = vector.load %arg6[%c0_3, %c0_4] : memref<32x64xf32, #tpu.memory_space<vmem>>, vector<32x64xf32>
    %cst = arith.constant dense<0.000000e+00> : vector<16x64xf32>
    %6 = tpu.matmul %4, %5, %cst {dimension_numbers = #tpu.dot_dimension_numbers<[1], [0], [0], [1], [0, 0, 1, 1], [], []>} : vector<16x32xf32>, vector<32x64xf32>, vector<16x64xf32> -> vector<16x64xf32>
    %7 = vector.extract_strided_slice %6 {offsets = [0, 0], sizes = [16, 32], strides = [1, 1]} : vector<16x64xf32> to vector<16x32xf32>
    %8 = vector.shape_cast %7 : vector<16x32xf32> to vector<2x8x8x4xf32>
    %9 = tpu.transpose %8, [0, 2, 1, 3] : vector<2x8x8x4xf32> -> vector<2x8x8x4xf32>
    %10 = vector.shape_cast %9 : vector<2x8x8x4xf32> to vector<16x8x4xf32>
    %11 = vector.extract_strided_slice %6 {offsets = [0, 32], sizes = [16, 32], strides = [1, 1]} : vector<16x64xf32> to vector<16x32xf32>
    %12 = vector.shape_cast %11 : vector<16x32xf32> to vector<2x8x8x4xf32>
    %13 = tpu.transpose %12, [0, 2, 1, 3] : vector<2x8x8x4xf32> -> vector<2x8x8x4xf32>
    %14 = vector.shape_cast %13 : vector<2x8x8x4xf32> to vector<16x8x4xf32>
    %c0_5 = arith.constant 0 : index
    %c0_6 = arith.constant 0 : index
    %c0_7 = arith.constant 0 : index
    %15 = vector.load %arg10[%c0_5, %c0_6, %c0_7] : memref<16x8x4xf32, #tpu.memory_space<vmem>>, vector<16x8x4xf32>
    "tpu.trace_start"() <{level = 10 : i32, message = "bqd,bkd->bqk"}> : () -> ()
    %cst_8 = arith.constant dense<0.000000e+00> : vector<16x8x8xf32>
    %16 = tpu.matmul %15, %10, %cst_8 {dimension_numbers = #tpu.dot_dimension_numbers<[2], [2], [1], [1], [0, 0, 0, 1, 1, 1], [0], [0]>} : vector<16x8x4xf32>, vector<16x8x4xf32>, vector<16x8x8xf32> -> vector<16x8x8xf32>
    "tpu.trace_stop"() : () -> ()
    %c0_9 = arith.constant 0 : index
    %c0_10 = arith.constant 0 : index
    %c0_11 = arith.constant 0 : index
    %17 = vector.load %arg11[%c0_9, %c0_10, %c0_11] : memref<16x8x1xf32, #tpu.memory_space<vmem>>, vector<16x8x1xf32>
    %cst_12 = arith.constant dense<0xFF800000> : vector<16x8xf32>
    %18 = vector.multi_reduction <maximumf>, %16, %cst_12 [2] : vector<16x8x8xf32> to vector<16x8xf32>
    %19 = vector.shape_cast %18 : vector<16x8xf32> to vector<16x8x1xf32>
    %20 = arith.maximumf %17, %19 : vector<16x8x1xf32>
    %21 = arith.subf %17, %20 : vector<16x8x1xf32>
    %22 = math.exp %21 : vector<16x8x1xf32>
    %23 = vector.broadcast %20 : vector<16x8x1xf32> to vector<16x8x8xf32>
    %24 = arith.subf %16, %23 : vector<16x8x8xf32>
    %25 = math.exp %24 : vector<16x8x8xf32>
    %c0_13 = arith.constant 0 : index
    %c0_14 = arith.constant 0 : index
    %c0_15 = arith.constant 0 : index
    %26 = vector.load %arg12[%c0_13, %c0_14, %c0_15] : memref<16x8x1xf32, #tpu.memory_space<vmem>>, vector<16x8x1xf32>
    %27 = arith.mulf %22, %26 : vector<16x8x1xf32>
    %cst_16 = arith.constant dense<0.000000e+00> : vector<16x8xf32>
    %28 = vector.multi_reduction <add>, %25, %cst_16 [2] : vector<16x8x8xf32> to vector<16x8xf32>
    %29 = vector.shape_cast %28 : vector<16x8xf32> to vector<16x8x1xf32>
    %30 = arith.addf %27, %29 : vector<16x8x1xf32>
    %c0_17 = arith.constant 0 : index
    %c0_18 = arith.constant 0 : index
    %c0_19 = arith.constant 0 : index
    %31 = vector.load %arg12[%c0_17, %c0_18, %c0_19] : memref<16x8x1xf32, #tpu.memory_space<vmem>>, vector<16x8x1xf32>
    tpu.vector_store %arg12[%c0_17, %c0_18, %c0_19], %30 {strides = array<i32>} : memref<16x8x1xf32, #tpu.memory_space<vmem>>, vector<16x8x1xf32>,
    %c0_20 = arith.constant 0 : index
    %c0_21 = arith.constant 0 : index
    %c0_22 = arith.constant 0 : index
    %32 = vector.load %arg13[%c0_20, %c0_21, %c0_22] : memref<16x8x4xf32, #tpu.memory_space<vmem>>, vector<16x8x4xf32>
    %33 = vector.broadcast %22 : vector<16x8x1xf32> to vector<16x8x4xf32>
    %34 = arith.mulf %33, %32 : vector<16x8x4xf32>
    "tpu.trace_start"() <{level = 10 : i32, message = "bqk,bkd->bqd"}> : () -> ()
    %cst_23 = arith.constant dense<0.000000e+00> : vector<16x8x4xf32>
    %35 = tpu.matmul %25, %14, %cst_23 {dimension_numbers = #tpu.dot_dimension_numbers<[2], [1], [1], [2], [0, 0, 0, 1, 1, 2], [0], [0]>} : vector<16x8x8xf32>, vector<16x8x4xf32>, vector<16x8x4xf32> -> vector<16x8x4xf32>
    "tpu.trace_stop"() : () -> ()
    %36 = arith.addf %34, %35 : vector<16x8x4xf32>
    %c0_24 = arith.constant 0 : index
    %c0_25 = arith.constant 0 : index
    %c0_26 = arith.constant 0 : index
    %37 = vector.load %arg13[%c0_24, %c0_25, %c0_26] : memref<16x8x4xf32, #tpu.memory_space<vmem>>, vector<16x8x4xf32>
    tpu.vector_store %arg13[%c0_24, %c0_25, %c0_26], %36 {strides = array<i32>} : memref<16x8x4xf32, #tpu.memory_space<vmem>>, vector<16x8x4xf32>,
    %c0_27 = arith.constant 0 : index
    %c0_28 = arith.constant 0 : index
    %c0_29 = arith.constant 0 : index
    %38 = vector.load %arg11[%c0_27, %c0_28, %c0_29] : memref<16x8x1xf32, #tpu.memory_space<vmem>>, vector<16x8x1xf32>
    tpu.vector_store %arg11[%c0_27, %c0_28, %c0_29], %20 {strides = array<i32>} : memref<16x8x1xf32, #tpu.memory_space<vmem>>, vector<16x8x1xf32>,
    %c0_i32_30 = arith.constant 0 : i32
    %39 = arith.cmpi eq, %arg2, %c0_i32_30 : i32
    %40 = arith.extui %39 : i1 to i32
    %c0_i32_31 = arith.constant 0 : i32
    %41 = arith.cmpi ne, %40, %c0_i32_31 : i32
    scf.if %41 {
      %c0_32 = arith.constant 0 : index
      %c0_33 = arith.constant 0 : index
      %c0_34 = arith.constant 0 : index
      %42 = vector.load %arg13[%c0_32, %c0_33, %c0_34] : memref<16x8x4xf32, #tpu.memory_space<vmem>>, vector<16x8x4xf32>
      %c0_35 = arith.constant 0 : index
      %c0_36 = arith.constant 0 : index
      %c0_37 = arith.constant 0 : index
      %43 = vector.load %arg12[%c0_35, %c0_36, %c0_37] : memref<16x8x1xf32, #tpu.memory_space<vmem>>, vector<16x8x1xf32>
      %44 = tpu.reciprocal %43 : vector<16x8x1xf32> -> vector<16x8x1xf32>
      %45 = vector.broadcast %44 : vector<16x8x1xf32> to vector<16x8x4xf32>
      %46 = arith.mulf %42, %45 : vector<16x8x4xf32>
      %47 = vector.shape_cast %46 : vector<16x8x4xf32> to vector<2x8x8x4xf32>
      %48 = tpu.transpose %47, [0, 2, 1, 3] : vector<2x8x8x4xf32> -> vector<2x8x8x4xf32>
      %49 = vector.shape_cast %48 : vector<2x8x8x4xf32> to vector<16x32xf32>
      %c0_38 = arith.constant 0 : index
      %c0_39 = arith.constant 0 : index
      %50 = vector.load %arg7[%c0_38, %c0_39] : memref<32x32xf32, #tpu.memory_space<vmem>>, vector<32x32xf32>
      %cst_40 = arith.constant dense<0.000000e+00> : vector<16x32xf32>
      %51 = tpu.matmul %49, %50, %cst_40 {dimension_numbers = #tpu.dot_dimension_numbers<[1], [0], [0], [1], [0, 0, 1, 1], [], []>} : vector<16x32xf32>, vector<32x32xf32>, vector<16x32xf32> -> vector<16x32xf32>
      %c0_41 = arith.constant 0 : index
      %c0_42 = arith.constant 0 : index
      %52 = vector.load %arg8[%c0_41, %c0_42] : memref<1x32xf32, #tpu.memory_space<vmem>>, vector<1x32xf32>
      %53 = vector.broadcast %52 : vector<1x32xf32> to vector<16x32xf32>
      %54 = arith.addf %51, %53 : vector<16x32xf32>
      %55 = vector.shape_cast %54 : vector<16x32xf32> to vector<2x8x32xf32>
      %c0_43 = arith.constant 0 : index
      %c0_44 = arith.constant 0 : index
      %c0_45 = arith.constant 0 : index
      %56 = vector.load %arg9[%c0_43, %c0_44, %c0_45] : memref<2x8x32xf32, #tpu.memory_space<vmem>>, vector<2x8x32xf32>
      tpu.vector_store %arg9[%c0_43, %c0_44, %c0_45], %55 {strides = array<i32>} : memref<2x8x32xf32, #tpu.memory_space<vmem>>, vector<2x8x32xf32>,
    } else {
    }
    return
  }
  func.func @transform_0(%arg0: i32, %arg1: i32, %arg2: i32) -> (i32, i32, i32) {
    %c0_i32 = arith.constant 0 : i32
    %c0_i32_0 = arith.constant 0 : i32
    return %arg0, %arg1, %c0_i32 : i32, i32, i32
  }
  func.func @transform_1(%arg0: i32, %arg1: i32, %arg2: i32) -> (i32, i32, i32) {
    %c0_i32 = arith.constant 0 : i32
    %c0_i32_0 = arith.constant 0 : i32
    return %arg0, %arg2, %c0_i32 : i32, i32, i32
  }
  func.func @transform_2(%arg0: i32, %arg1: i32, %arg2: i32) -> (i32, i32) {
    %c0_i32 = arith.constant 0 : i32
    %c0_i32_0 = arith.constant 0 : i32
    %c0_i32_1 = arith.constant 0 : i32
    return %c0_i32, %c0_i32_0 : i32, i32
  }
  func.func @transform_3(%arg0: i32, %arg1: i32, %arg2: i32) -> (i32, i32) {
    %c0_i32 = arith.constant 0 : i32
    %c0_i32_0 = arith.constant 0 : i32
    %c0_i32_1 = arith.constant 0 : i32
    return %c0_i32, %c0_i32_0 : i32, i32
  }
  func.func @transform_4(%arg0: i32, %arg1: i32, %arg2: i32) -> (i32, i32) {
    %c0_i32 = arith.constant 0 : i32
    %c0_i32_0 = arith.constant 0 : i32
    %c0_i32_1 = arith.constant 0 : i32
    return %c0_i32, %c0_i32_0 : i32, i32
  }
  func.func @transform_5(%arg0: i32, %arg1: i32, %arg2: i32) -> (i32, i32) {
    %c0_i32 = arith.constant 0 : i32
    %c0_i32_0 = arith.constant 0 : i32
    %c0_i32_1 = arith.constant 0 : i32
    return %c0_i32, %c0_i32_0 : i32, i32
  }
  func.func @transform_6(%arg0: i32, %arg1: i32, %arg2: i32) -> (i32, i32, i32) {
    %c0_i32 = arith.constant 0 : i32
    %c0_i32_0 = arith.constant 0 : i32
    return %arg0, %arg1, %c0_i32 : i32, i32, i32
  }
}

</mosaic_0001>

<bundles_post_ra>
// kernel: tpu_custom_call.1
= control target key start
LH: loop header
LB: loop body
LE: loop exit
PB: predicated region body
PF: predicated region fallthrough
CT: control target
= control target key end

     0   :  { %11 = vsyncpa [#allocation7], 0  ;;  %s8012_s0 = inlined_call_operand.hbm [shape: f32[2,8,32], index: 0, kind: input, shape index: {}]   ;;  %s8013_s1 = inlined_call_operand.hbm [shape: f32[2,8,32], index: 1, kind: input, shape index: {}]   ;;  %s8014_s2 = inlined_call_operand.hbm [shape: f32[32,32], index: 2, kind: input, shape index: {}]   ;;  %s8015_s3 = inlined_call_operand.hbm [shape: f32[32,64], index: 3, kind: input, shape index: {}]   ;;  %s8016_s4 = inlined_call_operand.hbm [shape: f32[32,32], index: 4, kind: input, shape index: {}]   ;;  %s8017_s5 = inlined_call_operand.vmem [shape: f32[1,32], index: 5, kind: input, shape index: {}]   ;;  %s8018_s6 = inlined_call_operand.hbm [shape: f32[2,8,32], index: 6, kind: output, shape index: {}]  }
   0x1   :  { %12 = vsyncpa [#allocation10], 0 }
   0x2   :  { %13 = vsyncpa [#allocation13], 0 }
   0x3   :  { %14 = vsyncpa [#allocation8], 0  ;;  %s6602_s21 = smov [#allocation9]   ;;  %s6603_s23 = smov [#allocation12]  }
   0x4   :  { %s32_s22 = sshll.u32 %s6602_s21, 4  ;;  %s56_s24 = sshll.u32 %s6603_s23, 4  ;;  %s33_s22 = int_to_ptr.vmem [resolvable:$true] %s32_s22  ;;  %s6665_s24 = int_to_ptr.vmem [resolvable:$true] %s56_s24 }
   0x5   :  { %s6462_s27 = scalar_lea.hbm %s8013_s1, 256 }
   0x6   :  { %p6463_p0 = scmp.ne.s32.totalorder %s8013_s1, %s6462_s27  ;;  %p6466_p1 = scmp.lt.u32.totalorder %s6462_s27, %s8013_s1 }
   0x8   :  { %p6468_p2 = pnand %p6466_p1, %p6463_p0 }
   0xa   :  { %6471 = shalt.err (!%p6468_p2)
}
   0xb   :  { %s6472_s8 = scalar_lea.vmem %s33_s22, 256  ;;  %p6477_p4 = scmp.lt.s32.totalorder %s33_s22, %s33_s22 }
   0xc   :  { %p6473_p3 = scmp.ne.s32.totalorder %s33_s22, %s6472_s8  ;;  %p6478_p5 = scmp.lt.s32.totalorder %s6472_s8, %s6472_s8 }
   0xe   :  { %p6479_p6 = por %p6478_p5, %p6477_p4 }
  0x10   :  { %p6480_p7 = pnand %p6479_p6, %p6473_p3 }
  0x12   :  { %6483 = shalt.err (!%p6480_p7)
}
  0x13   :  { %s6604_s9 = smov 128   ;;  %s6605_s10 = smov 8  }
  0x14   :  { %38 = dma.hbm_to_vmem [thread:$0]  %s8013_s1, 256, %s33_s22, [#allocation10], %s6604_s9, %s6604_s9, %s6605_s10  }
  0x15   :  { %s6484_s15 = scalar_lea.hbm %s8015_s3, 512 }
  0x16   :  { %p6485_p8 = scmp.ne.s32.totalorder %s8015_s3, %s6484_s15  ;;  %p6488_p9 = scmp.lt.u32.totalorder %s6484_s15, %s8015_s3 }
  0x18   :  { %p6490_p10 = pnand %p6488_p9, %p6485_p8 }
  0x1a   :  { %6493 = shalt.err (!%p6490_p10)
}
  0x1b   :  { %s6494_s20 = scalar_lea.vmem %s6665_s24, 512  ;;  %p6499_p12 = scmp.lt.s32.totalorder %s6665_s24, %s6665_s24 }
  0x1c   :  { %p6495_p11 = scmp.ne.s32.totalorder %s6665_s24, %s6494_s20  ;;  %p6500_p13 = scmp.lt.s32.totalorder %s6494_s20, %s6494_s20 }
  0x1e   :  { %p6501_p0 = por %p6500_p13, %p6499_p12 }
  0x20   :  { %p6502_p1 = pnand %p6501_p0, %p6495_p11 }
  0x22   :  { %6505 = shalt.err (!%p6502_p1)
}
  0x23   :  { %62 = dma.hbm_to_vmem [thread:$0]  %s8015_s3, 512, %s6665_s24, [#allocation13], %s6604_s9, %s6604_s9, %s6605_s10  }
  0x24   :  { %s6606_s22 = smov [#allocation6]   ;;  %s6607_s25 = smov [#allocation11]  }
  0x25   :  { %s20_s23 = sshll.u32 %s6606_s22, 4  ;;  %s44_s26 = sshll.u32 %s6607_s25, 4  ;;  %s21_s23 = int_to_ptr.vmem [resolvable:$true] %s20_s23  ;;  %s6702_s26 = int_to_ptr.vmem [resolvable:$true] %s44_s26 }
  0x26   :  { %s6506_s29 = scalar_lea.hbm %s8012_s0, 256 }
  0x27   :  { %p6507_p2 = scmp.ne.s32.totalorder %s8012_s0, %s6506_s29  ;;  %p6510_p3 = scmp.lt.u32.totalorder %s6506_s29, %s8012_s0 }
  0x29   :  { %p6512_p4 = pnand %p6510_p3, %p6507_p2 }
  0x2b   :  { %6515 = shalt.err (!%p6512_p4)
}
  0x2c   :  { %s6516_s3 = scalar_lea.vmem %s21_s23, 256  ;;  %p6521_p6 = scmp.lt.s32.totalorder %s21_s23, %s21_s23 }
  0x2d   :  { %p6517_p5 = scmp.ne.s32.totalorder %s21_s23, %s6516_s3  ;;  %p6522_p7 = scmp.lt.s32.totalorder %s6516_s3, %s6516_s3 }
  0x2f   :  { %p6523_p8 = por %p6522_p7, %p6521_p6 }
  0x31   :  { %p6524_p9 = pnand %p6523_p8, %p6517_p5 }
  0x33   :  { %6527 = shalt.err (!%p6524_p9)
}
  0x34   :  { %26 = dma.hbm_to_vmem [thread:$0]  %s8012_s0, 256, %s21_s23, [#allocation7], %s6604_s9, %s6604_s9, %s6605_s10  }
  0x35   :  { %s6528_s15 = scalar_lea.hbm %s8014_s2, 512 }
  0x36   :  { %p6529_p10 = scmp.ne.s32.totalorder %s8014_s2, %s6528_s15  ;;  %p6532_p11 = scmp.lt.u32.totalorder %s6528_s15, %s8014_s2 }
  0x38   :  { %p6534_p12 = pnand %p6532_p11, %p6529_p10 }
  0x3a   :  { %6537 = shalt.err (!%p6534_p12)
}
  0x3b   :  { %s6538_s20 = scalar_lea.vmem %s6702_s26, 512  ;;  %p6543_p0 = scmp.lt.s32.totalorder %s6702_s26, %s6702_s26 }
  0x3c   :  { %p6539_p13 = scmp.ne.s32.totalorder %s6702_s26, %s6538_s20  ;;  %p6544_p1 = scmp.lt.s32.totalorder %s6538_s20, %s6538_s20 }
  0x3e   :  { %p6545_p2 = por %p6544_p1, %p6543_p0 }
  0x40   :  { %p6546_p3 = pnand %p6545_p2, %p6539_p13 }
  0x42   :  { %6549 = shalt.err (!%p6546_p3)
}
  0x43   :  { %50 = dma.hbm_to_vmem [thread:$0]  %s8014_s2, 512, %s6702_s26, [#allocation10], %s6604_s9, %s6604_s9, %s6605_s10  }
  0x44   :  { %s6608_s21 = smov [#allocation14]   ;;  %s6550_s27 = scalar_lea.hbm %s8016_s4, 512 }
  0x45   :  { %s68_s22 = sshll.u32 %s6608_s21, 4  ;;  %p6551_p4 = scmp.ne.s32.totalorder %s8016_s4, %s6550_s27  ;;  %s69_s22 = int_to_ptr.vmem [resolvable:$true] %s68_s22 }
  0x46   :  { %p6554_p5 = scmp.lt.u32.totalorder %s6550_s27, %s8016_s4 }
  0x48   :  { %p6556_p6 = pnand %p6554_p5, %p6551_p4 }
  0x4a   :  { %6559 = shalt.err (!%p6556_p6)
}
  0x4b   :  { %s6560_s8 = scalar_lea.vmem %s69_s22, 512  ;;  %p6565_p8 = scmp.lt.s32.totalorder %s69_s22, %s69_s22 }
  0x4c   :  { %p6561_p7 = scmp.ne.s32.totalorder %s69_s22, %s6560_s8  ;;  %p6566_p9 = scmp.lt.s32.totalorder %s6560_s8, %s6560_s8 }
  0x4e   :  { %p6567_p10 = por %p6566_p9, %p6565_p8 }
  0x50   :  { %p6568_p11 = pnand %p6567_p10, %p6561_p7 }
  0x52   :  { %6571 = shalt.err (!%p6568_p11)
}
  0x53   :  { %74 = dma.hbm_to_vmem [thread:$0]  %s8016_s4, 512, %s69_s22, [#allocation13], %s6604_s9, %s6604_s9, %s6605_s10  }
  0x54   :  { %6594 = dma.done.wait [#allocation7], 256  }
  0x55   :  { %6595 = vsyncadd [#allocation7], 4294967040 }
  0x56   :  { %6596 = dma.done.wait [#allocation10], 768  }
  0x57   :  { %6597 = vsyncadd [#allocation10], 4294966528 }
  0x58   :  { %6598 = dma.done.wait [#allocation13], 1024  }
  0x59   :  { %6599 = vsyncadd [#allocation13], 4294966272  ;;  %vm102_vm0 = vcmask 261120   ;;  %v842_v0 = vld [vmem:[#allocation12] sm:$0xff]  ;;  %v843_v1 = vld [vmem:[#allocation12 + $0x8] sm:$0xff]  ;;  %s6609_s4 = smov 120   ;;  %v235_v25 = vlaneseq }
  0x5a   :  { %v844_v2 = vld [vmem:[#allocation12 + $0x10] sm:$0xff]  ;;  %v6320_v3 = vpack.c.bf16 %v843_v1, %v842_v0  ;;  %v845_v4 = vld [vmem:[#allocation12 + $0x18] sm:$0xff]  ;;  %v98_v7 = vld [vmem:[#allocation11] sm:$0xff]  ;;  %s6610_s11 = smov 124   ;;  %s6611_s3 = smov 112   ;;  %vm774_vm1 = vcmask 31744  }
  0x5b   :  { %v840_v5 = vld [vmem:[#allocation9] sm:$0xff]  ;;  %v6324_v6 = vpack.c.bf16 %v845_v4, %v844_v2  ;;  %v99_v8 = vld [vmem:[#allocation11 + $0x8] sm:$0xff]  ;;  %v101_v11 = vld [vmem:[#allocation11 + $0x18] sm:$0xff]  ;;  %s6612_s24 = smov 116   ;;  %s6613_s12 = smov 104   ;;  %v8019_v21 = vmov 0.0  }
  0x5c   :  { %6138 = vmatprep.mubr.msk.f32.mxu1 %vm102_vm0, %v840_v5  ;;  %v100_v9 = vld [vmem:[#allocation11 + $0x10] sm:$0xff]  ;;  %6321 = vmatprep.subr.bf16.mxu1 %v6320_v3  ;;  %v6312_v10 = vpack.c.bf16 %v99_v8, %v98_v7  ;;  %v96_v12 = vld [vmem:[#allocation6] sm:$0xff]  ;;  %v841_v14 = vld [vmem:[#allocation9 + $0x8] sm:$0xff]  ;;  %s6614_s13 = smov 108   ;;  %s6615_s14 = smov 100   ;;  %824 = vst.msk [vmem:[#allocation5] sm:$0xff] %vm774_vm1, %v8019_v21 }
  0x5d   :  { %6323 = vmatpush3.bf16.msra.mxu1 %v6320_v3  ;;  %v6316_v13 = vpack.c.bf16 %v101_v11, %v100_v9  ;;  %6127 = vmatprep.mubr.msk.f32.mxu0 %vm102_vm0, %v96_v12  ;;  %v97_v15 = vld [vmem:[#allocation6 + $0x8] sm:$0xff]  ;;  %825 = vst.msk [vmem:[#allocation5 + $0x8] sm:$0xff] %vm774_vm1, %v8019_v21  ;;  %826 = vst.msk [vmem:[#allocation5 + $0x10] sm:$0xff] %vm774_vm1, %v8019_v21  ;;  %vm6617_vm2 = vmmov 0   ;;  %s6618_s15 = smov 96   ;;  %v236_v29 = vshrl.u32 %v235_v25, 7 }
  0x5e   :  { %6325 = vmatprep.subr.bf16.mxu1 %v6324_v6  ;;  %6313 = vmatprep.subr.bf16.mxu0 %v6312_v10  ;;  %827 = vst.msk [vmem:[#allocation5 + $0x18] sm:$0xff] %vm774_vm1, %v8019_v21  ;;  %828 = vst.msk [vmem:[#allocation5 + $0x20] sm:$0xff] %vm774_vm1, %v8019_v21  ;;  %v6619_v23 = vmov 1983009808   ;;  %v6620_v26 = vmov 1934713408  }
  0x5f   :  { %6315 = vmatpush3.bf16.msra.mxu0 %v6312_v10  ;;  %829 = vst.msk [vmem:[#allocation5 + $0x28] sm:$0xff] %vm774_vm1, %v8019_v21  ;;  %830 = vst.msk [vmem:[#allocation5 + $0x30] sm:$0xff] %vm774_vm1, %v8019_v21  ;;  %v233_v24 = vunpack.c.l.s4 %v6619_v23  ;;  %v297_v27 = vunpack.c.l.s4 %v6620_v26  ;;  %vm791_vm3 = vcmask 7168   ;;  %vm3357_vm4 = vcmask 64512   ;;  %s6623_s16 = smov 4   ;;  %s6624_s17 = smov 12  }
  0x60   :  { %6317 = vmatprep.subr.bf16.mxu0 %v6316_v13  ;;  %831 = vst.msk [vmem:[#allocation5 + $0x38] sm:$0xff] %vm774_vm1, %v8019_v21  ;;  %832 = vst.msk [vmem:[#allocation5 + $0x40] sm:$0xff] %vm774_vm1, %v8019_v21  ;;  %s6625_s18 = smov 16   ;;  %s6626_s19 = smov 20   ;;  %vm5790_vm5 = vcmask 97280   ;;  %vm5793_vm6 = vcmask 130048  }
  0x61   :  { %6327 = vmatpush3.bf16.msra.mxu1 %v6324_v6  ;;  %833 = vst.msk [vmem:[#allocation5 + $0x48] sm:$0xff] %vm774_vm1, %v8019_v21  ;;  %834 = vst.msk [vmem:[#allocation5 + $0x50] sm:$0xff] %vm774_vm1, %v8019_v21  ;;  %v234_v28 = vunpack.c.0.s8 %v233_v24  ;;  %v298_v32 = vunpack.c.0.s8 %v297_v27  ;;  %s6627_s20 = smov 24   ;;  %s6628_s0 = smov 28   ;;  %vm5796_vm7 = vcmask 162816   ;;  %vm5799_vm8 = vcmask 195584  }
  0x62   :  { %6141 = vmatprep.subr.mxu1 %v8019_v21  ;;  %835 = vst.msk [vmem:[#allocation5 + $0x58] sm:$0xff] %vm774_vm1, %v8019_v21  ;;  %836 = vst.msk [vmem:[#allocation5 + $0x60] sm:$0xff] %vm774_vm1, %v8019_v21  ;;  %vm5802_vm9 = vcmask 228352   ;;  %s6629_s22 = smov [#allocation15]  }
  0x63   :  { %6319 = vmatpush3.bf16.msra.mxu0 %v6316_v13  ;;  %837 = vst.msk [vmem:[#allocation5 + $0x68] sm:$0xff] %vm774_vm1, %v8019_v21  ;;  %838 = vst.msk [vmem:[#allocation5 + $0x70] sm:$0xff] %vm774_vm1, %v8019_v21  ;;  %v6863_v33 = vsub.s32 %v234_v28, %v236_v29  ;;  %v6870_v40 = vsub.s32 %v298_v32, %v236_v29  ;;  %s5904_s23 = sshll.u32 %s6629_s22, 4  ;;  %s5905_s23 = int_to_ptr.vmem [resolvable:$true] %s5904_s23 }
  0x64   :  { %6139 = vmatmul.mubr.msk.f32.vlgmr.msra.gmra.mrb[0].mxu1 %vm102_vm0, %v841_v14  ;;  %839 = vst.msk [vmem:[#allocation5 + $0x78] sm:$0xff] %vm774_vm1, %v8019_v21  ;;  %6151 = vmatprep.subr.mxu0 %v8019_v21  ;;  %s6572_s25 = scalar_lea.vmem %s5905_s23, 256  ;;  %p6577_p13 = scmp.lt.s32.totalorder %s5905_s23, %s5905_s23 }
  0x65   :  { %6143 = vmatprep.mubr.msk.f32.mxu1 %vm6617_vm2, %v8019_v21  ;;  %808 = vst.msk [vmem:[#allocation4] sm:$0xff] %vm791_vm3, %v8019_v21  ;;  %809 = vst.msk [vmem:[#allocation4 + $0x8] sm:$0xff] %vm791_vm3, %v8019_v21  ;;  %p6573_p12 = scmp.ne.s32.totalorder %s5905_s23, %s6572_s25  ;;  %p6578_p0 = scmp.lt.s32.totalorder %s6572_s25, %s6572_s25 }
  0x66   :  { %6128 = vmatmul.mubr.msk.f32.vlgmr.msra.gmra.mrb[0].mxu0 %vm102_vm0, %v97_v15  ;;  %810 = vst.msk [vmem:[#allocation4 + $0x10] sm:$0xff] %vm791_vm3, %v8019_v21  ;;  %811 = vst.msk [vmem:[#allocation4 + $0x18] sm:$0xff] %vm791_vm3, %v8019_v21 }
  0x67   :  { %6153 = vmatprep.mubr.msk.f32.mxu0 %vm6617_vm2, %v8019_v21  ;;  %812 = vst.msk [vmem:[#allocation4 + $0x20] sm:$0xff] %vm791_vm3, %v8019_v21  ;;  %813 = vst.msk [vmem:[#allocation4 + $0x28] sm:$0xff] %vm791_vm3, %v8019_v21  ;;  %p6579_p1 = por %p6578_p0, %p6577_p13 }
  0x68   :  { %814 = vst.msk [vmem:[#allocation4 + $0x30] sm:$0xff] %vm791_vm3, %v8019_v21  ;;  %815 = vst.msk [vmem:[#allocation4 + $0x38] sm:$0xff] %vm791_vm3, %v8019_v21 }
  0x69   :  { %816 = vst.msk [vmem:[#allocation4 + $0x40] sm:$0xff] %vm791_vm3, %v8019_v21  ;;  %817 = vst.msk [vmem:[#allocation4 + $0x48] sm:$0xff] %vm791_vm3, %v8019_v21  ;;  %p6580_p2 = pnand %p6579_p1, %p6573_p12 }
  0x6a   :  { %818 = vst.msk [vmem:[#allocation4 + $0x50] sm:$0xff] %vm791_vm3, %v8019_v21  ;;  %819 = vst.msk [vmem:[#allocation4 + $0x58] sm:$0xff] %vm791_vm3, %v8019_v21 }
  0x6b   :  { %820 = vst.msk [vmem:[#allocation4 + $0x60] sm:$0xff] %vm791_vm3, %v8019_v21  ;;  %821 = vst.msk [vmem:[#allocation4 + $0x68] sm:$0xff] %vm791_vm3, %v8019_v21 }
  0x6c   :  { %822 = vst.msk [vmem:[#allocation4 + $0x70] sm:$0xff] %vm791_vm3, %v8019_v21  ;;  %823 = vst.msk [vmem:[#allocation4 + $0x78] sm:$0xff] %vm791_vm3, %v8019_v21 }
 0x137   :  { %v6758_v16 = vpop.f32.mrb[0].mxu1 }
 0x138   :  { %v6760_v17 = vpop.f32.mrb[1].mxu1 }
 0x139   :  { %936 = vrot.lane.b32.xlu0 %v6760_v17, %s6609_s4  ;;  %930 = vrot.lane.b32.xlu1 %v6760_v17, %s6610_s11  ;;  %v6129_v18 = vpop.f32.mrb[0].mxu0 }
 0x13a   :  { %v175_v19 = vpop.f32.mrb[1].mxu0  ;;  %v6818_v22 = vmul.f32 0.17677669, %v6129_v18 }
 0x13b   :  { %v6774_v20 = vmul.f32 0.17677669, %v175_v19 }
 0x13d   :  { %948 = vrot.lane.b32.xlu0 %v6760_v17, %s6611_s3  ;;  %942 = vrot.lane.b32.xlu1 %v6760_v17, %s6612_s24 }
 0x141   :  { %960 = vrot.lane.b32.xlu0 %v6760_v17, %s6613_s12  ;;  %954 = vrot.lane.b32.xlu1 %v6760_v17, %s6614_s13 }
 0x145   :  { %966 = vrot.lane.b32.xlu1 %v6760_v17, %s6615_s14  ;;  %188 = vrot.lane.b32.xlu0 %v6774_v20, %s6610_s11 }
 0x149   :  { %200 = vrot.lane.b32.xlu1 %v6774_v20, %s6612_s24  ;;  %194 = vrot.lane.b32.xlu0 %v6774_v20, %s6609_s4 }
 0x14d   :  { %196 = vrot.lane.b32.xlu1 %v6818_v22, %s6609_s4  ;;  %190 = vrot.lane.b32.xlu0 %v6818_v22, %s6610_s11 }
 0x151   :  { %212 = vrot.lane.b32.xlu1 %v6774_v20, %s6614_s13  ;;  %206 = vrot.lane.b32.xlu0 %v6774_v20, %s6611_s3 }
 0x155   :  { %224 = vrot.lane.b32.xlu1 %v6774_v20, %s6615_s14  ;;  %218 = vrot.lane.b32.xlu0 %v6774_v20, %s6613_s12 }
 0x159   :  { %932 = vrot.lane.b32.xlu1 %v6758_v16, %s6610_s11  ;;  %202 = vrot.lane.b32.xlu0 %v6818_v22, %s6612_s24 }
 0x15d   :  { %944 = vrot.lane.b32.xlu1 %v6758_v16, %s6612_s24  ;;  %938 = vrot.lane.b32.xlu0 %v6758_v16, %s6609_s4 }
 0x161   :  { %214 = vrot.lane.b32.xlu1 %v6818_v22, %s6614_s13  ;;  %208 = vrot.lane.b32.xlu0 %v6818_v22, %s6611_s3 }
 0x165   :  { %226 = vrot.lane.b32.xlu1 %v6818_v22, %s6615_s14  ;;  %220 = vrot.lane.b32.xlu0 %v6818_v22, %s6613_s12 }
 0x169   :  { %956 = vrot.lane.b32.xlu1 %v6758_v16, %s6614_s13  ;;  %950 = vrot.lane.b32.xlu0 %v6758_v16, %s6611_s3 }
 0x16d   :  { %968 = vrot.lane.b32.xlu1 %v6758_v16, %s6615_s14  ;;  %962 = vrot.lane.b32.xlu0 %v6758_v16, %s6613_s12 }
 0x171   :  { %1516 = vrot.lane.b32.xlu1 %v6760_v17, %s6618_s15 }
 0x1ab   :  { %v937_v30 = vpop.permute.xlu0 %936  ;;  %v931_v31 = vpop.permute.xlu1 %930 }
 0x1ac   :  { %1520 = vrot.lane.b32.xlu1 %v931_v31, %s6618_s15  ;;  %v972_v34 = vcombine.low %v6760_v17, %v937_v30  ;;  %v973_v35 = vcombine.high %v6760_v17, %v937_v30 }
 0x1ae   :  { %v980_v41 = vrot.slane %v972_v34, %v6863_v33  ;;  %v987_v42 = vrot.slane %v973_v35, %v6863_v33 }
 0x1af   :  { %v6867_v36 = vpop.permute.xlu0 %948  ;;  %v943_v37 = vpop.permute.xlu1 %942 }
 0x1b0   :  { %v988_v38 = vcombine.low %v931_v31, %v943_v37  ;;  %v989_v39 = vcombine.high %v931_v31, %v943_v37  ;;  %1524 = vrot.lane.b32.xlu1 %v937_v30, %s6618_s15 }
 0x1b2   :  { %v996_v43 = vrot.slane %v988_v38, %v6863_v33  ;;  %v1003_v44 = vrot.slane %v989_v39, %v6863_v33 }
 0x1b3   :  { %v6876_v45 = vpop.permute.xlu0 %960  ;;  %v6878_v46 = vpop.permute.xlu1 %954 }
 0x1b4   :  { %v1036_v47 = vcombine.low %v980_v41, %v996_v43  ;;  %v1037_v48 = vcombine.high %v980_v41, %v996_v43  ;;  %v1052_v49 = vcombine.low %v987_v42, %v1003_v44  ;;  %v1053_v50 = vcombine.high %v987_v42, %v1003_v44  ;;  %1528 = vrot.lane.b32.xlu1 %v943_v37, %s6618_s15 }
 0x1b5   :  { %v1004_v51 = vcombine.low %v6867_v36, %v6876_v45  ;;  %v1005_v52 = vcombine.high %v6867_v36, %v6876_v45 }
 0x1b6   :  { %v1044_v53 = vrot.slane %v1036_v47, %v6870_v40  ;;  %v1051_v54 = vrot.slane %v1037_v48, %v6870_v40  ;;  %v1060_v55 = vrot.slane %v1052_v49, %v6870_v40  ;;  %v1067_v56 = vrot.slane %v1053_v50, %v6870_v40 }
 0x1b7   :  { %v6889_v57 = vpop.permute.xlu1 %966  ;;  %v189_v58 = vpop.permute.xlu0 %188  ;;  %v1012_v3 = vrot.slane %v1004_v51, %v6863_v33  ;;  %v1019_v4 = vrot.slane %v1005_v52, %v6863_v33 }
 0x1b8   :  { %v5938_v59 = vcombine.low %v1044_v53, %v1051_v54  ;;  %v5940_v60 = vcombine.high %v1044_v53, %v1051_v54  ;;  %v5942_v61 = vcombine.low %v1060_v55, %v1067_v56  ;;  %v5944_v62 = vcombine.high %v1060_v55, %v1067_v56 }
 0x1b9   :  { %v1020_v63 = vcombine.low %v6878_v46, %v6889_v57  ;;  %v1021_v0 = vcombine.high %v6878_v46, %v6889_v57 }
 0x1ba   :  { %v6896_v1 = vrot.slane %v5938_v59, %v6863_v33  ;;  %v6899_v2 = vrot.slane %v5940_v60, %v6863_v33  ;;  %v6904_v5 = vrot.slane %v5942_v61, %v6863_v33  ;;  %v6907_v6 = vrot.slane %v5944_v62, %v6863_v33 }
 0x1bb   :  { %v1028_v7 = vrot.slane %v1020_v63, %v6863_v33  ;;  %v1035_v8 = vrot.slane %v1021_v0, %v6863_v33  ;;  %v201_v9 = vpop.permute.xlu1 %200  ;;  %v195_v10 = vpop.permute.xlu0 %194 }
 0x1bc   :  { %v246_v11 = vcombine.low %v189_v58, %v201_v9  ;;  %v247_v12 = vcombine.high %v189_v58, %v201_v9  ;;  %v230_v13 = vcombine.low %v6774_v20, %v195_v10  ;;  %v231_v14 = vcombine.high %v6774_v20, %v195_v10 }
 0x1bd   :  { %v1068_v15 = vcombine.low %v1012_v3, %v1028_v7  ;;  %v1069_v17 = vcombine.high %v1012_v3, %v1028_v7  ;;  %v1084_v18 = vcombine.low %v1019_v4, %v1035_v8  ;;  %v1085_v19 = vcombine.high %v1019_v4, %v1035_v8 }
 0x1be   :  { %v254_v23 = vrot.slane %v246_v11, %v6863_v33  ;;  %v261_v24 = vrot.slane %v247_v12, %v6863_v33  ;;  %v238_v25 = vrot.slane %v230_v13, %v6863_v33  ;;  %v245_v26 = vrot.slane %v231_v14, %v6863_v33 }
 0x1bf   :  { %v1076_v27 = vrot.slane %v1068_v15, %v6870_v40  ;;  %v1083_v28 = vrot.slane %v1069_v17, %v6870_v40  ;;  %v1092_v29 = vrot.slane %v1084_v18, %v6870_v40  ;;  %v1099_v20 = vrot.slane %v1085_v19, %v6870_v40  ;;  %v197_v30 = vpop.permute.xlu1 %196  ;;  %v6921_v31 = vpop.permute.xlu0 %190 }
 0x1c0   :  { %v294_v32 = vcombine.low %v238_v25, %v254_v23  ;;  %v295_v34 = vcombine.high %v238_v25, %v254_v23  ;;  %v310_v35 = vcombine.low %v245_v26, %v261_v24  ;;  %v311_v37 = vcombine.high %v245_v26, %v261_v24 }
 0x1c1   :  { %v5939_v38 = vcombine.low %v1076_v27, %v1083_v28  ;;  %v5941_v39 = vcombine.high %v1076_v27, %v1083_v28  ;;  %v5943_v41 = vcombine.low %v1092_v29, %v1099_v20  ;;  %v5945_v42 = vcombine.high %v1092_v29, %v1099_v20 }
 0x1c2   :  { %v302_v43 = vrot.slane %v294_v32, %v6870_v40  ;;  %v309_v44 = vrot.slane %v295_v34, %v6870_v40  ;;  %v318_v47 = vrot.slane %v310_v35, %v6870_v40  ;;  %v325_v48 = vrot.slane %v311_v37, %v6870_v40 }
 0x1c3   :  { %v6928_v49 = vrot.slane %v5939_v38, %v6863_v33  ;;  %v6931_v50 = vrot.slane %v5941_v39, %v6863_v33  ;;  %v6934_v51 = vrot.slane %v5943_v41, %v6863_v33  ;;  %v6937_v52 = vrot.slane %v5945_v42, %v6863_v33  ;;  %v213_v53 = vpop.permute.xlu1 %212  ;;  %v207_v54 = vpop.permute.xlu0 %206 }
 0x1c4   :  { %v5920_v55 = vcombine.low %v302_v43, %v309_v44  ;;  %v5922_v56 = vcombine.high %v302_v43, %v309_v44  ;;  %v5924_v58 = vcombine.low %v318_v47, %v325_v48  ;;  %v5926_v59 = vcombine.high %v318_v47, %v325_v48 }
 0x1c5   :  { %v366_v60 = vcombine.low %v6818_v22, %v197_v30  ;;  %v367_v61 = vcombine.high %v6818_v22, %v197_v30  ;;  %v1308_v62 = vcombine.low %v6896_v1, %v6899_v2  ;;  %v1340_v63 = vcombine.low %v6904_v5, %v6907_v6 }
 0x1c6   :  { %v510_v0 = vrot.slane %v5920_v55, %v6863_v33  ;;  %v526_v3 = vrot.slane %v5922_v56, %v6863_v33  ;;  %v542_v4 = vrot.slane %v5924_v58, %v6863_v33  ;;  %v558_v7 = vrot.slane %v5926_v59, %v6863_v33 }
 0x1c7   :  { %v6950_v8 = vrot.slane %v366_v60, %v6863_v33  ;;  %v6953_v9 = vrot.slane %v367_v61, %v6863_v33  ;;  %v6956_v22 = vrot.slane %v1308_v62, %v6870_v40  ;;  %v6959_v10 = vrot.slane %v1340_v63, %v6870_v40  ;;  %v225_v11 = vpop.permute.xlu1 %224  ;;  %v219_v12 = vpop.permute.xlu0 %218 }
 0x1c8   :  { %v566_v13 = vcombine.low %v510_v0, %v526_v3  ;;  %v567_v14 = vcombine.high %v510_v0, %v526_v3  ;;  %v598_v15 = vcombine.low %v542_v4, %v558_v7  ;;  %v599_v17 = vcombine.high %v542_v4, %v558_v7 }
 0x1c9   :  { %v1372_v18 = vcombine.low %v6956_v22, %v6959_v10  ;;  %v1309_v19 = vcombine.high %v6896_v1, %v6899_v2  ;;  %v1341_v23 = vcombine.high %v6904_v5, %v6907_v6  ;;  %v278_v24 = vcombine.low %v213_v53, %v225_v11 }
 0x1ca   :  { %v574_v25 = vrot.slane %v566_v13, %v6870_v40  ;;  %v581_v26 = vrot.slane %v567_v14, %v6870_v40  ;;  %v606_v27 = vrot.slane %v598_v15, %v6870_v40  ;;  %v613_v28 = vrot.slane %v599_v17, %v6870_v40 }
 0x1cb   :  { %6142 = vmatpush3.xpose.msk.msra.mxu1 %vm774_vm1, %v1372_v18  ;;  %v6973_v29 = vrot.slane %v1309_v19, %v6870_v40  ;;  %v6976_v20 = vrot.slane %v1341_v23, %v6870_v40  ;;  %v279_v1 = vcombine.high %v213_v53, %v225_v11  ;;  %v286_v2 = vrot.slane %v278_v24, %v6863_v33  ;;  %v6979_v5 = vpop.permute.xlu1 %932  ;;  %v203_v6 = vpop.permute.xlu0 %202 }
 0x1cc   :  { %v630_v30 = vcombine.low %v574_v25, %v606_v27  ;;  %v631_v32 = vcombine.high %v574_v25, %v606_v27  ;;  %v632_v34 = vcombine.low %v581_v26, %v613_v28  ;;  %v633_v35 = vcombine.high %v581_v26, %v613_v28  ;;  %6146 = vmatprep.subr.mxu1 %v8019_v21 }
 0x1cd   :  { %v1374_v37 = vcombine.low %v6973_v29, %v6976_v20  ;;  %v293_v38 = vrot.slane %v279_v1, %v6863_v33  ;;  %v262_v39 = vcombine.low %v207_v54, %v219_v12  ;;  %v263_v41 = vcombine.high %v207_v54, %v219_v12 }
 0x1ce   :  { %775 = vst.msk [vmem:[#allocation2] sm:$0xff] %vm774_vm1, %v630_v30  ;;  %776 = vst.msk [vmem:[#allocation2 + $0x8] sm:$0xff] %vm774_vm1, %v631_v32  ;;  %v382_v42 = vcombine.low %v6921_v31, %v203_v6  ;;  %v383_v43 = vcombine.high %v6921_v31, %v203_v6  ;;  %v1373_v44 = vcombine.high %v6956_v22, %v6959_v10 }
 0x1cf   :  { %777 = vst.msk [vmem:[#allocation2 + $0x10] sm:$0xff] %vm774_vm1, %v632_v34  ;;  %778 = vst.msk [vmem:[#allocation2 + $0x18] sm:$0xff] %vm774_vm1, %v633_v35  ;;  %v1324_v47 = vcombine.low %v6928_v49, %v6931_v50  ;;  %6152 = vmatpush3.xpose.msk.msra.mxu0 %vm774_vm1, %v1374_v37  ;;  %v270_v48 = vrot.slane %v262_v39, %v6863_v33  ;;  %v277_v53 = vrot.slane %v263_v41, %v6863_v33  ;;  %v6998_v54 = vpop.permute.xlu1 %944  ;;  %v7010_v61 = vpop.permute.xlu0 %938 }
 0x1d0   :  { %v1356_v55 = vcombine.low %v6934_v51, %v6937_v52  ;;  %v1375_v31 = vcombine.high %v6973_v29, %v6976_v20  ;;  %v390_v56 = vrot.slane %v382_v42, %v6863_v33  ;;  %v397_v58 = vrot.slane %v383_v43, %v6863_v33  ;;  %6161 = vmatprep.subr.mxu0 %v8019_v21 }
 0x1d1   :  { %v1124_v59 = vcombine.low %v6979_v5, %v6998_v54  ;;  %v1125_v60 = vcombine.high %v6979_v5, %v6998_v54  ;;  %v326_v62 = vcombine.low %v270_v48, %v286_v2  ;;  %v327_v63 = vcombine.high %v270_v48, %v286_v2 }
 0x1d2   :  { %v342_v0 = vcombine.low %v277_v53, %v293_v38  ;;  %v343_v3 = vcombine.high %v277_v53, %v293_v38  ;;  %v430_v4 = vcombine.low %v6950_v8, %v390_v56  ;;  %v431_v7 = vcombine.high %v6950_v8, %v390_v56 }
 0x1d3   :  { %v446_v22 = vcombine.low %v6953_v9, %v397_v58  ;;  %v447_v10 = vcombine.high %v6953_v9, %v397_v58  ;;  %v334_v11 = vrot.slane %v326_v62, %v6870_v40  ;;  %v341_v12 = vrot.slane %v327_v63, %v6870_v40  ;;  %v7021_v15 = vpop.permute.xlu1 %214  ;;  %v7027_v30 = vpop.permute.xlu0 %208 }
 0x1d4   :  { %v350_v13 = vrot.slane %v342_v0, %v6870_v40  ;;  %v357_v14 = vrot.slane %v343_v3, %v6870_v40  ;;  %v438_v17 = vrot.slane %v430_v4, %v6870_v40  ;;  %v445_v18 = vrot.slane %v431_v7, %v6870_v40 }
 0x1d5   :  { %v454_v8 = vrot.slane %v446_v22, %v6870_v40  ;;  %v461_v19 = vrot.slane %v447_v10, %v6870_v40  ;;  %v5921_v23 = vcombine.low %v334_v11, %v341_v12  ;;  %v5923_v9 = vcombine.high %v334_v11, %v341_v12  ;;  %v2108_v26 = vld [vmem:[#allocation2] sm:$0xff]  ;;  %v2109_v3 = vld [vmem:[#allocation2 + $0x8] sm:$0xff] }
 0x1d6   :  { %v5925_v24 = vcombine.low %v350_v13, %v357_v14  ;;  %v5927_v25 = vcombine.high %v350_v13, %v357_v14  ;;  %v2110_v27 = vld [vmem:[#allocation2 + $0x10] sm:$0xff]  ;;  %v5928_v28 = vcombine.low %v438_v17, %v445_v18  ;;  %v5930_v1 = vcombine.high %v438_v17, %v445_v18  ;;  %6144 = vmatmul.mubr.msk.f32.vlgmr.msra.gmra.mrb[2].mxu1 %vm774_vm1, %v2108_v26 }
 0x1d7   :  { %v5932_v2 = vcombine.low %v454_v8, %v461_v19  ;;  %v5934_v6 = vcombine.high %v454_v8, %v461_v19  ;;  %v517_v32 = vrot.slane %v5921_v23, %v6863_v33  ;;  %v533_v34 = vrot.slane %v5923_v9, %v6863_v33  ;;  %6147 = vmatpush3.xpose.msk.msra.mxu1 %vm774_vm1, %v1373_v44  ;;  %v7035_v38 = vpop.permute.xlu1 %226  ;;  %v221_v18 = vpop.permute.xlu0 %220 }
 0x1d8   :  { %v549_v35 = vrot.slane %v5925_v24, %v6863_v33  ;;  %v565_v37 = vrot.slane %v5927_v25, %v6863_v33  ;;  %v646_v39 = vrot.slane %v5928_v28, %v6863_v33  ;;  %v662_v41 = vrot.slane %v5930_v1, %v6863_v33  ;;  %6154 = vmatmul.mubr.msk.f32.vlgmr.msra.gmra.mrb[2].mxu0 %vm774_vm1, %v2110_v27  ;;  %v2111_v28 = vld [vmem:[#allocation2 + $0x18] sm:$0xff] }
 0x1d9   :  { %v678_v42 = vrot.slane %v5932_v2, %v6863_v33  ;;  %v694_v43 = vrot.slane %v5934_v6, %v6863_v33  ;;  %v582_v48 = vcombine.low %v517_v32, %v533_v34  ;;  %v583_v53 = vcombine.high %v517_v32, %v533_v34  ;;  %6148 = vmatprep.mubr.msk.f32.mxu1 %vm6617_vm2, %v8019_v21 }
 0x1da   :  { %v614_v56 = vcombine.low %v549_v35, %v565_v37  ;;  %v615_v58 = vcombine.high %v549_v35, %v565_v37  ;;  %v702_v44 = vcombine.low %v646_v39, %v662_v41  ;;  %v703_v62 = vcombine.high %v646_v39, %v662_v41  ;;  %6156 = vmatprep.subr.mxu1 %v8019_v21 }
 0x1db   :  { %v734_v63 = vcombine.low %v678_v42, %v694_v43  ;;  %v735_v0 = vcombine.high %v678_v42, %v694_v43  ;;  %v590_v4 = vrot.slane %v582_v48, %v6870_v40  ;;  %v597_v7 = vrot.slane %v583_v53, %v6870_v40  ;;  %6149 = vmatmul.mubr.msk.f32.vlgmr.msra.gmra.mrb[4].mxu1 %vm774_vm1, %v2109_v3  ;;  %v7050_v11 = vpop.permute.xlu1 %956 }
 0x1dc   :  { %v622_v22 = vrot.slane %v614_v56, %v6870_v40  ;;  %v629_v10 = vrot.slane %v615_v58, %v6870_v40  ;;  %v710_v12 = vrot.slane %v702_v44, %v6870_v40  ;;  %v717_v13 = vrot.slane %v703_v62, %v6870_v40  ;;  %6157 = vmatpush3.xpose.msk.msra.mxu1 %vm774_vm1, %v1375_v31 }
 0x1dd   :  { %v742_v14 = vrot.slane %v734_v63, %v6870_v40  ;;  %v749_v17 = vrot.slane %v735_v0, %v6870_v40  ;;  %6158 = vmatprep.mubr.msk.f32.mxu1 %vm6617_vm2, %v8019_v21  ;;  %6166 = vmatprep.subr.mxu1 %v8019_v21  ;;  %v1132_v29 = vrot.slane %v1124_v59, %v6863_v33 }
 0x1de   :  { %v634_v8 = vcombine.low %v590_v4, %v622_v22  ;;  %v635_v19 = vcombine.high %v590_v4, %v622_v22  ;;  %v636_v23 = vcombine.low %v597_v7, %v629_v10  ;;  %v637_v9 = vcombine.high %v597_v7, %v629_v10  ;;  %6163 = vmatprep.mubr.msk.f32.mxu0 %vm6617_vm2, %v8019_v21 }
 0x1df   :  { %v766_v24 = vcombine.low %v710_v12, %v742_v14  ;;  %v767_v25 = vcombine.high %v710_v12, %v742_v14  ;;  %v768_v26 = vcombine.low %v717_v13, %v749_v17  ;;  %v769_v27 = vcombine.high %v717_v13, %v749_v17  ;;  %6159 = vmatmul.mubr.msk.f32.vlgmr.msra.gmra.mrb[6].mxu1 %vm774_vm1, %v2111_v28  ;;  %v7102_v37 = vpop.permute.xlu1 %968 }
 0x1e0   :  { %779 = vst.msk [vmem:[#allocation2 + $0x20] sm:$0xff] %vm774_vm1, %v634_v8  ;;  %780 = vst.msk [vmem:[#allocation2 + $0x28] sm:$0xff] %vm774_vm1, %v635_v19  ;;  %v1139_v20 = vrot.slane %v1125_v60, %v6863_v33  ;;  %v1108_v31 = vcombine.low %v6758_v16, %v7010_v61  ;;  %v1109_v1 = vcombine.high %v6758_v16, %v7010_v61  ;;  %6168 = vmatprep.mubr.msk.f32.mxu1 %vm6617_vm2, %v8019_v21 }
 0x1e1   :  { %781 = vst.msk [vmem:[#allocation2 + $0x30] sm:$0xff] %vm774_vm1, %v636_v23  ;;  %782 = vst.msk [vmem:[#allocation2 + $0x38] sm:$0xff] %vm774_vm1, %v637_v9  ;;  %v1332_v59 = vrot.slane %v1324_v47, %v6870_v40  ;;  %v1364_v60 = vrot.slane %v1356_v55, %v6870_v40  ;;  %v414_v2 = vcombine.low %v7021_v15, %v7035_v38 }
 0x1e2   :  { %783 = vst.msk [vmem:[#allocation2 + $0x40] sm:$0xff] %vm774_vm1, %v766_v24  ;;  %784 = vst.msk [vmem:[#allocation2 + $0x48] sm:$0xff] %vm774_vm1, %v767_v25  ;;  %v415_v6 = vcombine.high %v7021_v15, %v7035_v38  ;;  %v1116_v32 = vrot.slane %v1108_v31, %v6863_v33  ;;  %v1123_v34 = vrot.slane %v1109_v1, %v6863_v33  ;;  %v7108_v38 = vpop.permute.xlu0 %950 }
 0x1e3   :  { %785 = vst.msk [vmem:[#allocation2 + $0x50] sm:$0xff] %vm774_vm1, %v768_v26  ;;  %786 = vst.msk [vmem:[#allocation2 + $0x58] sm:$0xff] %vm774_vm1, %v769_v27  ;;  %v398_v47 = vcombine.low %v7027_v30, %v221_v18  ;;  %v399_v35 = vcombine.high %v7027_v30, %v221_v18  ;;  %v1376_v55 = vcombine.low %v1332_v59, %v1364_v60 }
 0x1e4   :  { %v422_v39 = vrot.slane %v414_v2, %v6863_v33  ;;  %v429_v15 = vrot.slane %v415_v6, %v6863_v33  ;;  %v1377_v41 = vcombine.high %v1332_v59, %v1364_v60  ;;  %v1172_v42 = vcombine.low %v1116_v32, %v1132_v29 }
 0x1e5   :  { %v1173_v43 = vcombine.high %v1116_v32, %v1132_v29  ;;  %v1188_v48 = vcombine.low %v1123_v34, %v1139_v20  ;;  %v1189_v53 = vcombine.high %v1123_v34, %v1139_v20  ;;  %6162 = vmatpush3.xpose.msk.msra.mxu0 %vm774_vm1, %v1376_v55  ;;  %v406_v30 = vrot.slane %v398_v47, %v6863_v33 }
 0x1e6   :  { %v413_v56 = vrot.slane %v399_v35, %v6863_v33  ;;  %6167 = vmatpush3.xpose.msk.msra.mxu1 %vm774_vm1, %v1377_v41  ;;  %v1156_v58 = vcombine.low %v7050_v11, %v7102_v37  ;;  %v1180_v44 = vrot.slane %v1172_v42, %v6870_v40  ;;  %6171 = vmatprep.subr.mxu0 %v8019_v21  ;;  %v7127_v24 = vpop.permute.xlu0 %962 }
 0x1e7   :  { %v1187_v62 = vrot.slane %v1173_v43, %v6870_v40  ;;  %v1196_v63 = vrot.slane %v1188_v48, %v6870_v40  ;;  %v1203_v0 = vrot.slane %v1189_v53, %v6870_v40  ;;  %v462_v3 = vcombine.low %v406_v30, %v422_v39  ;;  %6176 = vmatprep.subr.mxu1 %v8019_v21  ;;  %v2112_v10 = vld [vmem:[#allocation2 + $0x20] sm:$0xff]  ;;  %v2113_v12 = vld [vmem:[#allocation2 + $0x28] sm:$0xff] }
 0x1e8   :  { %v463_v4 = vcombine.high %v406_v30, %v422_v39  ;;  %v478_v7 = vcombine.low %v413_v56, %v429_v15  ;;  %v479_v22 = vcombine.high %v413_v56, %v429_v15  ;;  %6164 = vmatmul.mubr.msk.f32.vlgmr.msra.gmra.mrb[4].mxu0 %vm774_vm1, %v2112_v10  ;;  %v1157_v59 = vcombine.high %v7050_v11, %v7102_v37 }
 0x1e9   :  { %v5946_v13 = vcombine.low %v1180_v44, %v1187_v62  ;;  %v5948_v14 = vcombine.high %v1180_v44, %v1187_v62  ;;  %v5950_v17 = vcombine.low %v1196_v63, %v1203_v0  ;;  %v5952_v18 = vcombine.high %v1196_v63, %v1203_v0  ;;  %6169 = vmatmul.mubr.msk.f32.vlgmr.msra.gmra.mrb[8].mxu1 %vm774_vm1, %v2113_v12 }
 0x1ea   :  { %v470_v8 = vrot.slane %v462_v3, %v6870_v40  ;;  %v477_v19 = vrot.slane %v463_v4, %v6870_v40  ;;  %v486_v23 = vrot.slane %v478_v7, %v6870_v40  ;;  %v493_v9 = vrot.slane %v479_v22, %v6870_v40  ;;  %6173 = vmatprep.mubr.msk.f32.mxu0 %vm6617_vm2, %v8019_v21 }
 0x1eb   :  { %v7131_v25 = vrot.slane %v5946_v13, %v6863_v33  ;;  %v7134_v26 = vrot.slane %v5948_v14, %v6863_v33  ;;  %v7137_v27 = vrot.slane %v5950_v17, %v6863_v33  ;;  %v7140_v28 = vrot.slane %v5952_v18, %v6863_v33  ;;  %6178 = vmatprep.mubr.msk.f32.mxu1 %vm6617_vm2, %v8019_v21 }
 0x1ec   :  { %v5929_v29 = vcombine.low %v470_v8, %v477_v19  ;;  %v5931_v20 = vcombine.high %v470_v8, %v477_v19  ;;  %v5933_v31 = vcombine.low %v486_v23, %v493_v9  ;;  %v5935_v1 = vcombine.high %v486_v23, %v493_v9 }
 0x1ed   :  { %v1164_v60 = vrot.slane %v1156_v58, %v6863_v33  ;;  %v1140_v2 = vcombine.low %v7108_v38, %v7127_v24  ;;  %v1141_v6 = vcombine.high %v7108_v38, %v7127_v24  ;;  %v1171_v55 = vrot.slane %v1157_v59, %v6863_v33 }
 0x1ee   :  { %v653_v32 = vrot.slane %v5929_v29, %v6863_v33  ;;  %v669_v34 = vrot.slane %v5931_v20, %v6863_v33  ;;  %v685_v47 = vrot.slane %v5933_v31, %v6863_v33  ;;  %v701_v35 = vrot.slane %v5935_v1, %v6863_v33 }
 0x1ef   :  { %v1148_v39 = vrot.slane %v1140_v2, %v6863_v33  ;;  %v1155_v15 = vrot.slane %v1141_v6, %v6863_v33  ;;  %v1325_v41 = vcombine.high %v6928_v49, %v6931_v50  ;;  %v1357_v23 = vcombine.high %v6934_v51, %v6937_v52 }
 0x1f0   :  { %v718_v42 = vcombine.low %v653_v32, %v669_v34  ;;  %v719_v43 = vcombine.high %v653_v32, %v669_v34  ;;  %v750_v48 = vcombine.low %v685_v47, %v701_v35  ;;  %v751_v53 = vcombine.high %v685_v47, %v701_v35 }
 0x1f1   :  { %v1204_v30 = vcombine.low %v1148_v39, %v1164_v60  ;;  %v1205_v56 = vcombine.high %v1148_v39, %v1164_v60  ;;  %v1220_v58 = vcombine.low %v1155_v15, %v1171_v55  ;;  %v1221_v44 = vcombine.high %v1155_v15, %v1171_v55  ;;  %v2114_v55 = vld [vmem:[#allocation2 + $0x30] sm:$0xff]  ;;  %v2115_v39 = vld [vmem:[#allocation2 + $0x38] sm:$0xff] }
 0x1f2   :  { %v726_v62 = vrot.slane %v718_v42, %v6870_v40  ;;  %v733_v63 = vrot.slane %v719_v43, %v6870_v40  ;;  %v758_v0 = vrot.slane %v750_v48, %v6870_v40  ;;  %v765_v3 = vrot.slane %v751_v53, %v6870_v40  ;;  %v2116_v43 = vld [vmem:[#allocation2 + $0x40] sm:$0xff]  ;;  %v2117_v48 = vld [vmem:[#allocation2 + $0x48] sm:$0xff] }
 0x1f3   :  { %v1212_v4 = vrot.slane %v1204_v30, %v6870_v40  ;;  %v1219_v49 = vrot.slane %v1205_v56, %v6870_v40  ;;  %v1228_v50 = vrot.slane %v1220_v58, %v6870_v40  ;;  %v1235_v7 = vrot.slane %v1221_v44, %v6870_v40 }
 0x1f4   :  { %v770_v22 = vcombine.low %v726_v62, %v758_v0  ;;  %v771_v10 = vcombine.high %v726_v62, %v758_v0  ;;  %v772_v12 = vcombine.low %v733_v63, %v765_v3  ;;  %v773_v13 = vcombine.high %v733_v63, %v765_v3  ;;  %v2118_v62 = vld [vmem:[#allocation2 + $0x50] sm:$0xff]  ;;  %v2119_v63 = vld [vmem:[#allocation2 + $0x58] sm:$0xff] }
 0x1f5   :  { %v5947_v14 = vcombine.low %v1212_v4, %v1219_v49  ;;  %v5949_v17 = vcombine.high %v1212_v4, %v1219_v49  ;;  %v5951_v18 = vcombine.low %v1228_v50, %v1235_v7  ;;  %v5953_v8 = vcombine.high %v1228_v50, %v1235_v7 }
 0x1f6   :  { %787 = vst.msk [vmem:[#allocation2 + $0x60] sm:$0xff] %vm774_vm1, %v770_v22  ;;  %788 = vst.msk [vmem:[#allocation2 + $0x68] sm:$0xff] %vm774_vm1, %v771_v10  ;;  %v1339_v19 = vrot.slane %v1325_v41, %v6870_v40  ;;  %v1444_v9 = vcombine.low %v7131_v25, %v7134_v26  ;;  %v1476_v29 = vcombine.low %v7137_v27, %v7140_v28 }
 0x1f7   :  { %789 = vst.msk [vmem:[#allocation2 + $0x70] sm:$0xff] %vm774_vm1, %v772_v12  ;;  %790 = vst.msk [vmem:[#allocation2 + $0x78] sm:$0xff] %vm774_vm1, %v773_v13  ;;  %v1395_v20 = vrot.slane %v5947_v14, %v6863_v33  ;;  %v1411_v31 = vrot.slane %v5949_v17, %v6863_v33  ;;  %v1427_v1 = vrot.slane %v5951_v18, %v6863_v33  ;;  %v1517_v12 = vpop.permute.xlu1 %1516 }
 0x1f8   :  { %v1443_v59 = vrot.slane %v5953_v8, %v6863_v33  ;;  %v1371_v60 = vrot.slane %v1357_v23, %v6870_v40  ;;  %v1452_v2 = vrot.slane %v1444_v9, %v6870_v40  ;;  %v1484_v51 = vrot.slane %v1476_v29, %v6870_v40 }
 0x1f9   :  { %v1445_v32 = vcombine.high %v7131_v25, %v7134_v26  ;;  %v1477_v34 = vcombine.high %v7137_v27, %v7140_v28  ;;  %v1460_v47 = vcombine.low %v1395_v20, %v1411_v31  ;;  %v1461_v28 = vcombine.high %v1395_v20, %v1411_v31 }
 0x1fa   :  { %v1378_v52 = vcombine.low %v1339_v19, %v1371_v60  ;;  %v1379_v6 = vcombine.high %v1339_v19, %v1371_v60  ;;  %v1492_v35 = vcombine.low %v1427_v1, %v1443_v59  ;;  %v1508_v15 = vcombine.low %v1452_v2, %v1484_v51 }
 0x1fb   :  { %v1509_v41 = vcombine.high %v1452_v2, %v1484_v51  ;;  %v1459_v42 = vrot.slane %v1445_v32, %v6870_v40  ;;  %v1491_v25 = vrot.slane %v1477_v34, %v6870_v40  ;;  %v1468_v26 = vrot.slane %v1460_v47, %v6870_v40 }
 0x1fc   :  { %6172 = vmatpush3.xpose.msk.msra.mxu0 %vm774_vm1, %v1378_v52  ;;  %6177 = vmatpush3.xpose.msk.msra.mxu1 %vm774_vm1, %v1379_v6  ;;  %v1500_v27 = vrot.slane %v1492_v35, %v6870_v40  ;;  %v1493_v56 = vcombine.high %v1427_v1, %v1443_v59  ;;  %v1475_v0 = vrot.slane %v1461_v28, %v6870_v40 }
 0x1fd   :  { %6181 = vmatprep.subr.mxu0 %v8019_v21  ;;  %6186 = vmatprep.subr.mxu1 %v8019_v21  ;;  %v1510_v53 = vcombine.low %v1459_v42, %v1491_v25  ;;  %v1511_v30 = vcombine.high %v1459_v42, %v1491_v25  ;;  %v2120_v4 = vld [vmem:[#allocation2 + $0x60] sm:$0xff]  ;;  %v2121_v49 = vld [vmem:[#allocation2 + $0x68] sm:$0xff] }
 0x1fe   :  { %v1512_v58 = vcombine.low %v1468_v26, %v1500_v27  ;;  %v1513_v44 = vcombine.high %v1468_v26, %v1500_v27  ;;  %v1507_v3 = vrot.slane %v1493_v56, %v6870_v40  ;;  %v2122_v22 = vld [vmem:[#allocation2 + $0x70] sm:$0xff]  ;;  %v2123_v10 = vld [vmem:[#allocation2 + $0x78] sm:$0xff] }
 0x1ff   :  { %6174 = vmatmul.mubr.msk.f32.vlgmr.msra.gmra.mrb[6].mxu0 %vm774_vm1, %v2114_v55  ;;  %6179 = vmatmul.mubr.msk.f32.vlgmr.msra.gmra.mrb[10].mxu1 %vm774_vm1, %v2115_v39 }
 0x200   :  { %6182 = vmatpush3.xpose.msk.msra.mxu0 %vm774_vm1, %v1508_v15  ;;  %6187 = vmatpush3.xpose.msk.msra.mxu1 %vm774_vm1, %v1509_v41  ;;  %v1514_v50 = vcombine.low %v1475_v0, %v1507_v3  ;;  %v1515_v7 = vcombine.high %v1475_v0, %v1507_v3 }
 0x201   :  { %6183 = vmatprep.mubr.msk.f32.mxu0 %vm6617_vm2, %v8019_v21  ;;  %6188 = vmatprep.mubr.msk.f32.mxu1 %vm6617_vm2, %v8019_v21 }
 0x202   :  { %6191 = vmatprep.subr.mxu0 %v8019_v21  ;;  %6196 = vmatprep.subr.mxu1 %v8019_v21 }
 0x203   :  { %6184 = vmatmul.mubr.msk.f32.vlgmr.msra.gmra.mrb[8].mxu0 %vm774_vm1, %v2116_v43  ;;  %6189 = vmatmul.mubr.msk.f32.vlgmr.msra.gmra.mrb[12].mxu1 %vm774_vm1, %v2117_v48 }
 0x204   :  { %6192 = vmatpush3.xpose.msk.msra.mxu0 %vm774_vm1, %v1510_v53  ;;  %6197 = vmatpush3.xpose.msk.msra.mxu1 %vm774_vm1, %v1511_v30 }
 0x205   :  { %6193 = vmatprep.mubr.msk.f32.mxu0 %vm6617_vm2, %v8019_v21  ;;  %6198 = vmatprep.mubr.msk.f32.mxu1 %vm6617_vm2, %v8019_v21 }
 0x206   :  { %6201 = vmatprep.subr.mxu0 %v8019_v21  ;;  %6206 = vmatprep.subr.mxu1 %v8019_v21 }
 0x207   :  { %6194 = vmatmul.mubr.msk.f32.vlgmr.msra.gmra.mrb[10].mxu0 %vm774_vm1, %v2118_v62  ;;  %6199 = vmatmul.mubr.msk.f32.vlgmr.msra.gmra.mrb[14].mxu1 %vm774_vm1, %v2119_v63  ;;  %v6621_v63 = vmov -inf  }
 0x208   :  { %6202 = vmatpush3.xpose.msk.msra.mxu0 %vm774_vm1, %v1512_v58  ;;  %6207 = vmatpush3.xpose.msk.msra.mxu1 %vm774_vm1, %v1513_v44  ;;  %792 = vst.msk [vmem:[#allocation3] sm:$0xff] %vm791_vm3, %v6621_v63  ;;  %793 = vst.msk [vmem:[#allocation3 + $0x8] sm:$0xff] %vm791_vm3, %v6621_v63 }
 0x209   :  { %6203 = vmatprep.mubr.msk.f32.mxu0 %vm6617_vm2, %v8019_v21  ;;  %6208 = vmatprep.mubr.msk.f32.mxu1 %vm6617_vm2, %v8019_v21  ;;  %794 = vst.msk [vmem:[#allocation3 + $0x10] sm:$0xff] %vm791_vm3, %v6621_v63  ;;  %795 = vst.msk [vmem:[#allocation3 + $0x18] sm:$0xff] %vm791_vm3, %v6621_v63 }
 0x20a   :  { %6211 = vmatprep.subr.mxu0 %v8019_v21  ;;  %6216 = vmatprep.subr.mxu1 %v8019_v21  ;;  %796 = vst.msk [vmem:[#allocation3 + $0x20] sm:$0xff] %vm791_vm3, %v6621_v63  ;;  %797 = vst.msk [vmem:[#allocation3 + $0x28] sm:$0xff] %vm791_vm3, %v6621_v63 }
 0x20b   :  { %6204 = vmatmul.mubr.msk.f32.vlgmr.msra.gmra.mrb[12].mxu0 %vm774_vm1, %v2120_v4  ;;  %6209 = vmatmul.mubr.msk.f32.vlgmr.msra.gmra.mrb[16].mxu1 %vm774_vm1, %v2121_v49  ;;  %798 = vst.msk [vmem:[#allocation3 + $0x30] sm:$0xff] %vm791_vm3, %v6621_v63  ;;  %799 = vst.msk [vmem:[#allocation3 + $0x38] sm:$0xff] %vm791_vm3, %v6621_v63 }
 0x20c   :  { %6212 = vmatpush3.xpose.msk.msra.mxu0 %vm774_vm1, %v1514_v50  ;;  %6217 = vmatpush3.xpose.msk.msra.mxu1 %vm774_vm1, %v1515_v7  ;;  %800 = vst.msk [vmem:[#allocation3 + $0x40] sm:$0xff] %vm791_vm3, %v6621_v63  ;;  %801 = vst.msk [vmem:[#allocation3 + $0x48] sm:$0xff] %vm791_vm3, %v6621_v63 }
 0x20d   :  { %6213 = vmatprep.mubr.msk.f32.mxu0 %vm6617_vm2, %v8019_v21  ;;  %6218 = vmatprep.mubr.msk.f32.mxu1 %vm6617_vm2, %v8019_v21  ;;  %802 = vst.msk [vmem:[#allocation3 + $0x50] sm:$0xff] %vm791_vm3, %v6621_v63  ;;  %803 = vst.msk [vmem:[#allocation3 + $0x58] sm:$0xff] %vm791_vm3, %v6621_v63 }
 0x20e   :  { %6221 = vmatprep.subr.mxu0 %v8019_v21  ;;  %6226 = vmatprep.subr.mxu1 %v8019_v21  ;;  %804 = vst.msk [vmem:[#allocation3 + $0x60] sm:$0xff] %vm791_vm3, %v6621_v63  ;;  %805 = vst.msk [vmem:[#allocation3 + $0x68] sm:$0xff] %vm791_vm3, %v6621_v63 }
 0x20f   :  { %6214 = vmatmul.mubr.msk.f32.vlgmr.msra.gmra.mrb[14].mxu0 %vm774_vm1, %v2122_v22  ;;  %6219 = vmatmul.mubr.msk.f32.vlgmr.msra.gmra.mrb[18].mxu1 %vm774_vm1, %v2123_v10  ;;  %806 = vst.msk [vmem:[#allocation3 + $0x70] sm:$0xff] %vm791_vm3, %v6621_v63  ;;  %807 = vst.msk [vmem:[#allocation3 + $0x78] sm:$0xff] %vm791_vm3, %v6621_v63 }
 0x210   :  { %6223 = vmatprep.mubr.msk.f32.mxu0 %vm6617_vm2, %v8019_v21  ;;  %6228 = vmatprep.mubr.msk.f32.mxu1 %vm6617_vm2, %v8019_v21 }
 0x21e   :  { %v1521_v13 = vpop.permute.xlu1 %1520 }
 0x222   :  { %v1525_v14 = vpop.permute.xlu1 %1524 }
 0x223   :  { %v1564_v17 = vcombine.low %v1517_v12, %v1525_v14  ;;  %v1565_v18 = vcombine.high %v1517_v12, %v1525_v14 }
 0x225   :  { %v1572_v9 = vrot.slane %v1564_v17, %v6863_v33  ;;  %v1579_v29 = vrot.slane %v1565_v18, %v6863_v33 }
 0x226   :  { %v1529_v8 = vpop.permute.xlu1 %1528 }
 0x227   :  { %v1580_v19 = vcombine.low %v1521_v13, %v1529_v8  ;;  %v1581_v23 = vcombine.high %v1521_v13, %v1529_v8 }
 0x229   :  { %v1588_v20 = vrot.slane %v1580_v19, %v6863_v33  ;;  %v1595_v31 = vrot.slane %v1581_v23, %v6863_v33 }
 0x22b   :  { %v1628_v1 = vcombine.low %v1572_v9, %v1588_v20  ;;  %v1629_v59 = vcombine.high %v1572_v9, %v1588_v20  ;;  %v1644_v60 = vcombine.low %v1579_v29, %v1595_v31  ;;  %v1645_v2 = vcombine.high %v1579_v29, %v1595_v31 }
 0x22c   :  { %v6622_v20 = vmov 0  }
 0x22d   :  { %v1636_v51 = vrot.slane %v1628_v1, %v6870_v40  ;;  %v1643_v52 = vrot.slane %v1629_v59, %v6870_v40  ;;  %v1652_v6 = vrot.slane %v1644_v60, %v6870_v40  ;;  %v1659_v32 = vrot.slane %v1645_v2, %v6870_v40  ;;  %6364 = vset.pattern.permute.xlu1 %v6622_v20 }
 0x22e   :  { %6365 = vset.pattern.permute.xlu0 %v6622_v20  ;;  %v7445_v20 = vld [vmem:[#allocation3 + $0x20] sm:$0xff] }
 0x22f   :  { %v5954_v34 = vcombine.low %v1636_v51, %v1643_v52  ;;  %v5956_v47 = vcombine.high %v1636_v51, %v1643_v52  ;;  %v5958_v35 = vcombine.low %v1652_v6, %v1659_v32  ;;  %v5960_v55 = vcombine.high %v1652_v6, %v1659_v32 }
 0x231   :  { %v1844_v39 = vrot.slane %v5954_v34, %v6863_v33  ;;  %v1860_v15 = vrot.slane %v5956_v47, %v6863_v33  ;;  %v1876_v41 = vrot.slane %v5958_v35, %v6863_v33  ;;  %v1892_v42 = vrot.slane %v5960_v55, %v6863_v33 }
 0x233   :  { %v1900_v25 = vcombine.low %v1844_v39, %v1860_v15  ;;  %v1932_v26 = vcombine.low %v1876_v41, %v1892_v42  ;;  %v1901_v27 = vcombine.high %v1844_v39, %v1860_v15  ;;  %v1933_v28 = vcombine.high %v1876_v41, %v1892_v42 }
 0x235   :  { %v1908_v43 = vrot.slane %v1900_v25, %v6870_v40  ;;  %v1940_v48 = vrot.slane %v1932_v26, %v6870_v40  ;;  %v7263_v53 = vrot.slane %v1901_v27, %v6870_v40  ;;  %v7266_v30 = vrot.slane %v1933_v28, %v6870_v40 }
 0x237   :  { %v1964_v56 = vcombine.low %v1908_v43, %v1940_v48  ;;  %v1965_v58 = vcombine.high %v1908_v43, %v1940_v48 }
 0x239   :  { %6222 = vmatpush3.msra.mxu0 %v1964_v56  ;;  %6227 = vmatpush3.msra.mxu1 %v1965_v58 }
 0x23a   :  { %6231 = vmatprep.subr.mxu0 %v8019_v21  ;;  %6236 = vmatprep.subr.mxu1 %v8019_v21 }
 0x2a9   :  { %v7322_v0 = vpop.f32.mrb[2].mxu1 }
 0x2aa   :  { %v6145_v3 = vpop.f32.mrb[3].mxu1  ;;  %v3358_v4 = vsel %vm3357_vm4, %v7322_v0, -inf }
 0x2ab   :  { %v7326_v49 = vpop.f32.mrb[2].mxu0  ;;  %3359 = vmax.xlane.f32.xlu0 %v3358_v4 }
 0x2ac   :  { %v6155_v50 = vpop.f32.mrb[3].mxu0  ;;  %v3364_v22 = vsel %vm3357_vm4, %v7326_v49, -inf }
 0x2ae   :  { %v7328_v7 = vpop.f32.mrb[4].mxu1 }
 0x2af   :  { %v6150_v10 = vpop.f32.mrb[5].mxu1  ;;  %3365 = vmax.xlane.f32.xlu0 %v3364_v22  ;;  %v3361_v12 = vsel %vm3357_vm4, %v7328_v7, -inf }
 0x2b0   :  { %3362 = vmax.xlane.f32.xlu1 %v3361_v12  ;;  %v7407_v10 = vld [vmem:[#allocation3 + $0x10] sm:$0xff] }
 0x2b2   :  { %v7334_v13 = vpop.f32.mrb[6].mxu1 }
 0x2b3   :  { %v6160_v14 = vpop.f32.mrb[7].mxu1  ;;  %v3367_v17 = vsel %vm3357_vm4, %v7334_v13, -inf }
 0x2b4   :  { %3368 = vmax.xlane.f32.xlu0 %v3367_v17  ;;  %v7427_v17 = vld [vmem:[#allocation3 + $0x18] sm:$0xff] }
 0x2bb   :  { %v7338_v18 = vpop.f32.mrb[4].mxu0 }
 0x2bc   :  { %v7340_v8 = vpop.f32.mrb[8].mxu1  ;;  %v6165_v19 = vpop.f32.mrb[5].mxu0  ;;  %v3370_v23 = vsel %vm3357_vm4, %v7338_v18, -inf }
 0x2bd   :  { %v6170_v9 = vpop.f32.mrb[9].mxu1  ;;  %v3373_v29 = vsel %vm3357_vm4, %v7340_v8, -inf  ;;  %3371 = vmax.xlane.f32.xlu1 %v3370_v23 }
 0x2be   :  { %3374 = vmax.xlane.f32.xlu0 %v3373_v29 }
 0x2d2   :  { %v7346_v31 = vpop.f32.mrb[6].mxu0  ;;  %v7348_v1 = vpop.f32.mrb[10].mxu1 }
 0x2d3   :  { %v6175_v59 = vpop.f32.mrb[7].mxu0  ;;  %v6180_v60 = vpop.f32.mrb[11].mxu1  ;;  %v3379_v2 = vsel %vm3357_vm4, %v7348_v1, -inf  ;;  %v3376_v51 = vsel %vm3357_vm4, %v7346_v31, -inf }
 0x2d4   :  { %3380 = vmax.xlane.f32.xlu0 %v3379_v2  ;;  %3377 = vmax.xlane.f32.xlu1 %v3376_v51  ;;  %v7449_v59 = vld [vmem:[#allocation3 + $0x28] sm:$0xff] }
 0x2d6   :  { %v7354_v52 = vpop.f32.mrb[8].mxu0  ;;  %v7356_v6 = vpop.f32.mrb[12].mxu1 }
 0x2d7   :  { %v6185_v32 = vpop.f32.mrb[9].mxu0  ;;  %v6190_v34 = vpop.f32.mrb[13].mxu1  ;;  %v3385_v47 = vsel %vm3357_vm4, %v7356_v6, -inf  ;;  %v3382_v35 = vsel %vm3357_vm4, %v7354_v52, -inf }
 0x2d8   :  { %3386 = vmax.xlane.f32.xlu0 %v3385_v47  ;;  %3383 = vmax.xlane.f32.xlu1 %v3382_v35  ;;  %v7472_v32 = vld [vmem:[#allocation3 + $0x38] sm:$0xff] }
 0x2da   :  { %v7362_v55 = vpop.f32.mrb[10].mxu0  ;;  %v7364_v39 = vpop.f32.mrb[14].mxu1 }
 0x2db   :  { %v6195_v15 = vpop.f32.mrb[11].mxu0  ;;  %v6200_v41 = vpop.f32.mrb[15].mxu1  ;;  %v3391_v42 = vsel %vm3357_vm4, %v7364_v39, -inf  ;;  %v3388_v25 = vsel %vm3357_vm4, %v7362_v55, -inf }
 0x2dc   :  { %3392 = vmax.xlane.f32.xlu0 %v3391_v42  ;;  %3389 = vmax.xlane.f32.xlu1 %v3388_v25  ;;  %v7480_v41 = vld [vmem:[#allocation3 + $0x40] sm:$0xff]  ;;  %v7482_v42 = vld [vmem:[#allocation3 + $0x48] sm:$0xff] }
 0x2de   :  { %v7370_v26 = vpop.f32.mrb[12].mxu0  ;;  %v7372_v27 = vpop.f32.mrb[16].mxu1 }
 0x2df   :  { %v6205_v28 = vpop.f32.mrb[13].mxu0  ;;  %v6210_v43 = vpop.f32.mrb[17].mxu1  ;;  %v3397_v48 = vsel %vm3357_vm4, %v7372_v27, -inf  ;;  %v3394_v56 = vsel %vm3357_vm4, %v7370_v26, -inf }
 0x2e0   :  { %3398 = vmax.xlane.f32.xlu0 %v3397_v48  ;;  %3395 = vmax.xlane.f32.xlu1 %v3394_v56  ;;  %v7540_v28 = vld [vmem:[#allocation3 + $0x70] sm:$0xff] }
 0x2e1   :  { %8039 = vst [vmem:[#allocation27_spill] sm:$0xff] %v7540_v28 }
 0x2e2   :  { %v7378_v58 = vpop.f32.mrb[14].mxu0  ;;  %v7380_v63 = vpop.f32.mrb[18].mxu1 }
 0x2e3   :  { %v6215_v3 = vpop.f32.mrb[15].mxu0  ;;  %v6220_v4 = vpop.f32.mrb[19].mxu1  ;;  %v3403_v50 = vsel %vm3357_vm4, %v7380_v63, -inf  ;;  %v3400_v22 = vsel %vm3357_vm4, %v7378_v58, -inf }
 0x2e4   :  { %3404 = vmax.xlane.f32.xlu0 %v3403_v50  ;;  %3401 = vmax.xlane.f32.xlu1 %v3400_v22  ;;  %v7500_v4 = vld [vmem:[#allocation3 + $0x50] sm:$0xff]  ;;  %v7502_v50 = vld [vmem:[#allocation3 + $0x58] sm:$0xff] }
 0x2f5   :  { %1536 = vrot.lane.b32.xlu1 %v6878_v46, %s6618_s15  ;;  %v7402_v46 = vld [vmem:[#allocation3] sm:$0xff] }
 0x2f9   :  { %1544 = vrot.lane.b32.xlu1 %v6889_v57, %s6618_s15 }
 0x2fa   :  { %1532 = vrot.lane.b32.xlu0 %v6867_v36, %s6618_s15 }
 0x2fd   :  { %1522 = vrot.lane.b32.xlu1 %v6979_v5, %s6618_s15 }
 0x2fe   :  { %1540 = vrot.lane.b32.xlu0 %v6876_v45, %s6618_s15 }
 0x301   :  { %1530 = vrot.lane.b32.xlu1 %v6998_v54, %s6618_s15 }
 0x302   :  { %1518 = vrot.lane.b32.xlu0 %v6758_v16, %s6618_s15  ;;  %v7414_v16 = vld [vmem:[#allocation3 + $0x8] sm:$0xff] }
 0x306   :  { %1526 = vrot.lane.b32.xlu0 %v7010_v61, %s6618_s15 }
 0x338   :  { %v3360_v57 = vpop.xlane.xlu0 %3359 }
 0x339   :  { %v7405_v36 = vmax.f32 %v7402_v46, %v3360_v57 }
 0x33b   :  { %5023 = vst.msk [vmem:[#allocation3] sm:$0xff] %vm791_vm3, %v7405_v36  ;;  %3472 = vperm.xlu1 %6364, %v7405_v36  }
 0x33c   :  { %v3366_v5 = vpop.xlane.xlu0 %3365 }
 0x33d   :  { %v3363_v54 = vpop.xlane.xlu1 %3362  ;;  %v7417_v61 = vmax.f32 %v7407_v10, %v3366_v5 }
 0x33e   :  { %v7420_v12 = vmax.f32 %v7414_v16, %v3363_v54 }
 0x33f   :  { %5025 = vst.msk [vmem:[#allocation3 + $0x10] sm:$0xff] %vm791_vm3, %v7417_v61  ;;  %3482 = vperm.xlu1 %6364, %v7417_v61  }
 0x340   :  { %5024 = vst.msk [vmem:[#allocation3 + $0x8] sm:$0xff] %vm791_vm3, %v7420_v12  ;;  %3477 = vperm.xlu0 %6365, %v7420_v12  }
 0x341   :  { %v3369_v23 = vpop.xlane.xlu0 %3368 }
 0x342   :  { %v7435_v9 = vmax.f32 %v7427_v17, %v3369_v23 }
 0x343   :  { %1538 = vrot.lane.b32.xlu1 %v7050_v11, %s6618_s15 }
 0x344   :  { %5026 = vst.msk [vmem:[#allocation3 + $0x18] sm:$0xff] %vm791_vm3, %v7435_v9  ;;  %1534 = vrot.lane.b32.xlu0 %v7108_v38, %s6618_s15  ;;  %v7542_v38 = vld [vmem:[#allocation3 + $0x78] sm:$0xff] }
 0x345   :  { %8040 = vst [vmem:[#allocation28_spill] sm:$0xff] %v7542_v38 }
 0x347   :  { %1546 = vrot.lane.b32.xlu1 %v7102_v37, %s6618_s15 }
 0x348   :  { %1542 = vrot.lane.b32.xlu0 %v7127_v24, %s6618_s15  ;;  %v7470_v24 = vld [vmem:[#allocation3 + $0x30] sm:$0xff] }
 0x349   :  { %8032 = vst [vmem:[#allocation20_spill] sm:$0xff] %v7470_v24 }
 0x34a   :  { %v3372_v11 = vpop.xlane.xlu1 %3371 }
 0x34b   :  { %v7454_v60 = vmax.f32 %v7445_v20, %v3372_v11  ;;  %v3375_v2 = vpop.xlane.xlu0 %3374 }
 0x34c   :  { %v7457_v51 = vmax.f32 %v7449_v59, %v3375_v2  ;;  %v7520_v2 = vld [vmem:[#allocation3 + $0x60] sm:$0xff] }
 0x34d   :  { %5027 = vst.msk [vmem:[#allocation3 + $0x20] sm:$0xff] %vm791_vm3, %v7454_v60  ;;  %3492 = vperm.xlu1 %6364, %v7454_v60   ;;  %8035 = vst [vmem:[#allocation23_spill] sm:$0xff] %v7520_v2 }
 0x34e   :  { %5028 = vst.msk [vmem:[#allocation3 + $0x28] sm:$0xff] %vm791_vm3, %v7457_v51 }
 0x351   :  { %3487 = vperm.xlu1 %6364, %v7435_v9  }
 0x355   :  { %3497 = vperm.xlu1 %6364, %v7457_v51  }
 0x361   :  { %v3378_v34 = vpop.xlane.xlu1 %3377  ;;  %v3381_v47 = vpop.xlane.xlu0 %3380 }
 0x362   :  { %v7475_v35 = vmax.f32 %v7470_v24, %v3378_v34  ;;  %v7478_v15 = vmax.f32 %v7472_v32, %v3381_v47  ;;  %v7522_v34 = vld [vmem:[#allocation3 + $0x68] sm:$0xff] }
 0x363   :  { %8036 = vst [vmem:[#allocation24_spill] sm:$0xff] %v7522_v34 }
 0x364   :  { %8033 = vst [vmem:[#allocation21_spill] sm:$0xff] %v7475_v35  ;;  %8034 = vst [vmem:[#allocation22_spill] sm:$0xff] %v7478_v15  ;;  %3502 = vperm.xlu0 %6365, %v7475_v35   ;;  %3507 = vperm.xlu1 %6364, %v7478_v15  }
 0x365   :  { %5029 = vst.msk [vmem:[#allocation3 + $0x30] sm:$0xff] %vm791_vm3, %v7475_v35  ;;  %5030 = vst.msk [vmem:[#allocation3 + $0x38] sm:$0xff] %vm791_vm3, %v7478_v15  ;;  %v3384_v43 = vpop.xlane.xlu1 %3383  ;;  %v3387_v48 = vpop.xlane.xlu0 %3386 }
 0x366   :  { %v7495_v56 = vmax.f32 %v7480_v41, %v3384_v43  ;;  %v7498_v3 = vmax.f32 %v7482_v42, %v3387_v48 }
 0x368   :  { %5031 = vst.msk [vmem:[#allocation3 + $0x40] sm:$0xff] %vm791_vm3, %v7495_v56  ;;  %5032 = vst.msk [vmem:[#allocation3 + $0x48] sm:$0xff] %vm791_vm3, %v7498_v3  ;;  %3512 = vperm.xlu0 %6365, %v7495_v56   ;;  %3517 = vperm.xlu1 %6364, %v7498_v3  }
 0x369   :  { %v3390_v5 = vpop.xlane.xlu1 %3389  ;;  %v3393_v54 = vpop.xlane.xlu0 %3392 }
 0x36a   :  { %v7515_v23 = vmax.f32 %v7500_v4, %v3390_v5  ;;  %v7518_v11 = vmax.f32 %v7502_v50, %v3393_v54 }
 0x36c   :  { %5033 = vst.msk [vmem:[#allocation3 + $0x50] sm:$0xff] %vm791_vm3, %v7515_v23  ;;  %5034 = vst.msk [vmem:[#allocation3 + $0x58] sm:$0xff] %vm791_vm3, %v7518_v11  ;;  %3522 = vperm.xlu0 %6365, %v7515_v23   ;;  %3527 = vperm.xlu1 %6364, %v7518_v11  }
 0x36d   :  { %v3396_v48 = vpop.xlane.xlu1 %3395  ;;  %v3399_v5 = vpop.xlane.xlu0 %3398 }
 0x36e   :  { %v7535_v54 = vmax.f32 %v7520_v2, %v3396_v48  ;;  %v7538_v25 = vmax.f32 %v7522_v34, %v3399_v5 }
 0x370   :  { %8037 = vst [vmem:[#allocation25_spill] sm:$0xff] %v7535_v54  ;;  %8038 = vst [vmem:[#allocation26_spill] sm:$0xff] %v7538_v25  ;;  %3532 = vperm.xlu0 %6365, %v7535_v54   ;;  %3537 = vperm.xlu1 %6364, %v7538_v25  }
 0x371   :  { %5035 = vst.msk [vmem:[#allocation3 + $0x60] sm:$0xff] %vm791_vm3, %v7535_v54  ;;  %5036 = vst.msk [vmem:[#allocation3 + $0x68] sm:$0xff] %vm791_vm3, %v7538_v25  ;;  %v3402_v48 = vpop.xlane.xlu1 %3401  ;;  %v3405_v5 = vpop.xlane.xlu0 %3404 }
 0x372   :  { %v7555_v43 = vmax.f32 %v7540_v28, %v3402_v48  ;;  %v7558_v37 = vmax.f32 %v7542_v38, %v3405_v5 }
 0x374   :  { %8041 = vst [vmem:[#allocation29_spill] sm:$0xff] %v7555_v43  ;;  %8042 = vst [vmem:[#allocation30_spill] sm:$0xff] %v7558_v37  ;;  %3542 = vperm.xlu0 %6365, %v7555_v43   ;;  %3547 = vperm.xlu1 %6364, %v7558_v37  }
 0x375   :  { %5037 = vst.msk [vmem:[#allocation3 + $0x70] sm:$0xff] %vm791_vm3, %v7555_v43  ;;  %5038 = vst.msk [vmem:[#allocation3 + $0x78] sm:$0xff] %vm791_vm3, %v7558_v37  ;;  %v1537_v48 = vpop.permute.xlu1 %1536  ;;  %v1533_v57 = vpop.permute.xlu0 %1532 }
 0x379   :  { %v1545_v5 = vpop.permute.xlu1 %1544  ;;  %v1541_v19 = vpop.permute.xlu0 %1540 }
 0x37a   :  { %v1612_v29 = vcombine.low %v1537_v48, %v1545_v5  ;;  %v1596_v14 = vcombine.low %v1533_v57, %v1541_v19  ;;  %v1613_v22 = vcombine.high %v1537_v48, %v1545_v5  ;;  %v1597_v45 = vcombine.high %v1533_v57, %v1541_v19 }
 0x37c   :  { %v1620_v62 = vrot.slane %v1612_v29, %v6863_v33  ;;  %v1604_v21 = vrot.slane %v1596_v14, %v6863_v33  ;;  %v1627_v44 = vrot.slane %v1613_v22, %v6863_v33  ;;  %v1611_v43 = vrot.slane %v1597_v45, %v6863_v33 }
 0x37d   :  { %v7572_v47 = vpop.permute.xlu1 %1522  ;;  %v1519_v2 = vpop.permute.xlu0 %1518 }
 0x37e   :  { %v1660_v28 = vcombine.low %v1604_v21, %v1620_v62  ;;  %v1661_v37 = vcombine.high %v1604_v21, %v1620_v62  ;;  %v1676_v38 = vcombine.low %v1611_v43, %v1627_v44  ;;  %v1677_v54 = vcombine.high %v1611_v43, %v1627_v44 }
 0x380   :  { %v1668_v34 = vrot.slane %v1660_v28, %v6870_v40  ;;  %v1675_v19 = vrot.slane %v1661_v37, %v6870_v40  ;;  %v1684_v29 = vrot.slane %v1676_v38, %v6870_v40  ;;  %v1691_v14 = vrot.slane %v1677_v54, %v6870_v40 }
 0x381   :  { %v1531_v25 = vpop.permute.xlu1 %1530  ;;  %v1527_v48 = vpop.permute.xlu0 %1526 }
 0x382   :  { %v5955_v5 = vcombine.low %v1668_v34, %v1675_v19  ;;  %v5957_v45 = vcombine.high %v1668_v34, %v1675_v19  ;;  %v5959_v35 = vcombine.low %v1684_v29, %v1691_v14  ;;  %v5961_v21 = vcombine.high %v1684_v29, %v1691_v14 }
 0x384   :  { %v7583_v37 = vrot.slane %v5955_v5, %v6863_v33  ;;  %v7587_v54 = vrot.slane %v5957_v45, %v6863_v33  ;;  %v7593_v34 = vrot.slane %v5961_v21, %v6863_v33  ;;  %v8043_v21 = vcombine.low %v7263_v53, %v7266_v30 }
 0x3ba   :  { %v3473_v57 = vpop.permute.xlu1 %3472 }
 0x3bb   :  { %v3550_v22 = vsub.f32 %v7322_v0, %v3473_v57  ;;  %v7590_v0 = vrot.slane %v5959_v35, %v6863_v33 }
 0x3bd   :  { %v3566_v62 = vmul.f32 1.442695, %v3550_v22 }
 0x3be   :  { %v3483_v44 = vpop.permute.xlu1 %3482 }
 0x3bf   :  { %6366 = vpow2.f32 %v3566_v62  ;;  %v3552_v43 = vsub.f32 %v7326_v49, %v3483_v44  ;;  %v3478_v28 = vpop.permute.xlu0 %3477  ;;  %v1916_v49 = vcombine.low %v7583_v37, %v7587_v54  ;;  %v1716_v44 = vcombine.low %v7572_v47, %v1531_v25 }
 0x3c0   :  { %v3551_v38 = vsub.f32 %v7328_v7, %v3478_v28  ;;  %v1948_v7 = vcombine.low %v7590_v0, %v7593_v34  ;;  %v8044_v28 = vmov 0.0  }
 0x3c1   :  { %v3570_v19 = vmul.f32 1.442695, %v3552_v43  ;;  %v7604_v35 = vrot.slane %v1916_v49, %v6870_v40  ;;  %v1700_v43 = vcombine.low %v1519_v2, %v1527_v48 }
 0x3c2   :  { %v3568_v29 = vmul.f32 1.442695, %v3551_v38  ;;  %v7595_v14 = vpop.permute.xlu1 %1538  ;;  %v7607_v5 = vrot.slane %v1948_v7, %v6870_v40 }
 0x3c3   :  { %6368 = vpow2.f32 %v3570_v19  ;;  %v1717_v19 = vcombine.high %v7572_v47, %v1531_v25  ;;  %v1535_v49 = vpop.permute.xlu0 %1534  ;;  %v8045_v47 = vcombine.high %v7263_v53, %v7266_v30  ;;  %v1917_v53 = vcombine.high %v7583_v37, %v7587_v54 }
 0x3c4   :  { %6370 = vpow2.f32 %v3568_v29  ;;  %v1701_v29 = vcombine.high %v1519_v2, %v1527_v48  ;;  %v1724_v2 = vrot.slane %v1716_v44, %v6863_v33  ;;  %v1949_v30 = vcombine.high %v7590_v0, %v7593_v34 }
 0x3c5   :  { %v1731_v48 = vrot.slane %v1717_v19, %v6863_v33  ;;  %v1931_v34 = vrot.slane %v1917_v53, %v6870_v40 }
 0x3c6   :  { %v7601_v57 = vpop.permute.xlu1 %1546 }
 0x3c7   :  { %v1749_v54 = vcombine.high %v7595_v14, %v7601_v57 }
 0x3c9   :  { %v6367_v22 = vpop.eup %6366 }
 0x3ca   :  { %6224 = vmatmul.mubr.msk.f32.vlgmr.msra.gmra.mrb[16].mxu0 %vm3357_vm4, %v6367_v22  ;;  %v3630_v45 = vsel %vm3357_vm4, %v6367_v22, 0.0  ;;  %v1968_v22 = vcombine.low %v7604_v35, %v7607_v5 }
 0x3cb   :  { %6232 = vmatpush3.msra.mxu0 %v8043_v21  ;;  %3631 = vadd.xlane.f32.xlu0 %v3630_v45 }
 0x3cc   :  { %v3493_v62 = vpop.permute.xlu1 %3492  ;;  %6233 = vmatprep.mubr.msk.f32.mxu0 %vm6617_vm2, %v8044_v28  ;;  %6241 = vmatprep.subr.mxu0 %v8044_v28 }
 0x3cd   :  { %v6369_v38 = vpop.eup %6368  ;;  %v3554_v7 = vsub.f32 %v7338_v18, %v3493_v62  ;;  %v1708_v18 = vrot.slane %v1700_v43, %v6863_v33  ;;  %v1715_v62 = vrot.slane %v1701_v29, %v6863_v33  ;;  %v1748_v29 = vcombine.low %v7595_v14, %v7601_v57 }
 0x3ce   :  { %v6371_v21 = vpop.eup %6370  ;;  %6234 = vmatmul.mubr.msk.f32.vlgmr.msra.gmra.mrb[18].mxu0 %vm3357_vm4, %v6369_v38  ;;  %v3636_v15 = vsel %vm3357_vm4, %v6369_v38, 0.0  ;;  %v1543_v38 = vpop.permute.xlu0 %1542  ;;  %v1763_v14 = vrot.slane %v1749_v54, %v6863_v33 }
 0x3cf   :  { %v3574_v45 = vmul.f32 1.442695, %v3554_v7  ;;  %6229 = vmatmul.mubr.msk.f32.vlgmr.msra.gmra.mrb[20].mxu1 %vm3357_vm4, %v6371_v21  ;;  %6242 = vmatpush3.msra.mxu0 %v1968_v22  ;;  %v3633_v25 = vsel %vm3357_vm4, %v6371_v21, 0.0  ;;  %v1780_v43 = vcombine.low %v1715_v62, %v1731_v48  ;;  %v1781_v19 = vcombine.high %v1715_v62, %v1731_v48 }
 0x3d0   :  { %v3488_v24 = vpop.permute.xlu1 %3487  ;;  %6237 = vmatpush3.msra.mxu1 %v8045_v47  ;;  %3637 = vadd.xlane.f32.xlu0 %v3636_v15  ;;  %v1732_v21 = vcombine.low %v1535_v49, %v1543_v38  ;;  %v1733_v0 = vcombine.high %v1535_v49, %v1543_v38  ;;  %v1756_v47 = vrot.slane %v1748_v29, %v6863_v33 }
 0x3d1   :  { %6372 = vpow2.f32 %v3574_v45  ;;  %v3553_v7 = vsub.f32 %v7334_v13, %v3488_v24  ;;  %3634 = vadd.xlane.f32.xlu1 %v3633_v25  ;;  %6243 = vmatprep.mubr.msk.f32.mxu0 %vm6617_vm2, %v8044_v28  ;;  %v1764_v13 = vcombine.low %v1708_v18, %v1724_v2  ;;  %v1765_v24 = vcombine.high %v1708_v18, %v1724_v2 }
 0x3d2   :  { %6251 = vmatprep.subr.mxu0 %v8044_v28  ;;  %6238 = vmatprep.mubr.msk.f32.mxu1 %vm6617_vm2, %v8044_v28  ;;  %v1963_v45 = vrot.slane %v1949_v30, %v6870_v40  ;;  %v1788_v2 = vrot.slane %v1780_v43, %v6870_v40  ;;  %v1795_v18 = vrot.slane %v1781_v19, %v6870_v40 }
 0x3d3   :  { %v3572_v44 = vmul.f32 1.442695, %v3553_v7  ;;  %6246 = vmatprep.subr.mxu1 %v8044_v28  ;;  %v1779_v25 = vrot.slane %v1765_v24, %v6870_v40  ;;  %v1740_v48 = vrot.slane %v1732_v21, %v6863_v33  ;;  %v1747_v57 = vrot.slane %v1733_v0, %v6863_v33 }
 0x3d4   :  { %v3498_v22 = vpop.permute.xlu1 %3497  ;;  %v1970_v49 = vcombine.low %v1931_v34, %v1963_v45  ;;  %v5968_v53 = vcombine.high %v1788_v2, %v1795_v18  ;;  %v1969_v19 = vcombine.high %v7604_v35, %v7607_v5 }
 0x3d5   :  { %v3555_v15 = vsub.f32 %v7340_v8, %v3498_v22  ;;  %6374 = vpow2.f32 %v3572_v44  ;;  %v1772_v8 = vrot.slane %v1764_v13, %v6870_v40  ;;  %v5966_v22 = vcombine.low %v1788_v2, %v1795_v18 }
 0x3d6   :  { %v1796_v30 = vcombine.low %v1740_v48, %v1756_v47  ;;  %v1797_v24 = vcombine.high %v1740_v48, %v1756_v47  ;;  %v1813_v43 = vcombine.high %v1747_v57, %v1763_v14 }
 0x3d7   :  { %v3576_v37 = vmul.f32 1.442695, %v3555_v15  ;;  %v5962_v7 = vcombine.low %v1772_v8, %v1779_v25  ;;  %v5964_v44 = vcombine.high %v1772_v8, %v1779_v25  ;;  %v1812_v15 = vcombine.low %v1747_v57, %v1763_v14 }
 0x3d8   :  { %v2012_v0 = vrot.slane %v5966_v22, %v6863_v33  ;;  %v2028_v8 = vrot.slane %v5968_v53, %v6863_v33  ;;  %v1804_v35 = vrot.slane %v1796_v30, %v6870_v40  ;;  %v1827_v48 = vrot.slane %v1813_v43, %v6870_v40 }
 0x3d9   :  { %6376 = vpow2.f32 %v3576_v37  ;;  %v1980_v29 = vrot.slane %v5962_v7, %v6863_v33  ;;  %v1971_v37 = vcombine.high %v1931_v34, %v1963_v45  ;;  %v1996_v54 = vrot.slane %v5964_v44, %v6863_v33 }
 0x3da   :  { %v1811_v34 = vrot.slane %v1797_v24, %v6870_v40  ;;  %v1820_v45 = vrot.slane %v1812_v15, %v6870_v40  ;;  %v2068_v44 = vcombine.low %v2012_v0, %v2028_v8 }
 0x3db   :  { %v6373_v62 = vpop.eup %6372 }
 0x3dc   :  { %6244 = vmatmul.mubr.msk.f32.vlgmr.msra.gmra.mrb[20].mxu0 %vm3357_vm4, %v6373_v62  ;;  %v3642_v38 = vsel %vm3357_vm4, %v6373_v62, 0.0  ;;  %v5963_v22 = vcombine.low %v1804_v35, %v1811_v34  ;;  %v5965_v53 = vcombine.high %v1804_v35, %v1811_v34  ;;  %v5967_v30 = vcombine.low %v1820_v45, %v1827_v48 }
 0x3dd   :  { %6252 = vmatpush3.msra.mxu0 %v1970_v49  ;;  %3643 = vadd.xlane.f32.xlu1 %v3642_v38 }
 0x3de   :  { %6253 = vmatprep.mubr.msk.f32.mxu0 %vm6617_vm2, %v8044_v28  ;;  %6261 = vmatprep.subr.mxu0 %v8044_v28  ;;  %v2019_v35 = vrot.slane %v5967_v30, %v6863_v33 }
 0x3df   :  { %v6375_v13 = vpop.eup %6374 }
 0x3e0   :  { %6239 = vmatmul.mubr.msk.f32.vlgmr.msra.gmra.mrb[22].mxu1 %vm3357_vm4, %v6375_v13  ;;  %v3639_v21 = vsel %vm3357_vm4, %v6375_v13, 0.0  ;;  %v5969_v13 = vcombine.high %v1820_v45, %v1827_v48 }
 0x3e1   :  { %6247 = vmatpush3.msra.mxu1 %v1969_v19  ;;  %3640 = vadd.xlane.f32.xlu0 %v3639_v21  ;;  %v2037_v21 = vcombine.high %v1980_v29, %v1996_v54 }
 0x3e2   :  { %6248 = vmatprep.mubr.msk.f32.mxu1 %vm6617_vm2, %v8044_v28  ;;  %6256 = vmatprep.subr.mxu1 %v8044_v28 }
 0x3e3   :  { %v3503_v25 = vpop.permute.xlu0 %3502  ;;  %v3508_v2 = vpop.permute.xlu1 %3507 }
 0x3e4   :  { %v6377_v18 = vpop.eup %6376  ;;  %v3556_v5 = vsub.f32 %v7346_v31, %v3503_v25  ;;  %v3557_v47 = vsub.f32 %v7348_v1, %v3508_v2  ;;  %v2036_v1 = vcombine.low %v1980_v29, %v1996_v54  ;;  %v1987_v2 = vrot.slane %v5963_v22, %v6863_v33 }
 0x3e5   :  { %v3645_v62 = vsel %vm3357_vm4, %v6377_v18, 0.0  ;;  %6249 = vmatmul.mubr.msk.f32.vlgmr.msra.gmra.mrb[24].mxu1 %vm3357_vm4, %v6377_v18  ;;  %v2003_v18 = vrot.slane %v5965_v53, %v6863_v33 }
 0x3e6   :  { %v3578_v14 = vmul.f32 1.442695, %v3556_v5  ;;  %v3580_v57 = vmul.f32 1.442695, %v3557_v47  ;;  %6257 = vmatpush3.msra.mxu1 %v1971_v37  ;;  %3646 = vadd.xlane.f32.xlu0 %v3645_v62  ;;  %v2069_v37 = vcombine.high %v2012_v0, %v2028_v8  ;;  %v2044_v25 = vrot.slane %v2036_v1, %v6870_v40 }
 0x3e7   :  { %v3513_v31 = vpop.permute.xlu0 %3512  ;;  %v3518_v49 = vpop.permute.xlu1 %3517  ;;  %6258 = vmatprep.mubr.msk.f32.mxu1 %vm6617_vm2, %v8044_v28  ;;  %6266 = vmatprep.subr.mxu1 %v8044_v28  ;;  %v2076_v5 = vrot.slane %v2068_v44, %v6870_v40  ;;  %v2035_v47 = vrot.slane %v5969_v13, %v6863_v33  ;;  %v2052_v62 = vcombine.low %v1987_v2, %v2003_v18 }
 0x3e8   :  { %6378 = vpow2.f32 %v3578_v14  ;;  %v3558_v7 = vsub.f32 %v7354_v52, %v3513_v31  ;;  %v3559_v38 = vsub.f32 %v7356_v6, %v3518_v49 }
 0x3e9   :  { %6380 = vpow2.f32 %v3580_v57  ;;  %v2100_v48 = vcombine.low %v2044_v25, %v2076_v5  ;;  %v2084_v49 = vcombine.low %v2019_v35, %v2035_v47  ;;  %v2060_v13 = vrot.slane %v2052_v62, %v6870_v40 }
 0x3ea   :  { %v3582_v24 = vmul.f32 1.442695, %v3558_v7  ;;  %v3584_v15 = vmul.f32 1.442695, %v3559_v38 }
 0x3eb   :  { %v3523_v43 = vpop.permute.xlu0 %3522  ;;  %v3528_v19 = vpop.permute.xlu1 %3527 }
 0x3ec   :  { %6382 = vpow2.f32 %v3582_v24  ;;  %v3560_v52 = vsub.f32 %v7362_v55, %v3523_v43  ;;  %v3561_v6 = vsub.f32 %v7364_v39, %v3528_v19  ;;  %v7697_v55 = vrot.slane %v2037_v21, %v6870_v40 }
 0x3ed   :  { %6384 = vpow2.f32 %v3584_v15  ;;  %v7700_v39 = vrot.slane %v2069_v37, %v6870_v40  ;;  %v2053_v24 = vcombine.high %v1987_v2, %v2003_v18  ;;  %v2085_v15 = vcombine.high %v2019_v35, %v2035_v47 }
 0x3ee   :  { %v3586_v34 = vmul.f32 1.442695, %v3560_v52  ;;  %v3588_v29 = vmul.f32 1.442695, %v3561_v6 }
 0x3ef   :  { %v3533_v54 = vpop.permute.xlu0 %3532  ;;  %v3538_v0 = vpop.permute.xlu1 %3537  ;;  %v2102_v44 = vcombine.low %v7697_v55, %v7700_v39  ;;  %v2099_v2 = vrot.slane %v2085_v15, %v6870_v40  ;;  %v2103_v47 = vcombine.high %v7697_v55, %v7700_v39 }
 0x3f0   :  { %6386 = vpow2.f32 %v3586_v34  ;;  %v3562_v8 = vsub.f32 %v7370_v26, %v3533_v54  ;;  %v3563_v45 = vsub.f32 %v7372_v27, %v3538_v0  ;;  %v2101_v26 = vcombine.high %v2044_v25, %v2076_v5 }
 0x3f1   :  { %6388 = vpow2.f32 %v3588_v29  ;;  %v2067_v25 = vrot.slane %v2053_v24, %v6870_v40 }
 0x3f2   :  { %v6379_v14 = vpop.eup %6378  ;;  %v3590_v57 = vmul.f32 1.442695, %v3562_v8  ;;  %v3592_v31 = vmul.f32 1.442695, %v3563_v45 }
 0x3f3   :  { %v6381_v1 = vpop.eup %6380  ;;  %v3543_v7 = vpop.permute.xlu0 %3542  ;;  %6254 = vmatmul.mubr.msk.f32.vlgmr.msra.gmra.mrb[22].mxu0 %vm3357_vm4, %v6379_v14  ;;  %v3648_v38 = vsel %vm3357_vm4, %v6379_v14, 0.0  ;;  %v2106_v29 = vcombine.low %v2067_v25, %v2099_v2  ;;  %v2107_v14 = vcombine.high %v2067_v25, %v2099_v2 }
 0x3f4   :  { %v3548_v22 = vpop.permute.xlu1 %3547  ;;  %6390 = vpow2.f32 %v3590_v57  ;;  %v3564_v27 = vsub.f32 %v7378_v58, %v3543_v7  ;;  %6262 = vmatpush3.msra.mxu0 %v2100_v48  ;;  %3649 = vadd.xlane.f32.xlu1 %v3648_v38  ;;  %v3651_v30 = vsel %vm3357_vm4, %v6381_v1, 0.0  ;;  %v2092_v58 = vrot.slane %v2084_v49, %v6870_v40 }
 0x3f5   :  { %v3565_v53 = vsub.f32 %v7380_v63, %v3548_v22  ;;  %6263 = vmatprep.mubr.msk.f32.mxu0 %vm6617_vm2, %v8044_v28  ;;  %6271 = vmatprep.subr.mxu0 %v8044_v28  ;;  %6392 = vpow2.f32 %v3592_v31  ;;  %v8046_v57 = vsub.f32 %v7402_v46, %v7405_v36  ;;  %v8048_v46 = vsub.f32 %v7427_v17, %v7435_v9 }
 0x3f6   :  { %v6383_v43 = vpop.eup %6382  ;;  %v3594_v19 = vmul.f32 1.442695, %v3564_v27  ;;  %6259 = vmatmul.mubr.msk.f32.vlgmr.msra.gmra.mrb[26].mxu1 %vm3357_vm4, %v6381_v1  ;;  %3652 = vadd.xlane.f32.xlu0 %v3651_v30  ;;  %v2104_v6 = vcombine.low %v2060_v13, %v2092_v58  ;;  %v2105_v55 = vcombine.high %v2060_v13, %v2092_v58  ;;  %v8047_v1 = vsub.f32 %v7407_v10, %v7417_v61  ;;  %v8065_v58 = vld [vmem:[#allocation25_spill] sm:$0xff] }
 0x3f7   :  { %v3596_v21 = vmul.f32 1.442695, %v3565_v53  ;;  %6264 = vmatmul.mubr.msk.f32.vlgmr.msra.gmra.mrb[24].mxu0 %vm3357_vm4, %v6383_v43  ;;  %v3654_v63 = vsel %vm3357_vm4, %v6383_v43, 0.0  ;;  %6267 = vmatpush3.msra.mxu1 %v2101_v26  ;;  %v6385_v37 = vpop.eup %6384  ;;  %v3438_v31 = vmul.f32 1.442695, %v8046_v57  ;;  %v8049_v38 = vsub.f32 %v7414_v16, %v7420_v12 }
 0x3f8   :  { %6394 = vpow2.f32 %v3594_v19  ;;  %6272 = vmatpush3.msra.mxu0 %v2102_v44  ;;  %3655 = vadd.xlane.f32.xlu1 %v3654_v63  ;;  %v3657_v35 = vsel %vm3357_vm4, %v6385_v37, 0.0  ;;  %v3442_v7 = vmul.f32 1.442695, %v8047_v1  ;;  %v3444_v36 = vmul.f32 1.442695, %v8048_v46  ;;  %v3600_v1 = vld [vmem:[#allocation4 + $0x10] sm:$0xff] }
 0x3f9   :  { %6273 = vmatprep.mubr.msk.f32.mxu0 %vm6617_vm2, %v8044_v28  ;;  %6281 = vmatprep.subr.mxu0 %v8044_v28  ;;  %6396 = vpow2.f32 %v3596_v21  ;;  %v3440_v44 = vmul.f32 1.442695, %v8049_v38  ;;  %v8051_v10 = vsub.f32 %v7480_v41, %v7495_v56  ;;  %v8052_v17 = vsub.f32 %v7502_v50, %v7518_v11  ;;  %v8056_v50 = vld [vmem:[#allocation22_spill] sm:$0xff]  ;;  %v8064_v21 = vld [vmem:[#allocation23_spill] sm:$0xff] }
 0x3fa   :  { %v6387_v52 = vpop.eup %6386  ;;  %6268 = vmatprep.mubr.msk.f32.mxu1 %vm6617_vm2, %v8044_v28  ;;  %6276 = vmatprep.subr.mxu1 %v8044_v28  ;;  %6398 = vpow2.f32 %v3438_v31  ;;  %v8053_v16 = vsub.f32 %v7500_v4, %v7515_v23  ;;  %v8055_v56 = vsub.f32 %v7445_v20, %v7454_v60  ;;  %v8057_v4 = vsub.f32 %v7472_v32, %v8056_v50  ;;  %v8061_v20 = vld [vmem:[#allocation24_spill] sm:$0xff]  ;;  %v8062_v60 = vld [vmem:[#allocation26_spill] sm:$0xff] }
 0x3fb   :  { %6274 = vmatmul.mubr.msk.f32.vlgmr.msra.gmra.mrb[26].mxu0 %vm3357_vm4, %v6387_v52  ;;  %v3660_v18 = vsel %vm3357_vm4, %v6387_v52, 0.0  ;;  %6269 = vmatmul.mubr.msk.f32.vlgmr.msra.gmra.mrb[28].mxu1 %vm3357_vm4, %v6385_v37  ;;  %v6389_v5 = vpop.eup %6388  ;;  %6400 = vpow2.f32 %v3442_v7  ;;  %v3454_v61 = vmul.f32 1.442695, %v8051_v10  ;;  %v3460_v9 = vmul.f32 1.442695, %v8052_v17  ;;  %v8067_v52 = vld [vmem:[#allocation28_spill] sm:$0xff] }
 0x3fc   :  { %6282 = vmatpush3.msra.mxu0 %v2104_v6  ;;  %3661 = vadd.xlane.f32.xlu1 %v3660_v18  ;;  %v3663_v0 = vsel %vm3357_vm4, %v6389_v5, 0.0  ;;  %6402 = vpow2.f32 %v3444_v36  ;;  %v3458_v12 = vmul.f32 1.442695, %v8053_v16  ;;  %v3446_v53 = vmul.f32 1.442695, %v8055_v56  ;;  %v8068_v6 = vld [vmem:[#allocation30_spill] sm:$0xff] }
 0x3fd   :  { %6283 = vmatprep.mubr.msk.f32.mxu0 %vm6617_vm2, %v8044_v28  ;;  %6291 = vmatprep.subr.mxu0 %v8044_v28  ;;  %6404 = vpow2.f32 %v3440_v44  ;;  %v3452_v23 = vmul.f32 1.442695, %v8057_v4  ;;  %v8063_v15 = vsub.f32 %v8061_v20, %v8062_v60  ;;  %v8066_v63 = vsub.f32 %v8064_v21, %v8065_v58  ;;  %v3602_v10 = vld [vmem:[#allocation4 + $0x20] sm:$0xff]  ;;  %v3601_v16 = vld [vmem:[#allocation4 + $0x18] sm:$0xff]  ;;  %v3603_v56 = vld [vmem:[#allocation4 + $0x28] sm:$0xff] }
 0x3fe   :  { %v6391_v34 = vpop.eup %6390  ;;  %6277 = vmatpush3.msra.mxu1 %v2103_v47  ;;  %3658 = vadd.xlane.f32.xlu0 %v3657_v35  ;;  %v8069_v25 = vsub.f32 %v8067_v52, %v8068_v6  ;;  %v8071_v47 = vld [vmem:[#allocation29_spill] sm:$0xff]  ;;  %v3606_v21 = vld [vmem:[#allocation4 + $0x40] sm:$0xff] }
 0x3ff   :  { %6284 = vmatmul.mubr.msk.f32.vlgmr.msra.gmra.mrb[28].mxu0 %vm3357_vm4, %v6391_v34  ;;  %v3666_v54 = vsel %vm3357_vm4, %v6391_v34, 0.0  ;;  %6278 = vmatprep.mubr.msk.f32.mxu1 %vm6617_vm2, %v8044_v28  ;;  %v6393_v8 = vpop.eup %6392  ;;  %v3464_v43 = vmul.f32 1.442695, %v8063_v15  ;;  %v3462_v37 = vmul.f32 1.442695, %v8066_v63  ;;  %v3605_v20 = vld [vmem:[#allocation4 + $0x38] sm:$0xff] }
 0x400   :  { %6292 = vmatpush3.msra.mxu0 %v2106_v29  ;;  %3667 = vadd.xlane.f32.xlu1 %v3666_v54  ;;  %v3669_v48 = vsel %vm3357_vm4, %v6393_v8, 0.0  ;;  %v3468_v2 = vmul.f32 1.442695, %v8069_v25 }
 0x401   :  { %6286 = vmatprep.subr.mxu1 %v8044_v28  ;;  %6293 = vmatprep.mubr.msk.f32.mxu0 %vm6617_vm2, %v8044_v28 }
 0x402   :  { %v6395_v39 = vpop.eup %6394  ;;  %6279 = vmatmul.mubr.msk.f32.vlgmr.msra.gmra.mrb[30].mxu1 %vm3357_vm4, %v6389_v5  ;;  %3664 = vadd.xlane.f32.xlu0 %v3663_v0  ;;  %v8070_v5 = vld [vmem:[#allocation27_spill] sm:$0xff] }
 0x403   :  { %6287 = vmatpush3.msra.mxu1 %v2105_v55  ;;  %6294 = vmatmul.mubr.msk.f32.vlgmr.msra.gmra.mrb[30].mxu0 %vm3357_vm4, %v6395_v39  ;;  %v3672_v45 = vsel %vm3357_vm4, %v6395_v39, 0.0  ;;  %v6397_v62 = vpop.eup %6396  ;;  %v8072_v34 = vsub.f32 %v8070_v5, %v8071_v47  ;;  %v3607_v47 = vld [vmem:[#allocation4 + $0x48] sm:$0xff] }
 0x404   :  { %3673 = vadd.xlane.f32.xlu1 %v3672_v45  ;;  %6288 = vmatprep.mubr.msk.f32.mxu1 %vm6617_vm2, %v8044_v28  ;;  %v3675_v49 = vsel %vm3357_vm4, %v6397_v62, 0.0  ;;  %v6399_v26 = vpop.eup %6398 }
 0x405   :  { %6296 = vmatprep.subr.mxu1 %v8044_v28  ;;  %v6401_v27 = vpop.eup %6400  ;;  %v3466_v29 = vmul.f32 1.442695, %v8072_v34 }
 0x406   :  { %6289 = vmatmul.mubr.msk.f32.vlgmr.msra.gmra.mrb[32].mxu1 %vm3357_vm4, %v6393_v8  ;;  %3670 = vadd.xlane.f32.xlu0 %v3669_v48  ;;  %v7783_v41 = vpop.eup %6402  ;;  %v3616_v46 = vmul.f32 %v6401_v27, %v3600_v1 }
 0x407   :  { %6297 = vmatpush3.msra.mxu1 %v2107_v14  ;;  %6298 = vmatprep.mubr.msk.f32.mxu1 %vm6617_vm2, %v8044_v28  ;;  %v8050_v28 = vsub.f32 %v7482_v42, %v7498_v3  ;;  %v8054_v42 = vsub.f32 %v7449_v59, %v7457_v51  ;;  %v6405_v11 = vpop.eup %6404  ;;  %v8058_v59 = vld [vmem:[#allocation20_spill] sm:$0xff]  ;;  %v8059_v51 = vld [vmem:[#allocation21_spill] sm:$0xff] }
 0x408   :  { %v8060_v13 = vsub.f32 %v8058_v59, %v8059_v51 }
 0x409   :  { %v3456_v22 = vmul.f32 1.442695, %v8050_v28  ;;  %v3448_v3 = vmul.f32 1.442695, %v8054_v42  ;;  %v3617_v42 = vmul.f32 %v7783_v41, %v3601_v16 }
 0x40a   :  { %6299 = vmatmul.mubr.msk.f32.vlgmr.msra.gmra.mrb[34].mxu1 %vm3357_vm4, %v6397_v62  ;;  %3676 = vadd.xlane.f32.xlu0 %v3675_v49  ;;  %v3450_v24 = vmul.f32 1.442695, %v8060_v13  ;;  %v3598_v62 = vld [vmem:[#allocation4] sm:$0xff]  ;;  %v3599_v49 = vld [vmem:[#allocation4 + $0x8] sm:$0xff] }
 0x40b   :  { %6406 = vpow2.f32 %v3456_v22  ;;  %v3614_v14 = vmul.f32 %v6399_v26, %v3598_v62  ;;  %v3615_v7 = vmul.f32 %v6405_v11, %v3599_v49 }
 0x40c   :  { %6408 = vpow2.f32 %v3454_v61 }
 0x40d   :  { %6410 = vpow2.f32 %v3460_v9 }
 0x40e   :  { %6412 = vpow2.f32 %v3458_v12 }
 0x40f   :  { %6414 = vpow2.f32 %v3448_v3 }
 0x410   :  { %6416 = vpow2.f32 %v3446_v53 }
 0x411   :  { %6418 = vpow2.f32 %v3452_v23 }
 0x412   :  { %6420 = vpow2.f32 %v3450_v24 }
 0x413   :  { %6422 = vpow2.f32 %v3464_v43 }
 0x414   :  { %6424 = vpow2.f32 %v3462_v37 }
 0x415   :  { %3729 = vperm.xlu1 %6364, %v6399_v26   ;;  %v7792_v30 = vpop.eup %6406  ;;  %6426 = vpow2.f32 %v3468_v2 }
 0x416   :  { %v7801_v19 = vpop.eup %6408  ;;  %6428 = vpow2.f32 %v3466_v29  ;;  %v3623_v62 = vmul.f32 %v7792_v30, %v3607_v47 }
 0x417   :  { %v7803_v32 = vpop.eup %6410  ;;  %v3622_v52 = vmul.f32 %v7801_v19, %v3606_v21 }
 0x418   :  { %v7813_v18 = vpop.eup %6412 }
 0x419   :  { %3739 = vperm.xlu1 %6364, %v6401_v27   ;;  %v6415_v35 = vpop.eup %6414 }
 0x41a   :  { %v6417_v54 = vpop.eup %6416  ;;  %v3619_v50 = vmul.f32 %v6415_v35, %v3603_v56 }
 0x41b   :  { %v7819_v0 = vpop.eup %6418  ;;  %v3618_v17 = vmul.f32 %v6417_v54, %v3602_v10 }
 0x41c   :  { %v6421_v8 = vpop.eup %6420  ;;  %v3621_v63 = vmul.f32 %v7819_v0, %v3605_v20 }
 0x41d   :  { %3744 = vperm.xlu1 %6364, %v7783_v41   ;;  %v7822_v55 = vpop.eup %6422  ;;  %v3604_v41 = vld [vmem:[#allocation4 + $0x30] sm:$0xff] }
 0x41e   :  { %v7825_v39 = vpop.eup %6424  ;;  %v3620_v60 = vmul.f32 %v6421_v8, %v3604_v41 }
 0x41f   :  { %v7827_v45 = vpop.eup %6426 }
 0x420   :  { %3734 = vperm.xlu0 %6365, %v6405_v11   ;;  %v7831_v48 = vpop.eup %6428 }
 0x421   :  { %3774 = vperm.xlu1 %6364, %v7792_v30  }
 0x424   :  { %3769 = vperm.xlu0 %6365, %v7801_v19  }
 0x425   :  { %3784 = vperm.xlu1 %6364, %v7803_v32  }
 0x428   :  { %3779 = vperm.xlu0 %6365, %v7813_v18  }
 0x429   :  { %3754 = vperm.xlu1 %6364, %v6415_v35   ;;  %v3608_v35 = vld [vmem:[#allocation4 + $0x50] sm:$0xff] }
 0x42a   :  { %v3624_v34 = vmul.f32 %v7813_v18, %v3608_v35 }
 0x42c   :  { %3749 = vperm.xlu0 %6365, %v6417_v54  }
 0x42d   :  { %3764 = vperm.xlu1 %6364, %v7819_v0   ;;  %v3610_v0 = vld [vmem:[#allocation4 + $0x60] sm:$0xff] }
 0x430   :  { %3759 = vperm.xlu0 %6365, %v6421_v8  }
 0x431   :  { %3794 = vperm.xlu1 %6364, %v7822_v55  }
 0x434   :  { %3789 = vperm.xlu0 %6365, %v7825_v39  }
 0x435   :  { %3804 = vperm.xlu1 %6364, %v7827_v45  }
 0x438   :  { %3799 = vperm.xlu0 %6365, %v7831_v48  }
 0x458   :  { %v3632_v57 = vpop.xlane.xlu0 %3631 }
 0x459   :  { %v3678_v31 = vadd.f32 %v3632_v57, %v3614_v14  ;;  %v3609_v57 = vld [vmem:[#allocation4 + $0x58] sm:$0xff] }
 0x45b   :  { %3695 = vst.msk [vmem:[#allocation4] sm:$0xff] %vm791_vm3, %v3678_v31  ;;  %v3626_v31 = vmul.f32 %v7825_v39, %v3610_v0 }
 0x45d   :  { %v3638_v38 = vpop.xlane.xlu0 %3637 }
 0x45e   :  { %v3635_v36 = vpop.xlane.xlu1 %3634  ;;  %v3680_v28 = vadd.f32 %v3638_v38, %v3616_v46  ;;  %v3612_v46 = vld [vmem:[#allocation4 + $0x70] sm:$0xff] }
 0x45f   :  { %v3679_v44 = vadd.f32 %v3635_v36, %v3615_v7  ;;  %v3625_v36 = vmul.f32 %v7803_v32, %v3609_v57 }
 0x460   :  { %3697 = vst.msk [vmem:[#allocation4 + $0x10] sm:$0xff] %vm791_vm3, %v3680_v28  ;;  %v3628_v28 = vmul.f32 %v7831_v48, %v3612_v46 }
 0x461   :  { %3696 = vst.msk [vmem:[#allocation4 + $0x8] sm:$0xff] %vm791_vm3, %v3679_v44  ;;  %v3611_v44 = vld [vmem:[#allocation4 + $0x68] sm:$0xff] }
 0x462   :  { %v5058_v22 = vld [vmem:[#allocation4] sm:$0xff] }
 0x463   :  { %6430 = vrcp.f32 %v5058_v22 }
 0x467   :  { %v5060_v61 = vld [vmem:[#allocation4 + $0x10] sm:$0xff] }
 0x468   :  { %v5059_v26 = vld [vmem:[#allocation4 + $0x8] sm:$0xff] }
 0x469   :  { %6432 = vrcp.f32 %v5059_v26  ;;  %v3627_v26 = vmul.f32 %v7822_v55, %v3611_v44 }
 0x46a   :  { %6434 = vrcp.f32 %v5060_v61  ;;  %v3644_v9 = vpop.xlane.xlu1 %3643 }
 0x46b   :  { %v3682_v12 = vadd.f32 %v3644_v9, %v3618_v17  ;;  %v3613_v9 = vld [vmem:[#allocation4 + $0x78] sm:$0xff] }
 0x46c   :  { %v3629_v48 = vmul.f32 %v7827_v45, %v3613_v9 }
 0x46d   :  { %v6431_v27 = vpop.eup %6430  ;;  %3699 = vst.msk [vmem:[#allocation4 + $0x20] sm:$0xff] %vm791_vm3, %v3682_v12 }
 0x46e   :  { %v3641_v3 = vpop.xlane.xlu0 %3640  ;;  %5092 = vperm.xlu0 %6365, %v6431_v27  }
 0x46f   :  { %v3681_v53 = vadd.f32 %v3641_v3, %v3617_v42 }
 0x471   :  { %3698 = vst.msk [vmem:[#allocation4 + $0x18] sm:$0xff] %vm791_vm3, %v3681_v53 }
 0x473   :  { %v3647_v4 = vpop.xlane.xlu0 %3646  ;;  %v6433_v23 = vpop.eup %6432 }
 0x474   :  { %v3683_v11 = vadd.f32 %v3647_v4, %v3619_v50  ;;  %v6435_v59 = vpop.eup %6434  ;;  %v5062_v51 = vld [vmem:[#allocation4 + $0x20] sm:$0xff]  ;;  %5097 = vperm.xlu1 %6364, %v6433_v23  }
 0x475   :  { %6436 = vrcp.f32 %v5062_v51  ;;  %5102 = vperm.xlu0 %6365, %v6435_v59   ;;  %v3711_v23 = vld [vmem:[#allocation5] sm:$0xff] }
 0x476   :  { %3700 = vst.msk [vmem:[#allocation4 + $0x28] sm:$0xff] %vm791_vm3, %v3683_v11 }
 0x478   :  { %v5061_v13 = vld [vmem:[#allocation4 + $0x18] sm:$0xff] }
 0x479   :  { %6438 = vrcp.f32 %v5061_v13  ;;  %v3713_v13 = vld [vmem:[#allocation5 + $0x10] sm:$0xff] }
 0x47d   :  { %v5063_v24 = vld [vmem:[#allocation4 + $0x28] sm:$0xff] }
 0x47e   :  { %6440 = vrcp.f32 %v5063_v24 }
 0x47f   :  { %v6437_v15 = vpop.eup %6436 }
 0x480   :  { %5112 = vperm.xlu0 %6365, %v6437_v15  }
 0x481   :  { %v3650_v43 = vpop.xlane.xlu1 %3649 }
 0x482   :  { %v3684_v58 = vadd.f32 %v3650_v43, %v3620_v60  ;;  %v3712_v60 = vld [vmem:[#allocation5 + $0x8] sm:$0xff] }
 0x483   :  { %v3653_v37 = vpop.xlane.xlu0 %3652  ;;  %v6439_v25 = vpop.eup %6438 }
 0x484   :  { %3701 = vst.msk [vmem:[#allocation4 + $0x30] sm:$0xff] %vm791_vm3, %v3684_v58  ;;  %v3685_v6 = vadd.f32 %v3653_v37, %v3621_v63  ;;  %5107 = vperm.xlu1 %6364, %v6439_v25  }
 0x485   :  { %v3656_v2 = vpop.xlane.xlu1 %3655 }
 0x486   :  { %v3686_v5 = vadd.f32 %v3656_v2, %v3622_v52  ;;  %3702 = vst.msk [vmem:[#allocation4 + $0x38] sm:$0xff] %vm791_vm3, %v3685_v6 }
 0x488   :  { %3703 = vst.msk [vmem:[#allocation4 + $0x40] sm:$0xff] %vm791_vm3, %v3686_v5  ;;  %v6441_v29 = vpop.eup %6440 }
 0x489   :  { %v3662_v54 = vpop.xlane.xlu1 %3661  ;;  %5117 = vperm.xlu1 %6364, %v6441_v29  }
 0x48a   :  { %v3688_v8 = vadd.f32 %v3662_v54, %v3624_v34 }
 0x48b   :  { %v5064_v19 = vld [vmem:[#allocation4 + $0x30] sm:$0xff]  ;;  %v3659_v14 = vpop.xlane.xlu0 %3658 }
 0x48c   :  { %6442 = vrcp.f32 %v5064_v19  ;;  %3705 = vst.msk [vmem:[#allocation4 + $0x50] sm:$0xff] %vm791_vm3, %v3688_v8  ;;  %v3687_v49 = vadd.f32 %v3659_v14, %v3623_v62  ;;  %v3715_v14 = vld [vmem:[#allocation5 + $0x20] sm:$0xff] }
 0x48d   :  { %v5065_v1 = vld [vmem:[#allocation4 + $0x38] sm:$0xff]  ;;  %v3668_v7 = vpop.xlane.xlu1 %3667 }
 0x48e   :  { %6444 = vrcp.f32 %v5065_v1  ;;  %v3690_v18 = vadd.f32 %v3668_v7, %v3626_v31  ;;  %3704 = vst.msk [vmem:[#allocation4 + $0x48] sm:$0xff] %vm791_vm3, %v3687_v49  ;;  %v3714_v1 = vld [vmem:[#allocation5 + $0x18] sm:$0xff] }
 0x48f   :  { %v5066_v30 = vld [vmem:[#allocation4 + $0x40] sm:$0xff]  ;;  %v3665_v38 = vpop.xlane.xlu0 %3664 }
 0x490   :  { %6446 = vrcp.f32 %v5066_v30  ;;  %3707 = vst.msk [vmem:[#allocation4 + $0x60] sm:$0xff] %vm791_vm3, %v3690_v18  ;;  %v3689_v22 = vadd.f32 %v3665_v38, %v3625_v36  ;;  %v3716_v30 = vld [vmem:[#allocation5 + $0x28] sm:$0xff] }
 0x491   :  { %v3674_v39 = vpop.xlane.xlu1 %3673 }
 0x492   :  { %v3692_v10 = vadd.f32 %v3674_v39, %v3628_v28  ;;  %3706 = vst.msk [vmem:[#allocation4 + $0x58] sm:$0xff] %vm791_vm3, %v3689_v22 }
 0x493   :  { %v5068_v61 = vld [vmem:[#allocation4 + $0x50] sm:$0xff]  ;;  %v3671_v17 = vpop.xlane.xlu0 %3670 }
 0x494   :  { %6448 = vrcp.f32 %v5068_v61  ;;  %3709 = vst.msk [vmem:[#allocation4 + $0x70] sm:$0xff] %vm791_vm3, %v3692_v10  ;;  %v3691_v32 = vadd.f32 %v3671_v17, %v3627_v26  ;;  %v3717_v17 = vld [vmem:[#allocation5 + $0x30] sm:$0xff] }
 0x495   :  { %v5067_v16 = vld [vmem:[#allocation4 + $0x48] sm:$0xff]  ;;  %v3730_v27 = vpop.permute.xlu1 %3729 }
 0x496   :  { %v6443_v12 = vpop.eup %6442  ;;  %6450 = vrcp.f32 %v5067_v16  ;;  %3708 = vst.msk [vmem:[#allocation4 + $0x68] sm:$0xff] %vm791_vm3, %v3691_v32  ;;  %v3807_v45 = vmul.f32 %v3730_v27, %v3711_v23  ;;  %v3718_v32 = vld [vmem:[#allocation5 + $0x38] sm:$0xff]  ;;  %v3719_v27 = vld [vmem:[#allocation5 + $0x40] sm:$0xff] }
 0x497   :  { %v5070_v42 = vld [vmem:[#allocation4 + $0x60] sm:$0xff]  ;;  %5122 = vperm.xlu0 %6365, %v6443_v12   ;;  %v3677_v3 = vpop.xlane.xlu0 %3676 }
 0x498   :  { %v6445_v56 = vpop.eup %6444  ;;  %6452 = vrcp.f32 %v5070_v42  ;;  %v3693_v55 = vadd.f32 %v3677_v3, %v3629_v48 }
 0x499   :  { %v5069_v53 = vld [vmem:[#allocation4 + $0x58] sm:$0xff]  ;;  %5127 = vperm.xlu1 %6364, %v6445_v56   ;;  %v3740_v11 = vpop.permute.xlu1 %3739 }
 0x49a   :  { %v6447_v50 = vpop.eup %6446  ;;  %6454 = vrcp.f32 %v5069_v53  ;;  %3710 = vst.msk [vmem:[#allocation4 + $0x78] sm:$0xff] %vm791_vm3, %v3693_v55  ;;  %v3809_v63 = vmul.f32 %v3740_v11, %v3713_v13 }
 0x49b   :  { %v5072_v4 = vld [vmem:[#allocation4 + $0x70] sm:$0xff]  ;;  %5132 = vperm.xlu0 %6365, %v6447_v50   ;;  %v3720_v50 = vld [vmem:[#allocation5 + $0x48] sm:$0xff] }
 0x49c   :  { %6456 = vrcp.f32 %v5072_v4  ;;  %v3721_v4 = vld [vmem:[#allocation5 + $0x50] sm:$0xff] }
 0x49d   :  { %v5071_v59 = vld [vmem:[#allocation4 + $0x68] sm:$0xff]  ;;  %v3892_v24 = vpop.f32.mrb[16].mxu0  ;;  %v3745_v37 = vpop.permute.xlu1 %3744 }
 0x49e   :  { %v6449_v51 = vpop.eup %6448  ;;  %6458 = vrcp.f32 %v5071_v59  ;;  %v4991_v15 = vadd.f32 %v3892_v24, %v3807_v45  ;;  %v6225_v43 = vpop.f32.mrb[17].mxu0  ;;  %v3810_v36 = vmul.f32 %v3745_v37, %v3714_v1  ;;  %v3722_v37 = vld [vmem:[#allocation5 + $0x58] sm:$0xff] }
 0x49f   :  { %5142 = vperm.xlu0 %6365, %v6449_v51   ;;  %v3735_v41 = vpop.permute.xlu0 %3734  ;;  %v3726_v1 = vld [vmem:[#allocation5 + $0x78] sm:$0xff] }
 0x4a0   :  { %v6451_v20 = vpop.eup %6450  ;;  %5007 = vst.msk [vmem:[#allocation5] sm:$0xff] %vm774_vm1, %v4991_v15  ;;  %v3808_v52 = vmul.f32 %v3735_v41, %v3712_v60 }
 0x4a1   :  { %v5073_v21 = vld [vmem:[#allocation4 + $0x78] sm:$0xff]  ;;  %5137 = vperm.xlu1 %6364, %v6451_v20   ;;  %v4038_v25 = vpop.f32.mrb[18].mxu0  ;;  %v3775_v62 = vpop.permute.xlu1 %3774  ;;  %v3723_v20 = vld [vmem:[#allocation5 + $0x60] sm:$0xff] }
 0x4a2   :  { %v6453_v58 = vpop.eup %6452  ;;  %6460 = vrcp.f32 %v5073_v21  ;;  %v3965_v35 = vpop.f32.mrb[20].mxu1  ;;  %v4993_v5 = vadd.f32 %v4038_v25, %v3809_v63  ;;  %v3816_v41 = vmul.f32 %v3775_v62, %v3720_v50 }
 0x4a3   :  { %5152 = vperm.xlu0 %6365, %v6453_v58   ;;  %v3770_v6 = vpop.permute.xlu0 %3769  ;;  %v6235_v47 = vpop.f32.mrb[19].mxu0  ;;  %v4992_v34 = vadd.f32 %v3965_v35, %v3808_v52 }
 0x4a4   :  { %v6455_v2 = vpop.eup %6454  ;;  %v6230_v29 = vpop.f32.mrb[21].mxu1  ;;  %5009 = vst.msk [vmem:[#allocation5 + $0x10] sm:$0xff] %vm774_vm1, %v4993_v5  ;;  %v3815_v55 = vmul.f32 %v3770_v6, %v3719_v27  ;;  %v3725_v6 = vld [vmem:[#allocation5 + $0x70] sm:$0xff] }
 0x4a5   :  { %5147 = vperm.xlu1 %6364, %v6455_v2   ;;  %5008 = vst.msk [vmem:[#allocation5 + $0x8] sm:$0xff] %vm774_vm1, %v4992_v34  ;;  %v3785_v31 = vpop.permute.xlu1 %3784  ;;  %v3724_v29 = vld [vmem:[#allocation5 + $0x68] sm:$0xff] }
 0x4a6   :  { %v6457_v54 = vpop.eup %6456  ;;  %v3818_v34 = vmul.f32 %v3785_v31, %v3722_v37 }
 0x4a7   :  { %5162 = vperm.xlu0 %6365, %v6457_v54   ;;  %v3780_v0 = vpop.permute.xlu0 %3779 }
 0x4a8   :  { %v6459_v8 = vpop.eup %6458  ;;  %v3817_v24 = vmul.f32 %v3780_v0, %v3721_v4 }
 0x4a9   :  { %5157 = vperm.xlu1 %6364, %v6459_v8   ;;  %v3755_v38 = vpop.permute.xlu1 %3754 }
 0x4aa   :  { %v3812_v39 = vmul.f32 %v3755_v38, %v3716_v30 }
 0x4ab   :  { %v3750_v57 = vpop.permute.xlu0 %3749 }
 0x4ac   :  { %v6461_v19 = vpop.eup %6460  ;;  %v3811_v49 = vmul.f32 %v3750_v57, %v3715_v14 }
 0x4ad   :  { %5167 = vperm.xlu1 %6364, %v6461_v19   ;;  %v3765_v16 = vpop.permute.xlu1 %3764 }
 0x4ae   :  { %v3814_v56 = vmul.f32 %v3765_v16, %v3718_v32 }
 0x4af   :  { %v4184_v7 = vpop.f32.mrb[20].mxu0  ;;  %v3760_v9 = vpop.permute.xlu0 %3759 }
 0x4b0   :  { %v4995_v46 = vadd.f32 %v4184_v7, %v3811_v49  ;;  %v6245_v18 = vpop.f32.mrb[21].mxu0  ;;  %v3813_v12 = vmul.f32 %v3760_v9, %v3717_v17  ;;  %v5043_v9 = vld [vmem:[#allocation5 + $0x8] sm:$0xff] }
 0x4b1   :  { %v3795_v35 = vpop.permute.xlu1 %3794 }
 0x4b2   :  { %5011 = vst.msk [vmem:[#allocation5 + $0x20] sm:$0xff] %vm774_vm1, %v4995_v46  ;;  %v3820_v49 = vmul.f32 %v3795_v35, %v3724_v29 }
 0x4b3   :  { %v4111_v44 = vpop.f32.mrb[22].mxu1  ;;  %v3790_v13 = vpop.permute.xlu0 %3789 }
 0x4b4   :  { %v4994_v28 = vadd.f32 %v4111_v44, %v3810_v36  ;;  %v6240_v22 = vpop.f32.mrb[23].mxu1  ;;  %v3819_v52 = vmul.f32 %v3790_v13, %v3723_v20 }
 0x4b5   :  { %v3805_v7 = vpop.permute.xlu1 %3804 }
 0x4b6   :  { %5010 = vst.msk [vmem:[#allocation5 + $0x18] sm:$0xff] %vm774_vm1, %v4994_v28  ;;  %v3822_v36 = vmul.f32 %v3805_v7, %v3726_v1 }
 0x4b7   :  { %v3800_v25 = vpop.permute.xlu0 %3799 }
 0x4b8   :  { %v4257_v10 = vpop.f32.mrb[24].mxu1  ;;  %v3821_v54 = vmul.f32 %v3800_v25, %v3725_v6 }
 0x4b9   :  { %v4996_v26 = vadd.f32 %v4257_v10, %v3812_v39  ;;  %v6250_v61 = vpop.f32.mrb[25].mxu1  ;;  %v5044_v10 = vld [vmem:[#allocation5 + $0x10] sm:$0xff] }
 0x4ba   :  { %v5042_v61 = vld [vmem:[#allocation5] sm:$0xff] }
 0x4bb   :  { %5012 = vst.msk [vmem:[#allocation5 + $0x28] sm:$0xff] %vm774_vm1, %v4996_v26 }
 0x4bd   :  { %v5045_v32 = vld [vmem:[#allocation5 + $0x18] sm:$0xff] }
 0x4c6   :  { %v4330_v48 = vpop.f32.mrb[22].mxu0 }
 0x4c7   :  { %v4997_v42 = vadd.f32 %v4330_v48, %v3813_v12  ;;  %v6255_v3 = vpop.f32.mrb[23].mxu0 }
 0x4c9   :  { %5013 = vst.msk [vmem:[#allocation5 + $0x30] sm:$0xff] %vm774_vm1, %v4997_v42  ;;  %v4403_v53 = vpop.f32.mrb[26].mxu1 }
 0x4ca   :  { %v4476_v23 = vpop.f32.mrb[24].mxu0  ;;  %v4998_v11 = vadd.f32 %v4403_v53, %v3814_v56  ;;  %v6260_v59 = vpop.f32.mrb[27].mxu1 }
 0x4cb   :  { %v4999_v51 = vadd.f32 %v4476_v23, %v3815_v55  ;;  %v6265_v45 = vpop.f32.mrb[25].mxu0 }
 0x4cc   :  { %5014 = vst.msk [vmem:[#allocation5 + $0x38] sm:$0xff] %vm774_vm1, %v4998_v11 }
 0x4cd   :  { %5015 = vst.msk [vmem:[#allocation5 + $0x40] sm:$0xff] %vm774_vm1, %v4999_v51 }
 0x4ce   :  { %v4622_v60 = vpop.f32.mrb[26].mxu0  ;;  %v4549_v15 = vpop.f32.mrb[28].mxu1 }
 0x4cf   :  { %v5001_v43 = vadd.f32 %v4622_v60, %v3817_v24  ;;  %v6275_v21 = vpop.f32.mrb[27].mxu0  ;;  %v5000_v58 = vadd.f32 %v4549_v15, %v3816_v41  ;;  %v6270_v63 = vpop.f32.mrb[29].mxu1 }
 0x4d1   :  { %5017 = vst.msk [vmem:[#allocation5 + $0x50] sm:$0xff] %vm774_vm1, %v5001_v43  ;;  %5016 = vst.msk [vmem:[#allocation5 + $0x48] sm:$0xff] %vm774_vm1, %v5000_v58 }
 0x4d2   :  { %v4768_v2 = vpop.f32.mrb[28].mxu0 }
 0x4d3   :  { %v5003_v5 = vadd.f32 %v4768_v2, %v3819_v52  ;;  %v6285_v47 = vpop.f32.mrb[29].mxu0 }
 0x4d4   :  { %v5046_v47 = vld [vmem:[#allocation5 + $0x20] sm:$0xff] }
 0x4d5   :  { %5019 = vst.msk [vmem:[#allocation5 + $0x60] sm:$0xff] %vm774_vm1, %v5003_v5  ;;  %v4695_v0 = vpop.f32.mrb[30].mxu1 }
 0x4d6   :  { %v5002_v8 = vadd.f32 %v4695_v0, %v3818_v34  ;;  %v4914_v62 = vpop.f32.mrb[30].mxu0  ;;  %v6280_v19 = vpop.f32.mrb[31].mxu1  ;;  %v5048_v34 = vld [vmem:[#allocation5 + $0x30] sm:$0xff] }
 0x4d7   :  { %v5005_v14 = vadd.f32 %v4914_v62, %v3821_v54  ;;  %v6295_v57 = vpop.f32.mrb[31].mxu0  ;;  %v5047_v19 = vld [vmem:[#allocation5 + $0x28] sm:$0xff] }
 0x4d8   :  { %5018 = vst.msk [vmem:[#allocation5 + $0x58] sm:$0xff] %vm774_vm1, %v5002_v8 }
 0x4d9   :  { %5021 = vst.msk [vmem:[#allocation5 + $0x70] sm:$0xff] %vm774_vm1, %v5005_v14  ;;  %v4841_v46 = vpop.f32.mrb[32].mxu1  ;;  %v5049_v14 = vld [vmem:[#allocation5 + $0x38] sm:$0xff] }
 0x4da   :  { %v5004_v18 = vadd.f32 %v4841_v46, %v3820_v49  ;;  %v6290_v31 = vpop.f32.mrb[33].mxu1 }
 0x4dc   :  { %5020 = vst.msk [vmem:[#allocation5 + $0x68] sm:$0xff] %vm774_vm1, %v5004_v18 }
 0x4dd   :  { %v4987_v30 = vpop.f32.mrb[34].mxu1 }
 0x4de   :  { %v5006_v38 = vadd.f32 %v4987_v30, %v3822_v36  ;;  %v6300_v44 = vpop.f32.mrb[35].mxu1 }
 0x4e0   :  { %5022 = vst.msk [vmem:[#allocation5 + $0x78] sm:$0xff] %vm774_vm1, %v5006_v38 }
 0x4ed   :  { %v5093_v28 = vpop.permute.xlu0 %5092 }
 0x4ee   :  { %v5170_v17 = vmul.f32 %v5093_v28, %v5042_v61 }
 0x4f3   :  { %v5098_v39 = vpop.permute.xlu1 %5097 }
 0x4f4   :  { %v5103_v22 = vpop.permute.xlu0 %5102  ;;  %v5171_v12 = vmul.f32 %v5098_v39, %v5043_v9 }
 0x4f5   :  { %v5172_v26 = vmul.f32 %v5103_v22, %v5044_v10 }
 0x4f7   :  { %v5186_v27 = vcombine.low %v5170_v17, %v5172_v26  ;;  %v5187_v48 = vcombine.high %v5170_v17, %v5172_v26 }
 0x4f9   :  { %v5194_v55 = vrot.slane %v5186_v27, %v6863_v33  ;;  %v5201_v53 = vrot.slane %v5187_v48, %v6863_v33 }
 0x4ff   :  { %v5113_v20 = vpop.permute.xlu0 %5112 }
 0x500   :  { %v5174_v8 = vmul.f32 %v5113_v20, %v5046_v47  ;;  %v5051_v20 = vld [vmem:[#allocation5 + $0x48] sm:$0xff] }
 0x503   :  { %v5108_v16 = vpop.permute.xlu1 %5107 }
 0x504   :  { %v5173_v42 = vmul.f32 %v5108_v16, %v5045_v32  ;;  %v5052_v16 = vld [vmem:[#allocation5 + $0x50] sm:$0xff] }
 0x506   :  { %v5202_v3 = vcombine.low %v5171_v12, %v5173_v42  ;;  %v5203_v56 = vcombine.high %v5171_v12, %v5173_v42 }
 0x508   :  { %v5210_v50 = vrot.slane %v5202_v3, %v6863_v33  ;;  %v5217_v4 = vrot.slane %v5203_v56, %v6863_v33  ;;  %v5118_v6 = vpop.permute.xlu1 %5117  ;;  %v5050_v56 = vld [vmem:[#allocation5 + $0x40] sm:$0xff] }
 0x509   :  { %v5175_v31 = vmul.f32 %v5118_v6, %v5047_v19 }
 0x50a   :  { %v5250_v23 = vcombine.low %v5194_v55, %v5210_v50  ;;  %v5251_v11 = vcombine.high %v5194_v55, %v5210_v50  ;;  %v5266_v59 = vcombine.low %v5201_v53, %v5217_v4  ;;  %v5267_v51 = vcombine.high %v5201_v53, %v5217_v4 }
 0x50c   :  { %v5258_v45 = vrot.slane %v5250_v23, %v6870_v40  ;;  %v5265_v13 = vrot.slane %v5251_v11, %v6870_v40  ;;  %v5274_v41 = vrot.slane %v5266_v59, %v6870_v40  ;;  %v5281_v24 = vrot.slane %v5267_v51, %v6870_v40 }
 0x50e   :  { %v6018_v60 = vcombine.low %v5258_v45, %v5265_v13  ;;  %v6020_v15 = vcombine.high %v5258_v45, %v5265_v13  ;;  %v6022_v43 = vcombine.low %v5274_v41, %v5281_v24  ;;  %v6024_v21 = vcombine.high %v5274_v41, %v5281_v24 }
 0x510   :  { %v5466_v58 = vrot.slane %v6018_v60, %v6863_v33  ;;  %v5482_v63 = vrot.slane %v6020_v15, %v6863_v33  ;;  %v5498_v37 = vrot.slane %v6022_v43, %v6863_v33  ;;  %v5514_v52 = vrot.slane %v6024_v21, %v6863_v33  ;;  %v5053_v60 = vld [vmem:[#allocation5 + $0x58] sm:$0xff] }
 0x512   :  { %v5522_v25 = vcombine.low %v5466_v58, %v5482_v63  ;;  %v5554_v2 = vcombine.low %v5498_v37, %v5514_v52  ;;  %v5523_v35 = vcombine.high %v5466_v58, %v5482_v63  ;;  %v5555_v5 = vcombine.high %v5498_v37, %v5514_v52 }
 0x514   :  { %v7889_v54 = vrot.slane %v5522_v25, %v6870_v40  ;;  %v7892_v0 = vrot.slane %v5554_v2, %v6870_v40  ;;  %v5537_v1 = vrot.slane %v5523_v35, %v6870_v40  ;;  %v5569_v7 = vrot.slane %v5555_v5, %v6870_v40  ;;  %v5056_v35 = vld [vmem:[#allocation5 + $0x70] sm:$0xff] }
 0x516   :  { %v5123_v29 = vpop.permute.xlu0 %5122  ;;  %v5587_v49 = vcombine.high %v7889_v54, %v7892_v0  ;;  %v5586_v46 = vcombine.low %v7889_v54, %v7892_v0  ;;  %v5588_v22 = vcombine.low %v5537_v1, %v5569_v7  ;;  %v5589_v3 = vcombine.high %v5537_v1, %v5569_v7 }
 0x517   :  { %v5176_v62 = vmul.f32 %v5123_v29, %v5048_v34  ;;  %v5054_v34 = vld [vmem:[#allocation5 + $0x60] sm:$0xff] }
 0x518   :  { %v5128_v57 = vpop.permute.xlu1 %5127  ;;  %5732 = vrot.lane.b32.xlu0 %v5587_v49, %s6623_s16 }
 0x519   :  { %v5218_v18 = vcombine.low %v5174_v8, %v5176_v62  ;;  %v5177_v36 = vmul.f32 %v5128_v57, %v5049_v14  ;;  %v5219_v30 = vcombine.high %v5174_v8, %v5176_v62 }
 0x51a   :  { %v5133_v38 = vpop.permute.xlu0 %5132 }
 0x51b   :  { %v5234_v44 = vcombine.low %v5175_v31, %v5177_v36  ;;  %v5235_v28 = vcombine.high %v5175_v31, %v5177_v36  ;;  %v5226_v39 = vrot.slane %v5218_v18, %v6863_v33  ;;  %v5233_v26 = vrot.slane %v5219_v30, %v6863_v33 }
 0x51c   :  { %5740 = vrot.lane.b32.xlu0 %v5588_v22, %s6605_s10  ;;  %v5178_v50 = vmul.f32 %v5133_v38, %v5050_v56 }
 0x51d   :  { %v5242_v10 = vrot.slane %v5234_v44, %v6863_v33  ;;  %v5249_v61 = vrot.slane %v5235_v28, %v6863_v33 }
 0x51e   :  { %v5143_v17 = vpop.permute.xlu0 %5142 }
 0x51f   :  { %v5282_v9 = vcombine.low %v5226_v39, %v5242_v10  ;;  %v5283_v32 = vcombine.high %v5226_v39, %v5242_v10  ;;  %v5298_v12 = vcombine.low %v5233_v26, %v5249_v61  ;;  %v5299_v27 = vcombine.high %v5233_v26, %v5249_v61 }
 0x520   :  { %v5180_v48 = vmul.f32 %v5143_v17, %v5052_v16  ;;  %v5138_v42 = vpop.permute.xlu1 %5137  ;;  %5748 = vrot.lane.b32.xlu0 %v5589_v3, %s6624_s17  ;;  %v5057_v16 = vld [vmem:[#allocation5 + $0x78] sm:$0xff] }
 0x521   :  { %v5290_v55 = vrot.slane %v5282_v9, %v6870_v40  ;;  %v5297_v53 = vrot.slane %v5283_v32, %v6870_v40  ;;  %v5306_v4 = vrot.slane %v5298_v12, %v6870_v40  ;;  %v5313_v23 = vrot.slane %v5299_v27, %v6870_v40  ;;  %v5055_v32 = vld [vmem:[#allocation5 + $0x68] sm:$0xff] }
 0x522   :  { %v5153_v11 = vpop.permute.xlu0 %5152  ;;  %v5322_v41 = vcombine.low %v5178_v50, %v5180_v48  ;;  %v5323_v24 = vcombine.high %v5178_v50, %v5180_v48  ;;  %v5179_v58 = vmul.f32 %v5138_v42, %v5051_v20 }
 0x523   :  { %v6019_v59 = vcombine.low %v5290_v55, %v5297_v53  ;;  %v6021_v51 = vcombine.high %v5290_v55, %v5297_v53  ;;  %v6023_v45 = vcombine.low %v5306_v4, %v5313_v23  ;;  %v6025_v13 = vcombine.high %v5306_v4, %v5313_v23 }
 0x524   :  { %v5148_v15 = vpop.permute.xlu1 %5147  ;;  %v5330_v47 = vrot.slane %v5322_v41, %v6863_v33  ;;  %v5337_v19 = vrot.slane %v5323_v24, %v6863_v33  ;;  %v5182_v14 = vmul.f32 %v5153_v11, %v5054_v34 }
 0x525   :  { %v5473_v43 = vrot.slane %v6019_v59, %v6863_v33  ;;  %v5489_v21 = vrot.slane %v6021_v51, %v6863_v33  ;;  %v5181_v63 = vmul.f32 %v5148_v15, %v5053_v60  ;;  %v5505_v37 = vrot.slane %v6023_v45, %v6863_v33 }
 0x526   :  { %v5521_v52 = vrot.slane %v6025_v13, %v6863_v33  ;;  %v5163_v6 = vpop.permute.xlu0 %5162 }
 0x527   :  { %v5338_v25 = vcombine.low %v5179_v58, %v5181_v63  ;;  %v5339_v2 = vcombine.high %v5179_v58, %v5181_v63  ;;  %v5538_v5 = vcombine.low %v5473_v43, %v5489_v21  ;;  %v5184_v29 = vmul.f32 %v5163_v6, %v5056_v35 }
 0x528   :  { %v5158_v8 = vpop.permute.xlu1 %5157  ;;  %v5570_v62 = vcombine.low %v5505_v37, %v5521_v52  ;;  %v5539_v18 = vcombine.high %v5473_v43, %v5489_v21  ;;  %v5571_v31 = vcombine.high %v5505_v37, %v5521_v52 }
 0x529   :  { %v5346_v57 = vrot.slane %v5338_v25, %v6863_v33  ;;  %v5353_v49 = vrot.slane %v5339_v2, %v6863_v33  ;;  %v5546_v1 = vrot.slane %v5538_v5, %v6870_v40  ;;  %v5354_v28 = vcombine.low %v5182_v14, %v5184_v29 }
 0x52a   :  { %v5578_v7 = vrot.slane %v5570_v62, %v6870_v40  ;;  %v5355_v22 = vcombine.high %v5182_v14, %v5184_v29  ;;  %v5183_v12 = vmul.f32 %v5158_v8, %v5055_v32  ;;  %v5553_v48 = vrot.slane %v5539_v18, %v6870_v40 }
 0x52b   :  { %v5386_v36 = vcombine.low %v5330_v47, %v5346_v57  ;;  %v5387_v30 = vcombine.high %v5330_v47, %v5346_v57  ;;  %v5402_v38 = vcombine.low %v5337_v19, %v5353_v49  ;;  %v5403_v44 = vcombine.high %v5337_v19, %v5353_v49 }
 0x52c   :  { %v5168_v39 = vpop.permute.xlu1 %5167  ;;  %v5590_v10 = vcombine.low %v5546_v1, %v5578_v7  ;;  %v5585_v42 = vrot.slane %v5571_v31, %v6870_v40  ;;  %v5362_v50 = vrot.slane %v5354_v28, %v6863_v33  ;;  %v5591_v11 = vcombine.high %v5546_v1, %v5578_v7 }
 0x52d   :  { %v5394_v26 = vrot.slane %v5386_v36, %v6870_v40  ;;  %v5401_v61 = vrot.slane %v5387_v30, %v6870_v40  ;;  %v5410_v17 = vrot.slane %v5402_v38, %v6870_v40  ;;  %v5417_v9 = vrot.slane %v5403_v44, %v6870_v40 }
 0x52e   :  { %v5185_v27 = vmul.f32 %v5168_v39, %v5057_v16  ;;  %5756 = vrot.lane.b32.xlu0 %v5590_v10, %s6625_s18  ;;  %v5369_v41 = vrot.slane %v5355_v22, %v6863_v33  ;;  %v5592_v60 = vcombine.low %v5553_v48, %v5585_v42  ;;  %v5593_v35 = vcombine.high %v5553_v48, %v5585_v42  ;;  %v5805_v22 = vld [vmem:[#allocation14] sm:$0xff]  ;;  %v5806_v39 = vld [vmem:[#allocation14 + $0x8] sm:$0xff] }
 0x52f   :  { %v6026_v3 = vcombine.low %v5394_v26, %v5401_v61  ;;  %v6028_v56 = vcombine.high %v5394_v26, %v5401_v61  ;;  %v6030_v55 = vcombine.low %v5410_v17, %v5417_v9  ;;  %v6032_v53 = vcombine.high %v5410_v17, %v5417_v9  ;;  %v5807_v9 = vld [vmem:[#allocation14 + $0x10] sm:$0xff] }
 0x530   :  { %v5370_v4 = vcombine.low %v5183_v12, %v5185_v27  ;;  %v5371_v23 = vcombine.high %v5183_v12, %v5185_v27  ;;  %v6328_v10 = vpack.c.bf16 %v5806_v39, %v5805_v22 }
 0x531   :  { %v5602_v59 = vrot.slane %v6026_v3, %v6863_v33  ;;  %v5618_v51 = vrot.slane %v6028_v56, %v6863_v33  ;;  %v5634_v45 = vrot.slane %v6030_v55, %v6863_v33  ;;  %v5650_v13 = vrot.slane %v6032_v53, %v6863_v33 }
 0x532   :  { %v5378_v24 = vrot.slane %v5370_v4, %v6863_v33  ;;  %v5385_v20 = vrot.slane %v5371_v23, %v6863_v33  ;;  %5764 = vrot.lane.b32.xlu0 %v5591_v11, %s6626_s19  ;;  %6329 = vmatprep.subr.bf16.mxu0 %v6328_v10 }
 0x533   :  { %v5658_v15 = vcombine.low %v5602_v59, %v5618_v51  ;;  %v5690_v43 = vcombine.low %v5634_v45, %v5650_v13  ;;  %v5659_v21 = vcombine.high %v5602_v59, %v5618_v51  ;;  %v5691_v58 = vcombine.high %v5634_v45, %v5650_v13  ;;  %6331 = vmatpush3.bf16.msra.mxu0 %v6328_v10 }
 0x534   :  { %v5418_v63 = vcombine.low %v5362_v50, %v5378_v24  ;;  %v5419_v37 = vcombine.high %v5362_v50, %v5378_v24  ;;  %v5434_v52 = vcombine.low %v5369_v41, %v5385_v20  ;;  %v5435_v6 = vcombine.high %v5369_v41, %v5385_v20 }
 0x535   :  { %v7938_v25 = vrot.slane %v5658_v15, %v6870_v40  ;;  %v7941_v2 = vrot.slane %v5690_v43, %v6870_v40  ;;  %v5673_v62 = vrot.slane %v5659_v21, %v6870_v40  ;;  %v5705_v19 = vrot.slane %v5691_v58, %v6870_v40 }
 0x536   :  { %v5426_v5 = vrot.slane %v5418_v63, %v6870_v40  ;;  %v5433_v47 = vrot.slane %v5419_v37, %v6870_v40  ;;  %v5442_v34 = vrot.slane %v5434_v52, %v6870_v40  ;;  %v5449_v29 = vrot.slane %v5435_v6, %v6870_v40  ;;  %5772 = vrot.lane.b32.xlu0 %v5592_v60, %s6627_s20 }
 0x537   :  { %v5723_v8 = vcombine.high %v7938_v25, %v7941_v2  ;;  %v5722_v14 = vcombine.low %v7938_v25, %v7941_v2  ;;  %v5724_v38 = vcombine.low %v5673_v62, %v5705_v19  ;;  %v5725_v26 = vcombine.high %v5673_v62, %v5705_v19  ;;  %v6034_v25 = vld [vmem:[%s8017_s5] ss:$0 sm:$0xff] }
 0x538   :  { %v6027_v57 = vcombine.low %v5426_v5, %v5433_v47  ;;  %v6029_v49 = vcombine.high %v5426_v5, %v5433_v47  ;;  %v6031_v1 = vcombine.low %v5442_v34, %v5449_v29  ;;  %v6033_v7 = vcombine.high %v5442_v34, %v5449_v29 }
 0x539   :  { %5734 = vrot.lane.b32.xlu1 %v5723_v8, %s6623_s16 }
 0x53a   :  { %v5609_v18 = vrot.slane %v6027_v57, %v6863_v33  ;;  %v5625_v31 = vrot.slane %v6029_v49, %v6863_v33  ;;  %v5641_v36 = vrot.slane %v6031_v1, %v6863_v33  ;;  %v5657_v30 = vrot.slane %v6033_v7, %v6863_v33  ;;  %5780 = vrot.lane.b32.xlu0 %v5593_v35, %s6628_s0  ;;  %v5808_v33 = vld [vmem:[#allocation14 + $0x18] sm:$0xff] }
 0x53b   :  { %v6332_v32 = vpack.c.bf16 %v5808_v33, %v5807_v9 }
 0x53c   :  { %v5674_v44 = vcombine.low %v5609_v18, %v5625_v31  ;;  %v5706_v28 = vcombine.low %v5641_v36, %v5657_v30  ;;  %v5675_v12 = vcombine.high %v5609_v18, %v5625_v31  ;;  %v5707_v27 = vcombine.high %v5641_v36, %v5657_v30 }
 0x53d   :  { %5742 = vrot.lane.b32.xlu1 %v5724_v38, %s6605_s10  ;;  %6333 = vmatprep.subr.bf16.mxu0 %v6332_v32 }
 0x53e   :  { %v5682_v61 = vrot.slane %v5674_v44, %v6870_v40  ;;  %v5714_v17 = vrot.slane %v5706_v28, %v6870_v40  ;;  %6335 = vmatpush3.bf16.msra.mxu0 %v6332_v32  ;;  %v5689_v42 = vrot.slane %v5675_v12, %v6870_v40  ;;  %v5721_v3 = vrot.slane %v5707_v27, %v6870_v40 }
 0x540   :  { %v5726_v16 = vcombine.low %v5682_v61, %v5714_v17  ;;  %v5727_v48 = vcombine.high %v5682_v61, %v5714_v17  ;;  %v5728_v56 = vcombine.low %v5689_v42, %v5721_v3  ;;  %v5729_v55 = vcombine.high %v5689_v42, %v5721_v3 }
 0x541   :  { %5750 = vrot.lane.b32.xlu1 %v5725_v26, %s6624_s17 }
 0x545   :  { %5758 = vrot.lane.b32.xlu1 %v5726_v16, %s6625_s18 }
 0x549   :  { %5766 = vrot.lane.b32.xlu1 %v5727_v48, %s6626_s19 }
 0x54d   :  { %5774 = vrot.lane.b32.xlu1 %v5728_v56, %s6627_s20 }
 0x551   :  { %5782 = vrot.lane.b32.xlu1 %v5729_v55, %s6628_s0 }
 0x58a   :  { %v5733_v53 = vpop.permute.xlu0 %5732 }
 0x58b   :  { %v5786_v59 = vsel %vm774_vm1, %v5586_v46, %v5733_v53 }
 0x58e   :  { %v5741_v50 = vpop.permute.xlu0 %5740 }
 0x58f   :  { %v5788_v40 = vsel %vm3357_vm4, %v5786_v59, %v5741_v50 }
 0x592   :  { %v5749_v4 = vpop.permute.xlu0 %5748 }
 0x593   :  { %v5791_v45 = vsel %vm5790_vm5, %v5788_v40, %v5749_v4 }
 0x5a0   :  { %v5757_v23 = vpop.permute.xlu0 %5756 }
 0x5a1   :  { %v5794_v13 = vsel %vm5793_vm6, %v5791_v45, %v5757_v23 }
 0x5a4   :  { %v5765_v11 = vpop.permute.xlu0 %5764 }
 0x5a5   :  { %v5797_v24 = vsel %vm5796_vm7, %v5794_v13, %v5765_v11 }
 0x5a8   :  { %v5773_v51 = vpop.permute.xlu0 %5772 }
 0x5a9   :  { %v5800_v20 = vsel %vm5799_vm8, %v5797_v24, %v5773_v51 }
 0x5ab   :  { %v5735_v41 = vpop.permute.xlu1 %5734 }
 0x5ac   :  { %v5781_v60 = vpop.permute.xlu0 %5780  ;;  %v5787_v21 = vsel %vm774_vm1, %v5722_v14, %v5735_v41 }
 0x5ad   :  { %v5803_v54 = vsel %vm5802_vm9, %v5800_v20, %v5781_v60 }
 0x5ae   :  { %6309 = vmatprep.mubr.msk.f32.mxu0 %vm102_vm0, %v5803_v54 }
 0x5af   :  { %v5743_v0 = vpop.permute.xlu1 %5742 }
 0x5b0   :  { %v5789_v58 = vsel %vm3357_vm4, %v5787_v21, %v5743_v0 }
 0x5b3   :  { %v5751_v46 = vpop.permute.xlu1 %5750 }
 0x5b4   :  { %v5792_v37 = vsel %vm5790_vm5, %v5789_v58, %v5751_v46 }
 0x5b7   :  { %v5759_v15 = vpop.permute.xlu1 %5758 }
 0x5b8   :  { %v5795_v52 = vsel %vm5793_vm6, %v5792_v37, %v5759_v15 }
 0x5bb   :  { %v5767_v43 = vpop.permute.xlu1 %5766 }
 0x5bc   :  { %v5798_v6 = vsel %vm5796_vm7, %v5795_v52, %v5767_v43 }
 0x5bf   :  { %v5775_v63 = vpop.permute.xlu1 %5774 }
 0x5c0   :  { %v5801_v35 = vsel %vm5799_vm8, %v5798_v6, %v5775_v63 }
 0x5c3   :  { %v5783_v5 = vpop.permute.xlu1 %5782 }
 0x5c4   :  { %v5804_v47 = vsel %vm5802_vm9, %v5801_v35, %v5783_v5 }
 0x5c5   :  { %6310 = vmatmul.mubr.msk.f32.vlgmr.msra.gmra.mrb[32].mxu0 %vm102_vm0, %v5804_v47 }
 0x698   :  { %v6311_v2 = vpop.f32.mrb[32].mxu0 }
 0x699   :  { %v5894_v34 = vadd.f32 %v6311_v2, %v6034_v25  ;;  %v5888_v29 = vpop.f32.mrb[33].mxu0 }
 0x69a   :  { %v5889_v8 = vadd.f32 %v6034_v25, %v5888_v29 }
 0x69b   :  { %5898 = vst.msk [vmem:[#allocation15 + $0x8] sm:$0xff] %vm102_vm0, %v5894_v34 }
 0x69c   :  { %5897 = vst.msk [vmem:[#allocation15] sm:$0xff] %vm102_vm0, %v5889_v8 }
 0x69d   :  { %6583 = shalt.err (!%p6580_p2)
}
 0x69e   :  { %s6584_s28 = scalar_lea.hbm %s8018_s6, 256 }
 0x69f   :  { %p6585_p3 = scmp.ne.s32.totalorder %s8018_s6, %s6584_s28  ;;  %p6588_p4 = scmp.lt.u32.totalorder %s6584_s28, %s8018_s6 }
 0x6a1   :  { %p6590_p5 = pnand %p6588_p4, %p6585_p3 }
 0x6a3   :  { %6593 = shalt.err (!%p6590_p5)
}
 0x6a4   :  { %5910 = dma.vmem_to_hbm [thread:$0]  %s5905_s23, 256, %s8018_s6, [#allocation8], %s6604_s9, %s6604_s9, %s6605_s10  }
 0x6a5   :  { %6600 = dma.done.wait [#allocation8], 256  }
 0x6a6   :  { %6601 = vsyncadd [#allocation8], 4294967040 }
 0x6a7   :  { %5914 = vsyncpa [#allocation7], 1 }
 0x6a8   :  { %5915 = vsyncpa [#allocation10], 1 }
 0x6a9   :  { %5916 = vsyncpa [#allocation13], 1 }
 0x6aa   :  { %5917 = vsyncpa [#allocation8], 1 }

// kernel: tpu_custom_call.1
= control target key start
LH: loop header
LB: loop body
LE: loop exit
PB: predicated region body
PF: predicated region fallthrough
CT: control target
= control target key end

     0   :  { %11 = vsyncpa [#allocation7], 0  ;;  %s8012_s0 = inlined_call_operand.hbm [shape: f32[2,8,32], index: 0, kind: input, shape index: {}]   ;;  %s8013_s1 = inlined_call_operand.hbm [shape: f32[2,8,32], index: 1, kind: input, shape index: {}]   ;;  %s8014_s2 = inlined_call_operand.hbm [shape: f32[32,32], index: 2, kind: input, shape index: {}]   ;;  %s8015_s3 = inlined_call_operand.hbm [shape: f32[32,64], index: 3, kind: input, shape index: {}]   ;;  %s8016_s4 = inlined_call_operand.hbm [shape: f32[32,32], index: 4, kind: input, shape index: {}]   ;;  %s8017_s5 = inlined_call_operand.vmem [shape: f32[1,32], index: 5, kind: input, shape index: {}]   ;;  %s8018_s6 = inlined_call_operand.hbm [shape: f32[2,8,32], index: 6, kind: output, shape index: {}]  }
   0x1   :  { %12 = vsyncpa [#allocation10], 0 }
   0x2   :  { %13 = vsyncpa [#allocation13], 0 }
   0x3   :  { %14 = vsyncpa [#allocation8], 0  ;;  %s6602_s21 = smov [#allocation9]   ;;  %s6603_s23 = smov [#allocation12]  }
   0x4   :  { %s32_s22 = sshll.u32 %s6602_s21, 4  ;;  %s56_s24 = sshll.u32 %s6603_s23, 4  ;;  %s33_s22 = int_to_ptr.vmem [resolvable:$true] %s32_s22  ;;  %s6665_s24 = int_to_ptr.vmem [resolvable:$true] %s56_s24 }
   0x5   :  { %s6462_s27 = scalar_lea.hbm %s8013_s1, 256 }
   0x6   :  { %p6463_p0 = scmp.ne.s32.totalorder %s8013_s1, %s6462_s27  ;;  %p6466_p1 = scmp.lt.u32.totalorder %s6462_s27, %s8013_s1 }
   0x8   :  { %p6468_p2 = pnand %p6466_p1, %p6463_p0 }
   0xa   :  { %6471 = shalt.err (!%p6468_p2)
}
   0xb   :  { %s6472_s8 = scalar_lea.vmem %s33_s22, 256  ;;  %p6477_p4 = scmp.lt.s32.totalorder %s33_s22, %s33_s22 }
   0xc   :  { %p6473_p3 = scmp.ne.s32.totalorder %s33_s22, %s6472_s8  ;;  %p6478_p5 = scmp.lt.s32.totalorder %s6472_s8, %s6472_s8 }
   0xe   :  { %p6479_p6 = por %p6478_p5, %p6477_p4 }
  0x10   :  { %p6480_p7 = pnand %p6479_p6, %p6473_p3 }
  0x12   :  { %6483 = shalt.err (!%p6480_p7)
}
  0x13   :  { %s6604_s9 = smov 128   ;;  %s6605_s10 = smov 8  }
  0x14   :  { %38 = dma.hbm_to_vmem [thread:$0]  %s8013_s1, 256, %s33_s22, [#allocation10], %s6604_s9, %s6604_s9, %s6605_s10  }
  0x15   :  { %s6484_s15 = scalar_lea.hbm %s8015_s3, 512 }
  0x16   :  { %p6485_p8 = scmp.ne.s32.totalorder %s8015_s3, %s6484_s15  ;;  %p6488_p9 = scmp.lt.u32.totalorder %s6484_s15, %s8015_s3 }
  0x18   :  { %p6490_p10 = pnand %p6488_p9, %p6485_p8 }
  0x1a   :  { %6493 = shalt.err (!%p6490_p10)
}
  0x1b   :  { %s6494_s20 = scalar_lea.vmem %s6665_s24, 512  ;;  %p6499_p12 = scmp.lt.s32.totalorder %s6665_s24, %s6665_s24 }
  0x1c   :  { %p6495_p11 = scmp.ne.s32.totalorder %s6665_s24, %s6494_s20  ;;  %p6500_p13 = scmp.lt.s32.totalorder %s6494_s20, %s6494_s20 }
  0x1e   :  { %p6501_p0 = por %p6500_p13, %p6499_p12 }
  0x20   :  { %p6502_p1 = pnand %p6501_p0, %p6495_p11 }
  0x22   :  { %6505 = shalt.err (!%p6502_p1)
}
  0x23   :  { %62 = dma.hbm_to_vmem [thread:$0]  %s8015_s3, 512, %s6665_s24, [#allocation13], %s6604_s9, %s6604_s9, %s6605_s10  }
  0x24   :  { %s6606_s22 = smov [#allocation6]   ;;  %s6607_s25 = smov [#allocation11]  }
  0x25   :  { %s20_s23 = sshll.u32 %s6606_s22, 4  ;;  %s44_s26 = sshll.u32 %s6607_s25, 4  ;;  %s21_s23 = int_to_ptr.vmem [resolvable:$true] %s20_s23  ;;  %s6702_s26 = int_to_ptr.vmem [resolvable:$true] %s44_s26 }
  0x26   :  { %s6506_s29 = scalar_lea.hbm %s8012_s0, 256 }
  0x27   :  { %p6507_p2 = scmp.ne.s32.totalorder %s8012_s0, %s6506_s29  ;;  %p6510_p3 = scmp.lt.u32.totalorder %s6506_s29, %s8012_s0 }
  0x29   :  { %p6512_p4 = pnand %p6510_p3, %p6507_p2 }
  0x2b   :  { %6515 = shalt.err (!%p6512_p4)
}
  0x2c   :  { %s6516_s3 = scalar_lea.vmem %s21_s23, 256  ;;  %p6521_p6 = scmp.lt.s32.totalorder %s21_s23, %s21_s23 }
  0x2d   :  { %p6517_p5 = scmp.ne.s32.totalorder %s21_s23, %s6516_s3  ;;  %p6522_p7 = scmp.lt.s32.totalorder %s6516_s3, %s6516_s3 }
  0x2f   :  { %p6523_p8 = por %p6522_p7, %p6521_p6 }
  0x31   :  { %p6524_p9 = pnand %p6523_p8, %p6517_p5 }
  0x33   :  { %6527 = shalt.err (!%p6524_p9)
}
  0x34   :  { %26 = dma.hbm_to_vmem [thread:$0]  %s8012_s0, 256, %s21_s23, [#allocation7], %s6604_s9, %s6604_s9, %s6605_s10  }
  0x35   :  { %s6528_s15 = scalar_lea.hbm %s8014_s2, 512 }
  0x36   :  { %p6529_p10 = scmp.ne.s32.totalorder %s8014_s2, %s6528_s15  ;;  %p6532_p11 = scmp.lt.u32.totalorder %s6528_s15, %s8014_s2 }
  0x38   :  { %p6534_p12 = pnand %p6532_p11, %p6529_p10 }
  0x3a   :  { %6537 = shalt.err (!%p6534_p12)
}
  0x3b   :  { %s6538_s20 = scalar_lea.vmem %s6702_s26, 512  ;;  %p6543_p0 = scmp.lt.s32.totalorder %s6702_s26, %s6702_s26 }
  0x3c   :  { %p6539_p13 = scmp.ne.s32.totalorder %s6702_s26, %s6538_s20  ;;  %p6544_p1 = scmp.lt.s32.totalorder %s6538_s20, %s6538_s20 }
  0x3e   :  { %p6545_p2 = por %p6544_p1, %p6543_p0 }
  0x40   :  { %p6546_p3 = pnand %p6545_p2, %p6539_p13 }
  0x42   :  { %6549 = shalt.err (!%p6546_p3)
}
  0x43   :  { %50 = dma.hbm_to_vmem [thread:$0]  %s8014_s2, 512, %s6702_s26, [#allocation10], %s6604_s9, %s6604_s9, %s6605_s10  }
  0x44   :  { %s6608_s21 = smov [#allocation14]   ;;  %s6550_s27 = scalar_lea.hbm %s8016_s4, 512 }
  0x45   :  { %s68_s22 = sshll.u32 %s6608_s21, 4  ;;  %p6551_p4 = scmp.ne.s32.totalorder %s8016_s4, %s6550_s27  ;;  %s69_s22 = int_to_ptr.vmem [resolvable:$true] %s68_s22 }
  0x46   :  { %p6554_p5 = scmp.lt.u32.totalorder %s6550_s27, %s8016_s4 }
  0x48   :  { %p6556_p6 = pnand %p6554_p5, %p6551_p4 }
  0x4a   :  { %6559 = shalt.err (!%p6556_p6)
}
  0x4b   :  { %s6560_s8 = scalar_lea.vmem %s69_s22, 512  ;;  %p6565_p8 = scmp.lt.s32.totalorder %s69_s22, %s69_s22 }
  0x4c   :  { %p6561_p7 = scmp.ne.s32.totalorder %s69_s22, %s6560_s8  ;;  %p6566_p9 = scmp.lt.s32.totalorder %s6560_s8, %s6560_s8 }
  0x4e   :  { %p6567_p10 = por %p6566_p9, %p6565_p8 }
  0x50   :  { %p6568_p11 = pnand %p6567_p10, %p6561_p7 }
  0x52   :  { %6571 = shalt.err (!%p6568_p11)
}
  0x53   :  { %74 = dma.hbm_to_vmem [thread:$0]  %s8016_s4, 512, %s69_s22, [#allocation13], %s6604_s9, %s6604_s9, %s6605_s10  }
  0x54   :  { %6594 = dma.done.wait [#allocation7], 256  }
  0x55   :  { %6595 = vsyncadd [#allocation7], 4294967040 }
  0x56   :  { %6596 = dma.done.wait [#allocation10], 768  }
  0x57   :  { %6597 = vsyncadd [#allocation10], 4294966528 }
  0x58   :  { %6598 = dma.done.wait [#allocation13], 1024  }
  0x59   :  { %6599 = vsyncadd [#allocation13], 4294966272  ;;  %vm102_vm0 = vcmask 261120   ;;  %v842_v0 = vld [vmem:[#allocation12] sm:$0xff]  ;;  %v843_v1 = vld [vmem:[#allocation12 + $0x8] sm:$0xff]  ;;  %s6609_s4 = smov 120   ;;  %v235_v25 = vlaneseq }
  0x5a   :  { %v844_v2 = vld [vmem:[#allocation12 + $0x10] sm:$0xff]  ;;  %v6320_v3 = vpack.c.bf16 %v843_v1, %v842_v0  ;;  %v845_v4 = vld [vmem:[#allocation12 + $0x18] sm:$0xff]  ;;  %v98_v7 = vld [vmem:[#allocation11] sm:$0xff]  ;;  %s6610_s11 = smov 124   ;;  %s6611_s3 = smov 112   ;;  %vm774_vm1 = vcmask 31744  }
  0x5b   :  { %v840_v5 = vld [vmem:[#allocation9] sm:$0xff]  ;;  %v6324_v6 = vpack.c.bf16 %v845_v4, %v844_v2  ;;  %v99_v8 = vld [vmem:[#allocation11 + $0x8] sm:$0xff]  ;;  %v101_v11 = vld [vmem:[#allocation11 + $0x18] sm:$0xff]  ;;  %s6612_s24 = smov 116   ;;  %s6613_s12 = smov 104   ;;  %v8019_v21 = vmov 0.0  }
  0x5c   :  { %6138 = vmatprep.mubr.msk.f32.mxu1 %vm102_vm0, %v840_v5  ;;  %v100_v9 = vld [vmem:[#allocation11 + $0x10] sm:$0xff]  ;;  %6321 = vmatprep.subr.bf16.mxu1 %v6320_v3  ;;  %v6312_v10 = vpack.c.bf16 %v99_v8, %v98_v7  ;;  %v96_v12 = vld [vmem:[#allocation6] sm:$0xff]  ;;  %v841_v14 = vld [vmem:[#allocation9 + $0x8] sm:$0xff]  ;;  %s6614_s13 = smov 108   ;;  %s6615_s14 = smov 100   ;;  %824 = vst.msk [vmem:[#allocation5] sm:$0xff] %vm774_vm1, %v8019_v21 }
  0x5d   :  { %6323 = vmatpush3.bf16.msra.mxu1 %v6320_v3  ;;  %v6316_v13 = vpack.c.bf16 %v101_v11, %v100_v9  ;;  %6127 = vmatprep.mubr.msk.f32.mxu0 %vm102_vm0, %v96_v12  ;;  %v97_v15 = vld [vmem:[#allocation6 + $0x8] sm:$0xff]  ;;  %825 = vst.msk [vmem:[#allocation5 + $0x8] sm:$0xff] %vm774_vm1, %v8019_v21  ;;  %826 = vst.msk [vmem:[#allocation5 + $0x10] sm:$0xff] %vm774_vm1, %v8019_v21  ;;  %vm6617_vm2 = vmmov 0   ;;  %s6618_s15 = smov 96   ;;  %v236_v29 = vshrl.u32 %v235_v25, 7 }
  0x5e   :  { %6325 = vmatprep.subr.bf16.mxu1 %v6324_v6  ;;  %6313 = vmatprep.subr.bf16.mxu0 %v6312_v10  ;;  %827 = vst.msk [vmem:[#allocation5 + $0x18] sm:$0xff] %vm774_vm1, %v8019_v21  ;;  %828 = vst.msk [vmem:[#allocation5 + $0x20] sm:$0xff] %vm774_vm1, %v8019_v21  ;;  %v6619_v23 = vmov 1983009808   ;;  %v6620_v26 = vmov 1934713408  }
  0x5f   :  { %6315 = vmatpush3.bf16.msra.mxu0 %v6312_v10  ;;  %829 = vst.msk [vmem:[#allocation5 + $0x28] sm:$0xff] %vm774_vm1, %v8019_v21  ;;  %830 = vst.msk [vmem:[#allocation5 + $0x30] sm:$0xff] %vm774_vm1, %v8019_v21  ;;  %v233_v24 = vunpack.c.l.s4 %v6619_v23  ;;  %v297_v27 = vunpack.c.l.s4 %v6620_v26  ;;  %vm791_vm3 = vcmask 7168   ;;  %vm3357_vm4 = vcmask 64512   ;;  %s6623_s16 = smov 4   ;;  %s6624_s17 = smov 12  }
  0x60   :  { %6317 = vmatprep.subr.bf16.mxu0 %v6316_v13  ;;  %831 = vst.msk [vmem:[#allocation5 + $0x38] sm:$0xff] %vm774_vm1, %v8019_v21  ;;  %832 = vst.msk [vmem:[#allocation5 + $0x40] sm:$0xff] %vm774_vm1, %v8019_v21  ;;  %s6625_s18 = smov 16   ;;  %s6626_s19 = smov 20   ;;  %vm5790_vm5 = vcmask 97280   ;;  %vm5793_vm6 = vcmask 130048  }
  0x61   :  { %6327 = vmatpush3.bf16.msra.mxu1 %v6324_v6  ;;  %833 = vst.msk [vmem:[#allocation5 + $0x48] sm:$0xff] %vm774_vm1, %v8019_v21  ;;  %834 = vst.msk [vmem:[#allocation5 + $0x50] sm:$0xff] %vm774_vm1, %v8019_v21  ;;  %v234_v28 = vunpack.c.0.s8 %v233_v24  ;;  %v298_v32 = vunpack.c.0.s8 %v297_v27  ;;  %s6627_s20 = smov 24   ;;  %s6628_s0 = smov 28   ;;  %vm5796_vm7 = vcmask 162816   ;;  %vm5799_vm8 = vcmask 195584  }
  0x62   :  { %6141 = vmatprep.subr.mxu1 %v8019_v21  ;;  %835 = vst.msk [vmem:[#allocation5 + $0x58] sm:$0xff] %vm774_vm1, %v8019_v21  ;;  %836 = vst.msk [vmem:[#allocation5 + $0x60] sm:$0xff] %vm774_vm1, %v8019_v21  ;;  %vm5802_vm9 = vcmask 228352   ;;  %s6629_s22 = smov [#allocation15]  }
  0x63   :  { %6319 = vmatpush3.bf16.msra.mxu0 %v6316_v13  ;;  %837 = vst.msk [vmem:[#allocation5 + $0x68] sm:$0xff] %vm774_vm1, %v8019_v21  ;;  %838 = vst.msk [vmem:[#allocation5 + $0x70] sm:$0xff] %vm774_vm1, %v8019_v21  ;;  %v6863_v33 = vsub.s32 %v234_v28, %v236_v29  ;;  %v6870_v40 = vsub.s32 %v298_v32, %v236_v29  ;;  %s5904_s23 = sshll.u32 %s6629_s22, 4  ;;  %s5905_s23 = int_to_ptr.vmem [resolvable:$true] %s5904_s23 }
  0x64   :  { %6139 = vmatmul.mubr.msk.f32.vlgmr.msra.gmra.mrb[0].mxu1 %vm102_vm0, %v841_v14  ;;  %839 = vst.msk [vmem:[#allocation5 + $0x78] sm:$0xff] %vm774_vm1, %v8019_v21  ;;  %6151 = vmatprep.subr.mxu0 %v8019_v21  ;;  %s6572_s25 = scalar_lea.vmem %s5905_s23, 256  ;;  %p6577_p13 = scmp.lt.s32.totalorder %s5905_s23, %s5905_s23 }
  0x65   :  { %6143 = vmatprep.mubr.msk.f32.mxu1 %vm6617_vm2, %v8019_v21  ;;  %808 = vst.msk [vmem:[#allocation4] sm:$0xff] %vm791_vm3, %v8019_v21  ;;  %809 = vst.msk [vmem:[#allocation4 + $0x8] sm:$0xff] %vm791_vm3, %v8019_v21  ;;  %p6573_p12 = scmp.ne.s32.totalorder %s5905_s23, %s6572_s25  ;;  %p6578_p0 = scmp.lt.s32.totalorder %s6572_s25, %s6572_s25 }
  0x66   :  { %6128 = vmatmul.mubr.msk.f32.vlgmr.msra.gmra.mrb[0].mxu0 %vm102_vm0, %v97_v15  ;;  %810 = vst.msk [vmem:[#allocation4 + $0x10] sm:$0xff] %vm791_vm3, %v8019_v21  ;;  %811 = vst.msk [vmem:[#allocation4 + $0x18] sm:$0xff] %vm791_vm3, %v8019_v21 }
  0x67   :  { %6153 = vmatprep.mubr.msk.f32.mxu0 %vm6617_vm2, %v8019_v21  ;;  %812 = vst.msk [vmem:[#allocation4 + $0x20] sm:$0xff] %vm791_vm3, %v8019_v21  ;;  %813 = vst.msk [vmem:[#allocation4 + $0x28] sm:$0xff] %vm791_vm3, %v8019_v21  ;;  %p6579_p1 = por %p6578_p0, %p6577_p13 }
  0x68   :  { %814 = vst.msk [vmem:[#allocation4 + $0x30] sm:$0xff] %vm791_vm3, %v8019_v21  ;;  %815 = vst.msk [vmem:[#allocation4 + $0x38] sm:$0xff] %vm791_vm3, %v8019_v21 }
  0x69   :  { %816 = vst.msk [vmem:[#allocation4 + $0x40] sm:$0xff] %vm791_vm3, %v8019_v21  ;;  %817 = vst.msk [vmem:[#allocation4 + $0x48] sm:$0xff] %vm791_vm3, %v8019_v21  ;;  %p6580_p2 = pnand %p6579_p1, %p6573_p12 }
  0x6a   :  { %818 = vst.msk [vmem:[#allocation4 + $0x50] sm:$0xff] %vm791_vm3, %v8019_v21  ;;  %819 = vst.msk [vmem:[#allocation4 + $0x58] sm:$0xff] %vm791_vm3, %v8019_v21 }
  0x6b   :  { %820 = vst.msk [vmem:[#allocation4 + $0x60] sm:$0xff] %vm791_vm3, %v8019_v21  ;;  %821 = vst.msk [vmem:[#allocation4 + $0x68] sm:$0xff] %vm791_vm3, %v8019_v21 }
  0x6c   :  { %822 = vst.msk [vmem:[#allocation4 + $0x70] sm:$0xff] %vm791_vm3, %v8019_v21  ;;  %823 = vst.msk [vmem:[#allocation4 + $0x78] sm:$0xff] %vm791_vm3, %v8019_v21 }
 0x137   :  { %v6758_v16 = vpop.f32.mrb[0].mxu1 }
 0x138   :  { %v6760_v17 = vpop.f32.mrb[1].mxu1 }
 0x139   :  { %936 = vrot.lane.b32.xlu0 %v6760_v17, %s6609_s4  ;;  %930 = vrot.lane.b32.xlu1 %v6760_v17, %s6610_s11  ;;  %v6129_v18 = vpop.f32.mrb[0].mxu0 }
 0x13a   :  { %v175_v19 = vpop.f32.mrb[1].mxu0  ;;  %v6818_v22 = vmul.f32 0.17677669, %v6129_v18 }
 0x13b   :  { %v6774_v20 = vmul.f32 0.17677669, %v175_v19 }
 0x13d   :  { %948 = vrot.lane.b32.xlu0 %v6760_v17, %s6611_s3  ;;  %942 = vrot.lane.b32.xlu1 %v6760_v17, %s6612_s24 }
 0x141   :  { %960 = vrot.lane.b32.xlu0 %v6760_v17, %s6613_s12  ;;  %954 = vrot.lane.b32.xlu1 %v6760_v17, %s6614_s13 }
 0x145   :  { %966 = vrot.lane.b32.xlu1 %v6760_v17, %s6615_s14  ;;  %188 = vrot.lane.b32.xlu0 %v6774_v20, %s6610_s11 }
 0x149   :  { %200 = vrot.lane.b32.xlu1 %v6774_v20, %s6612_s24  ;;  %194 = vrot.lane.b32.xlu0 %v6774_v20, %s6609_s4 }
 0x14d   :  { %196 = vrot.lane.b32.xlu1 %v6818_v22, %s6609_s4  ;;  %190 = vrot.lane.b32.xlu0 %v6818_v22, %s6610_s11 }
 0x151   :  { %212 = vrot.lane.b32.xlu1 %v6774_v20, %s6614_s13  ;;  %206 = vrot.lane.b32.xlu0 %v6774_v20, %s6611_s3 }
 0x155   :  { %224 = vrot.lane.b32.xlu1 %v6774_v20, %s6615_s14  ;;  %218 = vrot.lane.b32.xlu0 %v6774_v20, %s6613_s12 }
 0x159   :  { %932 = vrot.lane.b32.xlu1 %v6758_v16, %s6610_s11  ;;  %202 = vrot.lane.b32.xlu0 %v6818_v22, %s6612_s24 }
 0x15d   :  { %944 = vrot.lane.b32.xlu1 %v6758_v16, %s6612_s24  ;;  %938 = vrot.lane.b32.xlu0 %v6758_v16, %s6609_s4 }
 0x161   :  { %214 = vrot.lane.b32.xlu1 %v6818_v22, %s6614_s13  ;;  %208 = vrot.lane.b32.xlu0 %v6818_v22, %s6611_s3 }
 0x165   :  { %226 = vrot.lane.b32.xlu1 %v6818_v22, %s6615_s14  ;;  %220 = vrot.lane.b32.xlu0 %v6818_v22, %s6613_s12 }
 0x169   :  { %956 = vrot.lane.b32.xlu1 %v6758_v16, %s6614_s13  ;;  %950 = vrot.lane.b32.xlu0 %v6758_v16, %s6611_s3 }
 0x16d   :  { %968 = vrot.lane.b32.xlu1 %v6758_v16, %s6615_s14  ;;  %962 = vrot.lane.b32.xlu0 %v6758_v16, %s6613_s12 }
 0x171   :  { %1516 = vrot.lane.b32.xlu1 %v6760_v17, %s6618_s15 }
 0x1ab   :  { %v937_v30 = vpop.permute.xlu0 %936  ;;  %v931_v31 = vpop.permute.xlu1 %930 }
 0x1ac   :  { %1520 = vrot.lane.b32.xlu1 %v931_v31, %s6618_s15  ;;  %v972_v34 = vcombine.low %v6760_v17, %v937_v30  ;;  %v973_v35 = vcombine.high %v6760_v17, %v937_v30 }
 0x1ae   :  { %v980_v41 = vrot.slane %v972_v34, %v6863_v33  ;;  %v987_v42 = vrot.slane %v973_v35, %v6863_v33 }
 0x1af   :  { %v6867_v36 = vpop.permute.xlu0 %948  ;;  %v943_v37 = vpop.permute.xlu1 %942 }
 0x1b0   :  { %v988_v38 = vcombine.low %v931_v31, %v943_v37  ;;  %v989_v39 = vcombine.high %v931_v31, %v943_v37  ;;  %1524 = vrot.lane.b32.xlu1 %v937_v30, %s6618_s15 }
 0x1b2   :  { %v996_v43 = vrot.slane %v988_v38, %v6863_v33  ;;  %v1003_v44 = vrot.slane %v989_v39, %v6863_v33 }
 0x1b3   :  { %v6876_v45 = vpop.permute.xlu0 %960  ;;  %v6878_v46 = vpop.permute.xlu1 %954 }
 0x1b4   :  { %v1036_v47 = vcombine.low %v980_v41, %v996_v43  ;;  %v1037_v48 = vcombine.high %v980_v41, %v996_v43  ;;  %v1052_v49 = vcombine.low %v987_v42, %v1003_v44  ;;  %v1053_v50 = vcombine.high %v987_v42, %v1003_v44  ;;  %1528 = vrot.lane.b32.xlu1 %v943_v37, %s6618_s15 }
 0x1b5   :  { %v1004_v51 = vcombine.low %v6867_v36, %v6876_v45  ;;  %v1005_v52 = vcombine.high %v6867_v36, %v6876_v45 }
 0x1b6   :  { %v1044_v53 = vrot.slane %v1036_v47, %v6870_v40  ;;  %v1051_v54 = vrot.slane %v1037_v48, %v6870_v40  ;;  %v1060_v55 = vrot.slane %v1052_v49, %v6870_v40  ;;  %v1067_v56 = vrot.slane %v1053_v50, %v6870_v40 }
 0x1b7   :  { %v6889_v57 = vpop.permute.xlu1 %966  ;;  %v189_v58 = vpop.permute.xlu0 %188  ;;  %v1012_v3 = vrot.slane %v1004_v51, %v6863_v33  ;;  %v1019_v4 = vrot.slane %v1005_v52, %v6863_v33 }
 0x1b8   :  { %v5938_v59 = vcombine.low %v1044_v53, %v1051_v54  ;;  %v5940_v60 = vcombine.high %v1044_v53, %v1051_v54  ;;  %v5942_v61 = vcombine.low %v1060_v55, %v1067_v56  ;;  %v5944_v62 = vcombine.high %v1060_v55, %v1067_v56 }
 0x1b9   :  { %v1020_v63 = vcombine.low %v6878_v46, %v6889_v57  ;;  %v1021_v0 = vcombine.high %v6878_v46, %v6889_v57 }
 0x1ba   :  { %v6896_v1 = vrot.slane %v5938_v59, %v6863_v33  ;;  %v6899_v2 = vrot.slane %v5940_v60, %v6863_v33  ;;  %v6904_v5 = vrot.slane %v5942_v61, %v6863_v33  ;;  %v6907_v6 = vrot.slane %v5944_v62, %v6863_v33 }
 0x1bb   :  { %v1028_v7 = vrot.slane %v1020_v63, %v6863_v33  ;;  %v1035_v8 = vrot.slane %v1021_v0, %v6863_v33  ;;  %v201_v9 = vpop.permute.xlu1 %200  ;;  %v195_v10 = vpop.permute.xlu0 %194 }
 0x1bc   :  { %v246_v11 = vcombine.low %v189_v58, %v201_v9  ;;  %v247_v12 = vcombine.high %v189_v58, %v201_v9  ;;  %v230_v13 = vcombine.low %v6774_v20, %v195_v10  ;;  %v231_v14 = vcombine.high %v6774_v20, %v195_v10 }
 0x1bd   :  { %v1068_v15 = vcombine.low %v1012_v3, %v1028_v7  ;;  %v1069_v17 = vcombine.high %v1012_v3, %v1028_v7  ;;  %v1084_v18 = vcombine.low %v1019_v4, %v1035_v8  ;;  %v1085_v19 = vcombine.high %v1019_v4, %v1035_v8 }
 0x1be   :  { %v254_v23 = vrot.slane %v246_v11, %v6863_v33  ;;  %v261_v24 = vrot.slane %v247_v12, %v6863_v33  ;;  %v238_v25 = vrot.slane %v230_v13, %v6863_v33  ;;  %v245_v26 = vrot.slane %v231_v14, %v6863_v33 }
 0x1bf   :  { %v1076_v27 = vrot.slane %v1068_v15, %v6870_v40  ;;  %v1083_v28 = vrot.slane %v1069_v17, %v6870_v40  ;;  %v1092_v29 = vrot.slane %v1084_v18, %v6870_v40  ;;  %v1099_v20 = vrot.slane %v1085_v19, %v6870_v40  ;;  %v197_v30 = vpop.permute.xlu1 %196  ;;  %v6921_v31 = vpop.permute.xlu0 %190 }
 0x1c0   :  { %v294_v32 = vcombine.low %v238_v25, %v254_v23  ;;  %v295_v34 = vcombine.high %v238_v25, %v254_v23  ;;  %v310_v35 = vcombine.low %v245_v26, %v261_v24  ;;  %v311_v37 = vcombine.high %v245_v26, %v261_v24 }
 0x1c1   :  { %v5939_v38 = vcombine.low %v1076_v27, %v1083_v28  ;;  %v5941_v39 = vcombine.high %v1076_v27, %v1083_v28  ;;  %v5943_v41 = vcombine.low %v1092_v29, %v1099_v20  ;;  %v5945_v42 = vcombine.high %v1092_v29, %v1099_v20 }
 0x1c2   :  { %v302_v43 = vrot.slane %v294_v32, %v6870_v40  ;;  %v309_v44 = vrot.slane %v295_v34, %v6870_v40  ;;  %v318_v47 = vrot.slane %v310_v35, %v6870_v40  ;;  %v325_v48 = vrot.slane %v311_v37, %v6870_v40 }
 0x1c3   :  { %v6928_v49 = vrot.slane %v5939_v38, %v6863_v33  ;;  %v6931_v50 = vrot.slane %v5941_v39, %v6863_v33  ;;  %v6934_v51 = vrot.slane %v5943_v41, %v6863_v33  ;;  %v6937_v52 = vrot.slane %v5945_v42, %v6863_v33  ;;  %v213_v53 = vpop.permute.xlu1 %212  ;;  %v207_v54 = vpop.permute.xlu0 %206 }
 0x1c4   :  { %v5920_v55 = vcombine.low %v302_v43, %v309_v44  ;;  %v5922_v56 = vcombine.high %v302_v43, %v309_v44  ;;  %v5924_v58 = vcombine.low %v318_v47, %v325_v48  ;;  %v5926_v59 = vcombine.high %v318_v47, %v325_v48 }
 0x1c5   :  { %v366_v60 = vcombine.low %v6818_v22, %v197_v30  ;;  %v367_v61 = vcombine.high %v6818_v22, %v197_v30  ;;  %v1308_v62 = vcombine.low %v6896_v1, %v6899_v2  ;;  %v1340_v63 = vcombine.low %v6904_v5, %v6907_v6 }
 0x1c6   :  { %v510_v0 = vrot.slane %v5920_v55, %v6863_v33  ;;  %v526_v3 = vrot.slane %v5922_v56, %v6863_v33  ;;  %v542_v4 = vrot.slane %v5924_v58, %v6863_v33  ;;  %v558_v7 = vrot.slane %v5926_v59, %v6863_v33 }
 0x1c7   :  { %v6950_v8 = vrot.slane %v366_v60, %v6863_v33  ;;  %v6953_v9 = vrot.slane %v367_v61, %v6863_v33  ;;  %v6956_v22 = vrot.slane %v1308_v62, %v6870_v40  ;;  %v6959_v10 = vrot.slane %v1340_v63, %v6870_v40  ;;  %v225_v11 = vpop.permute.xlu1 %224  ;;  %v219_v12 = vpop.permute.xlu0 %218 }
 0x1c8   :  { %v566_v13 = vcombine.low %v510_v0, %v526_v3  ;;  %v567_v14 = vcombine.high %v510_v0, %v526_v3  ;;  %v598_v15 = vcombine.low %v542_v4, %v558_v7  ;;  %v599_v17 = vcombine.high %v542_v4, %v558_v7 }
 0x1c9   :  { %v1372_v18 = vcombine.low %v6956_v22, %v6959_v10  ;;  %v1309_v19 = vcombine.high %v6896_v1, %v6899_v2  ;;  %v1341_v23 = vcombine.high %v6904_v5, %v6907_v6  ;;  %v278_v24 = vcombine.low %v213_v53, %v225_v11 }
 0x1ca   :  { %v574_v25 = vrot.slane %v566_v13, %v6870_v40  ;;  %v581_v26 = vrot.slane %v567_v14, %v6870_v40  ;;  %v606_v27 = vrot.slane %v598_v15, %v6870_v40  ;;  %v613_v28 = vrot.slane %v599_v17, %v6870_v40 }
 0x1cb   :  { %6142 = vmatpush3.xpose.msk.msra.mxu1 %vm774_vm1, %v1372_v18  ;;  %v6973_v29 = vrot.slane %v1309_v19, %v6870_v40  ;;  %v6976_v20 = vrot.slane %v1341_v23, %v6870_v40  ;;  %v279_v1 = vcombine.high %v213_v53, %v225_v11  ;;  %v286_v2 = vrot.slane %v278_v24, %v6863_v33  ;;  %v6979_v5 = vpop.permute.xlu1 %932  ;;  %v203_v6 = vpop.permute.xlu0 %202 }
 0x1cc   :  { %v630_v30 = vcombine.low %v574_v25, %v606_v27  ;;  %v631_v32 = vcombine.high %v574_v25, %v606_v27  ;;  %v632_v34 = vcombine.low %v581_v26, %v613_v28  ;;  %v633_v35 = vcombine.high %v581_v26, %v613_v28  ;;  %6146 = vmatprep.subr.mxu1 %v8019_v21 }
 0x1cd   :  { %v1374_v37 = vcombine.low %v6973_v29, %v6976_v20  ;;  %v293_v38 = vrot.slane %v279_v1, %v6863_v33  ;;  %v262_v39 = vcombine.low %v207_v54, %v219_v12  ;;  %v263_v41 = vcombine.high %v207_v54, %v219_v12 }
 0x1ce   :  { %775 = vst.msk [vmem:[#allocation2] sm:$0xff] %vm774_vm1, %v630_v30  ;;  %776 = vst.msk [vmem:[#allocation2 + $0x8] sm:$0xff] %vm774_vm1, %v631_v32  ;;  %v382_v42 = vcombine.low %v6921_v31, %v203_v6  ;;  %v383_v43 = vcombine.high %v6921_v31, %v203_v6  ;;  %v1373_v44 = vcombine.high %v6956_v22, %v6959_v10 }
 0x1cf   :  { %777 = vst.msk [vmem:[#allocation2 + $0x10] sm:$0xff] %vm774_vm1, %v632_v34  ;;  %778 = vst.msk [vmem:[#allocation2 + $0x18] sm:$0xff] %vm774_vm1, %v633_v35  ;;  %v1324_v47 = vcombine.low %v6928_v49, %v6931_v50  ;;  %6152 = vmatpush3.xpose.msk.msra.mxu0 %vm774_vm1, %v1374_v37  ;;  %v270_v48 = vrot.slane %v262_v39, %v6863_v33  ;;  %v277_v53 = vrot.slane %v263_v41, %v6863_v33  ;;  %v6998_v54 = vpop.permute.xlu1 %944  ;;  %v7010_v61 = vpop.permute.xlu0 %938 }
 0x1d0   :  { %v1356_v55 = vcombine.low %v6934_v51, %v6937_v52  ;;  %v1375_v31 = vcombine.high %v6973_v29, %v6976_v20  ;;  %v390_v56 = vrot.slane %v382_v42, %v6863_v33  ;;  %v397_v58 = vrot.slane %v383_v43, %v6863_v33  ;;  %6161 = vmatprep.subr.mxu0 %v8019_v21 }
 0x1d1   :  { %v1124_v59 = vcombine.low %v6979_v5, %v6998_v54  ;;  %v1125_v60 = vcombine.high %v6979_v5, %v6998_v54  ;;  %v326_v62 = vcombine.low %v270_v48, %v286_v2  ;;  %v327_v63 = vcombine.high %v270_v48, %v286_v2 }
 0x1d2   :  { %v342_v0 = vcombine.low %v277_v53, %v293_v38  ;;  %v343_v3 = vcombine.high %v277_v53, %v293_v38  ;;  %v430_v4 = vcombine.low %v6950_v8, %v390_v56  ;;  %v431_v7 = vcombine.high %v6950_v8, %v390_v56 }
 0x1d3   :  { %v446_v22 = vcombine.low %v6953_v9, %v397_v58  ;;  %v447_v10 = vcombine.high %v6953_v9, %v397_v58  ;;  %v334_v11 = vrot.slane %v326_v62, %v6870_v40  ;;  %v341_v12 = vrot.slane %v327_v63, %v6870_v40  ;;  %v7021_v15 = vpop.permute.xlu1 %214  ;;  %v7027_v30 = vpop.permute.xlu0 %208 }
 0x1d4   :  { %v350_v13 = vrot.slane %v342_v0, %v6870_v40  ;;  %v357_v14 = vrot.slane %v343_v3, %v6870_v40  ;;  %v438_v17 = vrot.slane %v430_v4, %v6870_v40  ;;  %v445_v18 = vrot.slane %v431_v7, %v6870_v40 }
 0x1d5   :  { %v454_v8 = vrot.slane %v446_v22, %v6870_v40  ;;  %v461_v19 = vrot.slane %v447_v10, %v6870_v40  ;;  %v5921_v23 = vcombine.low %v334_v11, %v341_v12  ;;  %v5923_v9 = vcombine.high %v334_v11, %v341_v12  ;;  %v2108_v26 = vld [vmem:[#allocation2] sm:$0xff]  ;;  %v2109_v3 = vld [vmem:[#allocation2 + $0x8] sm:$0xff] }
 0x1d6   :  { %v5925_v24 = vcombine.low %v350_v13, %v357_v14  ;;  %v5927_v25 = vcombine.high %v350_v13, %v357_v14  ;;  %v2110_v27 = vld [vmem:[#allocation2 + $0x10] sm:$0xff]  ;;  %v5928_v28 = vcombine.low %v438_v17, %v445_v18  ;;  %v5930_v1 = vcombine.high %v438_v17, %v445_v18  ;;  %6144 = vmatmul.mubr.msk.f32.vlgmr.msra.gmra.mrb[2].mxu1 %vm774_vm1, %v2108_v26 }
 0x1d7   :  { %v5932_v2 = vcombine.low %v454_v8, %v461_v19  ;;  %v5934_v6 = vcombine.high %v454_v8, %v461_v19  ;;  %v517_v32 = vrot.slane %v5921_v23, %v6863_v33  ;;  %v533_v34 = vrot.slane %v5923_v9, %v6863_v33  ;;  %6147 = vmatpush3.xpose.msk.msra.mxu1 %vm774_vm1, %v1373_v44  ;;  %v7035_v38 = vpop.permute.xlu1 %226  ;;  %v221_v18 = vpop.permute.xlu0 %220 }
 0x1d8   :  { %v549_v35 = vrot.slane %v5925_v24, %v6863_v33  ;;  %v565_v37 = vrot.slane %v5927_v25, %v6863_v33  ;;  %v646_v39 = vrot.slane %v5928_v28, %v6863_v33  ;;  %v662_v41 = vrot.slane %v5930_v1, %v6863_v33  ;;  %6154 = vmatmul.mubr.msk.f32.vlgmr.msra.gmra.mrb[2].mxu0 %vm774_vm1, %v2110_v27  ;;  %v2111_v28 = vld [vmem:[#allocation2 + $0x18] sm:$0xff] }
 0x1d9   :  { %v678_v42 = vrot.slane %v5932_v2, %v6863_v33  ;;  %v694_v43 = vrot.slane %v5934_v6, %v6863_v33  ;;  %v582_v48 = vcombine.low %v517_v32, %v533_v34  ;;  %v583_v53 = vcombine.high %v517_v32, %v533_v34  ;;  %6148 = vmatprep.mubr.msk.f32.mxu1 %vm6617_vm2, %v8019_v21 }
 0x1da   :  { %v614_v56 = vcombine.low %v549_v35, %v565_v37  ;;  %v615_v58 = vcombine.high %v549_v35, %v565_v37  ;;  %v702_v44 = vcombine.low %v646_v39, %v662_v41  ;;  %v703_v62 = vcombine.high %v646_v39, %v662_v41  ;;  %6156 = vmatprep.subr.mxu1 %v8019_v21 }
 0x1db   :  { %v734_v63 = vcombine.low %v678_v42, %v694_v43  ;;  %v735_v0 = vcombine.high %v678_v42, %v694_v43  ;;  %v590_v4 = vrot.slane %v582_v48, %v6870_v40  ;;  %v597_v7 = vrot.slane %v583_v53, %v6870_v40  ;;  %6149 = vmatmul.mubr.msk.f32.vlgmr.msra.gmra.mrb[4].mxu1 %vm774_vm1, %v2109_v3  ;;  %v7050_v11 = vpop.permute.xlu1 %956 }
 0x1dc   :  { %v622_v22 = vrot.slane %v614_v56, %v6870_v40  ;;  %v629_v10 = vrot.slane %v615_v58, %v6870_v40  ;;  %v710_v12 = vrot.slane %v702_v44, %v6870_v40  ;;  %v717_v13 = vrot.slane %v703_v62, %v6870_v40  ;;  %6157 = vmatpush3.xpose.msk.msra.mxu1 %vm774_vm1, %v1375_v31 }
 0x1dd   :  { %v742_v14 = vrot.slane %v734_v63, %v6870_v40  ;;  %v749_v17 = vrot.slane %v735_v0, %v6870_v40  ;;  %6158 = vmatprep.mubr.msk.f32.mxu1 %vm6617_vm2, %v8019_v21  ;;  %6166 = vmatprep.subr.mxu1 %v8019_v21  ;;  %v1132_v29 = vrot.slane %v1124_v59, %v6863_v33 }
 0x1de   :  { %v634_v8 = vcombine.low %v590_v4, %v622_v22  ;;  %v635_v19 = vcombine.high %v590_v4, %v622_v22  ;;  %v636_v23 = vcombine.low %v597_v7, %v629_v10  ;;  %v637_v9 = vcombine.high %v597_v7, %v629_v10  ;;  %6163 = vmatprep.mubr.msk.f32.mxu0 %vm6617_vm2, %v8019_v21 }
 0x1df   :  { %v766_v24 = vcombine.low %v710_v12, %v742_v14  ;;  %v767_v25 = vcombine.high %v710_v12, %v742_v14  ;;  %v768_v26 = vcombine.low %v717_v13, %v749_v17  ;;  %v769_v27 = vcombine.high %v717_v13, %v749_v17  ;;  %6159 = vmatmul.mubr.msk.f32.vlgmr.msra.gmra.mrb[6].mxu1 %vm774_vm1, %v2111_v28  ;;  %v7102_v37 = vpop.permute.xlu1 %968 }
 0x1e0   :  { %779 = vst.msk [vmem:[#allocation2 + $0x20] sm:$0xff] %vm774_vm1, %v634_v8  ;;  %780 = vst.msk [vmem:[#allocation2 + $0x28] sm:$0xff] %vm774_vm1, %v635_v19  ;;  %v1139_v20 = vrot.slane %v1125_v60, %v6863_v33  ;;  %v1108_v31 = vcombine.low %v6758_v16, %v7010_v61  ;;  %v1109_v1 = vcombine.high %v6758_v16, %v7010_v61  ;;  %6168 = vmatprep.mubr.msk.f32.mxu1 %vm6617_vm2, %v8019_v21 }
 0x1e1   :  { %781 = vst.msk [vmem:[#allocation2 + $0x30] sm:$0xff] %vm774_vm1, %v636_v23  ;;  %782 = vst.msk [vmem:[#allocation2 + $0x38] sm:$0xff] %vm774_vm1, %v637_v9  ;;  %v1332_v59 = vrot.slane %v1324_v47, %v6870_v40  ;;  %v1364_v60 = vrot.slane %v1356_v55, %v6870_v40  ;;  %v414_v2 = vcombine.low %v7021_v15, %v7035_v38 }
 0x1e2   :  { %783 = vst.msk [vmem:[#allocation2 + $0x40] sm:$0xff] %vm774_vm1, %v766_v24  ;;  %784 = vst.msk [vmem:[#allocation2 + $0x48] sm:$0xff] %vm774_vm1, %v767_v25  ;;  %v415_v6 = vcombine.high %v7021_v15, %v7035_v38  ;;  %v1116_v32 = vrot.slane %v1108_v31, %v6863_v33  ;;  %v1123_v34 = vrot.slane %v1109_v1, %v6863_v33  ;;  %v7108_v38 = vpop.permute.xlu0 %950 }
 0x1e3   :  { %785 = vst.msk [vmem:[#allocation2 + $0x50] sm:$0xff] %vm774_vm1, %v768_v26  ;;  %786 = vst.msk [vmem:[#allocation2 + $0x58] sm:$0xff] %vm774_vm1, %v769_v27  ;;  %v398_v47 = vcombine.low %v7027_v30, %v221_v18  ;;  %v399_v35 = vcombine.high %v7027_v30, %v221_v18  ;;  %v1376_v55 = vcombine.low %v1332_v59, %v1364_v60 }
 0x1e4   :  { %v422_v39 = vrot.slane %v414_v2, %v6863_v33  ;;  %v429_v15 = vrot.slane %v415_v6, %v6863_v33  ;;  %v1377_v41 = vcombine.high %v1332_v59, %v1364_v60  ;;  %v1172_v42 = vcombine.low %v1116_v32, %v1132_v29 }
 0x1e5   :  { %v1173_v43 = vcombine.high %v1116_v32, %v1132_v29  ;;  %v1188_v48 = vcombine.low %v1123_v34, %v1139_v20  ;;  %v1189_v53 = vcombine.high %v1123_v34, %v1139_v20  ;;  %6162 = vmatpush3.xpose.msk.msra.mxu0 %vm774_vm1, %v1376_v55  ;;  %v406_v30 = vrot.slane %v398_v47, %v6863_v33 }
 0x1e6   :  { %v413_v56 = vrot.slane %v399_v35, %v6863_v33  ;;  %6167 = vmatpush3.xpose.msk.msra.mxu1 %vm774_vm1, %v1377_v41  ;;  %v1156_v58 = vcombine.low %v7050_v11, %v7102_v37  ;;  %v1180_v44 = vrot.slane %v1172_v42, %v6870_v40  ;;  %6171 = vmatprep.subr.mxu0 %v8019_v21  ;;  %v7127_v24 = vpop.permute.xlu0 %962 }
 0x1e7   :  { %v1187_v62 = vrot.slane %v1173_v43, %v6870_v40  ;;  %v1196_v63 = vrot.slane %v1188_v48, %v6870_v40  ;;  %v1203_v0 = vrot.slane %v1189_v53, %v6870_v40  ;;  %v462_v3 = vcombine.low %v406_v30, %v422_v39  ;;  %6176 = vmatprep.subr.mxu1 %v8019_v21  ;;  %v2112_v10 = vld [vmem:[#allocation2 + $0x20] sm:$0xff]  ;;  %v2113_v12 = vld [vmem:[#allocation2 + $0x28] sm:$0xff] }
 0x1e8   :  { %v463_v4 = vcombine.high %v406_v30, %v422_v39  ;;  %v478_v7 = vcombine.low %v413_v56, %v429_v15  ;;  %v479_v22 = vcombine.high %v413_v56, %v429_v15  ;;  %6164 = vmatmul.mubr.msk.f32.vlgmr.msra.gmra.mrb[4].mxu0 %vm774_vm1, %v2112_v10  ;;  %v1157_v59 = vcombine.high %v7050_v11, %v7102_v37 }
 0x1e9   :  { %v5946_v13 = vcombine.low %v1180_v44, %v1187_v62  ;;  %v5948_v14 = vcombine.high %v1180_v44, %v1187_v62  ;;  %v5950_v17 = vcombine.low %v1196_v63, %v1203_v0  ;;  %v5952_v18 = vcombine.high %v1196_v63, %v1203_v0  ;;  %6169 = vmatmul.mubr.msk.f32.vlgmr.msra.gmra.mrb[8].mxu1 %vm774_vm1, %v2113_v12 }
 0x1ea   :  { %v470_v8 = vrot.slane %v462_v3, %v6870_v40  ;;  %v477_v19 = vrot.slane %v463_v4, %v6870_v40  ;;  %v486_v23 = vrot.slane %v478_v7, %v6870_v40  ;;  %v493_v9 = vrot.slane %v479_v22, %v6870_v40  ;;  %6173 = vmatprep.mubr.msk.f32.mxu0 %vm6617_vm2, %v8019_v21 }
 0x1eb   :  { %v7131_v25 = vrot.slane %v5946_v13, %v6863_v33  ;;  %v7134_v26 = vrot.slane %v5948_v14, %v6863_v33  ;;  %v7137_v27 = vrot.slane %v5950_v17, %v6863_v33  ;;  %v7140_v28 = vrot.slane %v5952_v18, %v6863_v33  ;;  %6178 = vmatprep.mubr.msk.f32.mxu1 %vm6617_vm2, %v8019_v21 }
 0x1ec   :  { %v5929_v29 = vcombine.low %v470_v8, %v477_v19  ;;  %v5931_v20 = vcombine.high %v470_v8, %v477_v19  ;;  %v5933_v31 = vcombine.low %v486_v23, %v493_v9  ;;  %v5935_v1 = vcombine.high %v486_v23, %v493_v9 }
 0x1ed   :  { %v1164_v60 = vrot.slane %v1156_v58, %v6863_v33  ;;  %v1140_v2 = vcombine.low %v7108_v38, %v7127_v24  ;;  %v1141_v6 = vcombine.high %v7108_v38, %v7127_v24  ;;  %v1171_v55 = vrot.slane %v1157_v59, %v6863_v33 }
 0x1ee   :  { %v653_v32 = vrot.slane %v5929_v29, %v6863_v33  ;;  %v669_v34 = vrot.slane %v5931_v20, %v6863_v33  ;;  %v685_v47 = vrot.slane %v5933_v31, %v6863_v33  ;;  %v701_v35 = vrot.slane %v5935_v1, %v6863_v33 }
 0x1ef   :  { %v1148_v39 = vrot.slane %v1140_v2, %v6863_v33  ;;  %v1155_v15 = vrot.slane %v1141_v6, %v6863_v33  ;;  %v1325_v41 = vcombine.high %v6928_v49, %v6931_v50  ;;  %v1357_v23 = vcombine.high %v6934_v51, %v6937_v52 }
 0x1f0   :  { %v718_v42 = vcombine.low %v653_v32, %v669_v34  ;;  %v719_v43 = vcombine.high %v653_v32, %v669_v34  ;;  %v750_v48 = vcombine.low %v685_v47, %v701_v35  ;;  %v751_v53 = vcombine.high %v685_v47, %v701_v35 }
 0x1f1   :  { %v1204_v30 = vcombine.low %v1148_v39, %v1164_v60  ;;  %v1205_v56 = vcombine.high %v1148_v39, %v1164_v60  ;;  %v1220_v58 = vcombine.low %v1155_v15, %v1171_v55  ;;  %v1221_v44 = vcombine.high %v1155_v15, %v1171_v55  ;;  %v2114_v55 = vld [vmem:[#allocation2 + $0x30] sm:$0xff]  ;;  %v2115_v39 = vld [vmem:[#allocation2 + $0x38] sm:$0xff] }
 0x1f2   :  { %v726_v62 = vrot.slane %v718_v42, %v6870_v40  ;;  %v733_v63 = vrot.slane %v719_v43, %v6870_v40  ;;  %v758_v0 = vrot.slane %v750_v48, %v6870_v40  ;;  %v765_v3 = vrot.slane %v751_v53, %v6870_v40  ;;  %v2116_v43 = vld [vmem:[#allocation2 + $0x40] sm:$0xff]  ;;  %v2117_v48 = vld [vmem:[#allocation2 + $0x48] sm:$0xff] }
 0x1f3   :  { %v1212_v4 = vrot.slane %v1204_v30, %v6870_v40  ;;  %v1219_v49 = vrot.slane %v1205_v56, %v6870_v40  ;;  %v1228_v50 = vrot.slane %v1220_v58, %v6870_v40  ;;  %v1235_v7 = vrot.slane %v1221_v44, %v6870_v40 }
 0x1f4   :  { %v770_v22 = vcombine.low %v726_v62, %v758_v0  ;;  %v771_v10 = vcombine.high %v726_v62, %v758_v0  ;;  %v772_v12 = vcombine.low %v733_v63, %v765_v3  ;;  %v773_v13 = vcombine.high %v733_v63, %v765_v3  ;;  %v2118_v62 = vld [vmem:[#allocation2 + $0x50] sm:$0xff]  ;;  %v2119_v63 = vld [vmem:[#allocation2 + $0x58] sm:$0xff] }
 0x1f5   :  { %v5947_v14 = vcombine.low %v1212_v4, %v1219_v49  ;;  %v5949_v17 = vcombine.high %v1212_v4, %v1219_v49  ;;  %v5951_v18 = vcombine.low %v1228_v50, %v1235_v7  ;;  %v5953_v8 = vcombine.high %v1228_v50, %v1235_v7 }
 0x1f6   :  { %787 = vst.msk [vmem:[#allocation2 + $0x60] sm:$0xff] %vm774_vm1, %v770_v22  ;;  %788 = vst.msk [vmem:[#allocation2 + $0x68] sm:$0xff] %vm774_vm1, %v771_v10  ;;  %v1339_v19 = vrot.slane %v1325_v41, %v6870_v40  ;;  %v1444_v9 = vcombine.low %v7131_v25, %v7134_v26  ;;  %v1476_v29 = vcombine.low %v7137_v27, %v7140_v28 }
 0x1f7   :  { %789 = vst.msk [vmem:[#allocation2 + $0x70] sm:$0xff] %vm774_vm1, %v772_v12  ;;  %790 = vst.msk [vmem:[#allocation2 + $0x78] sm:$0xff] %vm774_vm1, %v773_v13  ;;  %v1395_v20 = vrot.slane %v5947_v14, %v6863_v33  ;;  %v1411_v31 = vrot.slane %v5949_v17, %v6863_v33  ;;  %v1427_v1 = vrot.slane %v5951_v18, %v6863_v33  ;;  %v1517_v12 = vpop.permute.xlu1 %1516 }
 0x1f8   :  { %v1443_v59 = vrot.slane %v5953_v8, %v6863_v33  ;;  %v1371_v60 = vrot.slane %v1357_v23, %v6870_v40  ;;  %v1452_v2 = vrot.slane %v1444_v9, %v6870_v40  ;;  %v1484_v51 = vrot.slane %v1476_v29, %v6870_v40 }
 0x1f9   :  { %v1445_v32 = vcombine.high %v7131_v25, %v7134_v26  ;;  %v1477_v34 = vcombine.high %v7137_v27, %v7140_v28  ;;  %v1460_v47 = vcombine.low %v1395_v20, %v1411_v31  ;;  %v1461_v28 = vcombine.high %v1395_v20, %v1411_v31 }
 0x1fa   :  { %v1378_v52 = vcombine.low %v1339_v19, %v1371_v60  ;;  %v1379_v6 = vcombine.high %v1339_v19, %v1371_v60  ;;  %v1492_v35 = vcombine.low %v1427_v1, %v1443_v59  ;;  %v1508_v15 = vcombine.low %v1452_v2, %v1484_v51 }
 0x1fb   :  { %v1509_v41 = vcombine.high %v1452_v2, %v1484_v51  ;;  %v1459_v42 = vrot.slane %v1445_v32, %v6870_v40  ;;  %v1491_v25 = vrot.slane %v1477_v34, %v6870_v40  ;;  %v1468_v26 = vrot.slane %v1460_v47, %v6870_v40 }
 0x1fc   :  { %6172 = vmatpush3.xpose.msk.msra.mxu0 %vm774_vm1, %v1378_v52  ;;  %6177 = vmatpush3.xpose.msk.msra.mxu1 %vm774_vm1, %v1379_v6  ;;  %v1500_v27 = vrot.slane %v1492_v35, %v6870_v40  ;;  %v1493_v56 = vcombine.high %v1427_v1, %v1443_v59  ;;  %v1475_v0 = vrot.slane %v1461_v28, %v6870_v40 }
 0x1fd   :  { %6181 = vmatprep.subr.mxu0 %v8019_v21  ;;  %6186 = vmatprep.subr.mxu1 %v8019_v21  ;;  %v1510_v53 = vcombine.low %v1459_v42, %v1491_v25  ;;  %v1511_v30 = vcombine.high %v1459_v42, %v1491_v25  ;;  %v2120_v4 = vld [vmem:[#allocation2 + $0x60] sm:$0xff]  ;;  %v2121_v49 = vld [vmem:[#allocation2 + $0x68] sm:$0xff] }
 0x1fe   :  { %v1512_v58 = vcombine.low %v1468_v26, %v1500_v27  ;;  %v1513_v44 = vcombine.high %v1468_v26, %v1500_v27  ;;  %v1507_v3 = vrot.slane %v1493_v56, %v6870_v40  ;;  %v2122_v22 = vld [vmem:[#allocation2 + $0x70] sm:$0xff]  ;;  %v2123_v10 = vld [vmem:[#allocation2 + $0x78] sm:$0xff] }
 0x1ff   :  { %6174 = vmatmul.mubr.msk.f32.vlgmr.msra.gmra.mrb[6].mxu0 %vm774_vm1, %v2114_v55  ;;  %6179 = vmatmul.mubr.msk.f32.vlgmr.msra.gmra.mrb[10].mxu1 %vm774_vm1, %v2115_v39 }
 0x200   :  { %6182 = vmatpush3.xpose.msk.msra.mxu0 %vm774_vm1, %v1508_v15  ;;  %6187 = vmatpush3.xpose.msk.msra.mxu1 %vm774_vm1, %v1509_v41  ;;  %v1514_v50 = vcombine.low %v1475_v0, %v1507_v3  ;;  %v1515_v7 = vcombine.high %v1475_v0, %v1507_v3 }
 0x201   :  { %6183 = vmatprep.mubr.msk.f32.mxu0 %vm6617_vm2, %v8019_v21  ;;  %6188 = vmatprep.mubr.msk.f32.mxu1 %vm6617_vm2, %v8019_v21 }
 0x202   :  { %6191 = vmatprep.subr.mxu0 %v8019_v21  ;;  %6196 = vmatprep.subr.mxu1 %v8019_v21 }
 0x203   :  { %6184 = vmatmul.mubr.msk.f32.vlgmr.msra.gmra.mrb[8].mxu0 %vm774_vm1, %v2116_v43  ;;  %6189 = vmatmul.mubr.msk.f32.vlgmr.msra.gmra.mrb[12].mxu1 %vm774_vm1, %v2117_v48 }
 0x204   :  { %6192 = vmatpush3.xpose.msk.msra.mxu0 %vm774_vm1, %v1510_v53  ;;  %6197 = vmatpush3.xpose.msk.msra.mxu1 %vm774_vm1, %v1511_v30 }
 0x205   :  { %6193 = vmatprep.mubr.msk.f32.mxu0 %vm6617_vm2, %v8019_v21  ;;  %6198 = vmatprep.mubr.msk.f32.mxu1 %vm6617_vm2, %v8019_v21 }
 0x206   :  { %6201 = vmatprep.subr.mxu0 %v8019_v21  ;;  %6206 = vmatprep.subr.mxu1 %v8019_v21 }
 0x207   :  { %6194 = vmatmul.mubr.msk.f32.vlgmr.msra.gmra.mrb[10].mxu0 %vm774_vm1, %v2118_v62  ;;  %6199 = vmatmul.mubr.msk.f32.vlgmr.msra.gmra.mrb[14].mxu1 %vm774_vm1, %v2119_v63  ;;  %v6621_v63 = vmov -inf  }
 0x208   :  { %6202 = vmatpush3.xpose.msk.msra.mxu0 %vm774_vm1, %v1512_v58  ;;  %6207 = vmatpush3.xpose.msk.msra.mxu1 %vm774_vm1, %v1513_v44  ;;  %792 = vst.msk [vmem:[#allocation3] sm:$0xff] %vm791_vm3, %v6621_v63  ;;  %793 = vst.msk [vmem:[#allocation3 + $0x8] sm:$0xff] %vm791_vm3, %v6621_v63 }
 0x209   :  { %6203 = vmatprep.mubr.msk.f32.mxu0 %vm6617_vm2, %v8019_v21  ;;  %6208 = vmatprep.mubr.msk.f32.mxu1 %vm6617_vm2, %v8019_v21  ;;  %794 = vst.msk [vmem:[#allocation3 + $0x10] sm:$0xff] %vm791_vm3, %v6621_v63  ;;  %795 = vst.msk [vmem:[#allocation3 + $0x18] sm:$0xff] %vm791_vm3, %v6621_v63 }
 0x20a   :  { %6211 = vmatprep.subr.mxu0 %v8019_v21  ;;  %6216 = vmatprep.subr.mxu1 %v8019_v21  ;;  %796 = vst.msk [vmem:[#allocation3 + $0x20] sm:$0xff] %vm791_vm3, %v6621_v63  ;;  %797 = vst.msk [vmem:[#allocation3 + $0x28] sm:$0xff] %vm791_vm3, %v6621_v63 }
 0x20b   :  { %6204 = vmatmul.mubr.msk.f32.vlgmr.msra.gmra.mrb[12].mxu0 %vm774_vm1, %v2120_v4  ;;  %6209 = vmatmul.mubr.msk.f32.vlgmr.msra.gmra.mrb[16].mxu1 %vm774_vm1, %v2121_v49  ;;  %798 = vst.msk [vmem:[#allocation3 + $0x30] sm:$0xff] %vm791_vm3, %v6621_v63  ;;  %799 = vst.msk [vmem:[#allocation3 + $0x38] sm:$0xff] %vm791_vm3, %v6621_v63 }
 0x20c   :  { %6212 = vmatpush3.xpose.msk.msra.mxu0 %vm774_vm1, %v1514_v50  ;;  %6217 = vmatpush3.xpose.msk.msra.mxu1 %vm774_vm1, %v1515_v7  ;;  %800 = vst.msk [vmem:[#allocation3 + $0x40] sm:$0xff] %vm791_vm3, %v6621_v63  ;;  %801 = vst.msk [vmem:[#allocation3 + $0x48] sm:$0xff] %vm791_vm3, %v6621_v63 }
 0x20d   :  { %6213 = vmatprep.mubr.msk.f32.mxu0 %vm6617_vm2, %v8019_v21  ;;  %6218 = vmatprep.mubr.msk.f32.mxu1 %vm6617_vm2, %v8019_v21  ;;  %802 = vst.msk [vmem:[#allocation3 + $0x50] sm:$0xff] %vm791_vm3, %v6621_v63  ;;  %803 = vst.msk [vmem:[#allocation3 + $0x58] sm:$0xff] %vm791_vm3, %v6621_v63 }
 0x20e   :  { %6221 = vmatprep.subr.mxu0 %v8019_v21  ;;  %6226 = vmatprep.subr.mxu1 %v8019_v21  ;;  %804 = vst.msk [vmem:[#allocation3 + $0x60] sm:$0xff] %vm791_vm3, %v6621_v63  ;;  %805 = vst.msk [vmem:[#allocation3 + $0x68] sm:$0xff] %vm791_vm3, %v6621_v63 }
 0x20f   :  { %6214 = vmatmul.mubr.msk.f32.vlgmr.msra.gmra.mrb[14].mxu0 %vm774_vm1, %v2122_v22  ;;  %6219 = vmatmul.mubr.msk.f32.vlgmr.msra.gmra.mrb[18].mxu1 %vm774_vm1, %v2123_v10  ;;  %806 = vst.msk [vmem:[#allocation3 + $0x70] sm:$0xff] %vm791_vm3, %v6621_v63  ;;  %807 = vst.msk [vmem:[#allocation3 + $0x78] sm:$0xff] %vm791_vm3, %v6621_v63 }
 0x210   :  { %6223 = vmatprep.mubr.msk.f32.mxu0 %vm6617_vm2, %v8019_v21  ;;  %6228 = vmatprep.mubr.msk.f32.mxu1 %vm6617_vm2, %v8019_v21 }
 0x21e   :  { %v1521_v13 = vpop.permute.xlu1 %1520 }
 0x222   :  { %v1525_v14 = vpop.permute.xlu1 %1524 }
 0x223   :  { %v1564_v17 = vcombine.low %v1517_v12, %v1525_v14  ;;  %v1565_v18 = vcombine.high %v1517_v12, %v1525_v14 }
 0x225   :  { %v1572_v9 = vrot.slane %v1564_v17, %v6863_v33  ;;  %v1579_v29 = vrot.slane %v1565_v18, %v6863_v33 }
 0x226   :  { %v1529_v8 = vpop.permute.xlu1 %1528 }
 0x227   :  { %v1580_v19 = vcombine.low %v1521_v13, %v1529_v8  ;;  %v1581_v23 = vcombine.high %v1521_v13, %v1529_v8 }
 0x229   :  { %v1588_v20 = vrot.slane %v1580_v19, %v6863_v33  ;;  %v1595_v31 = vrot.slane %v1581_v23, %v6863_v33 }
 0x22b   :  { %v1628_v1 = vcombine.low %v1572_v9, %v1588_v20  ;;  %v1629_v59 = vcombine.high %v1572_v9, %v1588_v20  ;;  %v1644_v60 = vcombine.low %v1579_v29, %v1595_v31  ;;  %v1645_v2 = vcombine.high %v1579_v29, %v1595_v31 }
 0x22c   :  { %v6622_v20 = vmov 0  }
 0x22d   :  { %v1636_v51 = vrot.slane %v1628_v1, %v6870_v40  ;;  %v1643_v52 = vrot.slane %v1629_v59, %v6870_v40  ;;  %v1652_v6 = vrot.slane %v1644_v60, %v6870_v40  ;;  %v1659_v32 = vrot.slane %v1645_v2, %v6870_v40  ;;  %6364 = vset.pattern.permute.xlu1 %v6622_v20 }
 0x22e   :  { %6365 = vset.pattern.permute.xlu0 %v6622_v20  ;;  %v7445_v20 = vld [vmem:[#allocation3 + $0x20] sm:$0xff] }
 0x22f   :  { %v5954_v34 = vcombine.low %v1636_v51, %v1643_v52  ;;  %v5956_v47 = vcombine.high %v1636_v51, %v1643_v52  ;;  %v5958_v35 = vcombine.low %v1652_v6, %v1659_v32  ;;  %v5960_v55 = vcombine.high %v1652_v6, %v1659_v32 }
 0x231   :  { %v1844_v39 = vrot.slane %v5954_v34, %v6863_v33  ;;  %v1860_v15 = vrot.slane %v5956_v47, %v6863_v33  ;;  %v1876_v41 = vrot.slane %v5958_v35, %v6863_v33  ;;  %v1892_v42 = vrot.slane %v5960_v55, %v6863_v33 }
 0x233   :  { %v1900_v25 = vcombine.low %v1844_v39, %v1860_v15  ;;  %v1932_v26 = vcombine.low %v1876_v41, %v1892_v42  ;;  %v1901_v27 = vcombine.high %v1844_v39, %v1860_v15  ;;  %v1933_v28 = vcombine.high %v1876_v41, %v1892_v42 }
 0x235   :  { %v1908_v43 = vrot.slane %v1900_v25, %v6870_v40  ;;  %v1940_v48 = vrot.slane %v1932_v26, %v6870_v40  ;;  %v7263_v53 = vrot.slane %v1901_v27, %v6870_v40  ;;  %v7266_v30 = vrot.slane %v1933_v28, %v6870_v40 }
 0x237   :  { %v1964_v56 = vcombine.low %v1908_v43, %v1940_v48  ;;  %v1965_v58 = vcombine.high %v1908_v43, %v1940_v48 }
 0x239   :  { %6222 = vmatpush3.msra.mxu0 %v1964_v56  ;;  %6227 = vmatpush3.msra.mxu1 %v1965_v58 }
 0x23a   :  { %6231 = vmatprep.subr.mxu0 %v8019_v21  ;;  %6236 = vmatprep.subr.mxu1 %v8019_v21 }
 0x2a9   :  { %v7322_v0 = vpop.f32.mrb[2].mxu1 }
 0x2aa   :  { %v6145_v3 = vpop.f32.mrb[3].mxu1  ;;  %v3358_v4 = vsel %vm3357_vm4, %v7322_v0, -inf }
 0x2ab   :  { %v7326_v49 = vpop.f32.mrb[2].mxu0  ;;  %3359 = vmax.xlane.f32.xlu0 %v3358_v4 }
 0x2ac   :  { %v6155_v50 = vpop.f32.mrb[3].mxu0  ;;  %v3364_v22 = vsel %vm3357_vm4, %v7326_v49, -inf }
 0x2ae   :  { %v7328_v7 = vpop.f32.mrb[4].mxu1 }
 0x2af   :  { %v6150_v10 = vpop.f32.mrb[5].mxu1  ;;  %3365 = vmax.xlane.f32.xlu0 %v3364_v22  ;;  %v3361_v12 = vsel %vm3357_vm4, %v7328_v7, -inf }
 0x2b0   :  { %3362 = vmax.xlane.f32.xlu1 %v3361_v12  ;;  %v7407_v10 = vld [vmem:[#allocation3 + $0x10] sm:$0xff] }
 0x2b2   :  { %v7334_v13 = vpop.f32.mrb[6].mxu1 }
 0x2b3   :  { %v6160_v14 = vpop.f32.mrb[7].mxu1  ;;  %v3367_v17 = vsel %vm3357_vm4, %v7334_v13, -inf }
 0x2b4   :  { %3368 = vmax.xlane.f32.xlu0 %v3367_v17  ;;  %v7427_v17 = vld [vmem:[#allocation3 + $0x18] sm:$0xff] }
 0x2bb   :  { %v7338_v18 = vpop.f32.mrb[4].mxu0 }
 0x2bc   :  { %v7340_v8 = vpop.f32.mrb[8].mxu1  ;;  %v6165_v19 = vpop.f32.mrb[5].mxu0  ;;  %v3370_v23 = vsel %vm3357_vm4, %v7338_v18, -inf }
 0x2bd   :  { %v6170_v9 = vpop.f32.mrb[9].mxu1  ;;  %v3373_v29 = vsel %vm3357_vm4, %v7340_v8, -inf  ;;  %3371 = vmax.xlane.f32.xlu1 %v3370_v23 }
 0x2be   :  { %3374 = vmax.xlane.f32.xlu0 %v3373_v29 }
 0x2d2   :  { %v7346_v31 = vpop.f32.mrb[6].mxu0  ;;  %v7348_v1 = vpop.f32.mrb[10].mxu1 }
 0x2d3   :  { %v6175_v59 = vpop.f32.mrb[7].mxu0  ;;  %v6180_v60 = vpop.f32.mrb[11].mxu1  ;;  %v3379_v2 = vsel %vm3357_vm4, %v7348_v1, -inf  ;;  %v3376_v51 = vsel %vm3357_vm4, %v7346_v31, -inf }
 0x2d4   :  { %3380 = vmax.xlane.f32.xlu0 %v3379_v2  ;;  %3377 = vmax.xlane.f32.xlu1 %v3376_v51  ;;  %v7449_v59 = vld [vmem:[#allocation3 + $0x28] sm:$0xff] }
 0x2d6   :  { %v7354_v52 = vpop.f32.mrb[8].mxu0  ;;  %v7356_v6 = vpop.f32.mrb[12].mxu1 }
 0x2d7   :  { %v6185_v32 = vpop.f32.mrb[9].mxu0  ;;  %v6190_v34 = vpop.f32.mrb[13].mxu1  ;;  %v3385_v47 = vsel %vm3357_vm4, %v7356_v6, -inf  ;;  %v3382_v35 = vsel %vm3357_vm4, %v7354_v52, -inf }
 0x2d8   :  { %3386 = vmax.xlane.f32.xlu0 %v3385_v47  ;;  %3383 = vmax.xlane.f32.xlu1 %v3382_v35  ;;  %v7472_v32 = vld [vmem:[#allocation3 + $0x38] sm:$0xff] }
 0x2da   :  { %v7362_v55 = vpop.f32.mrb[10].mxu0  ;;  %v7364_v39 = vpop.f32.mrb[14].mxu1 }
 0x2db   :  { %v6195_v15 = vpop.f32.mrb[11].mxu0  ;;  %v6200_v41 = vpop.f32.mrb[15].mxu1  ;;  %v3391_v42 = vsel %vm3357_vm4, %v7364_v39, -inf  ;;  %v3388_v25 = vsel %vm3357_vm4, %v7362_v55, -inf }
 0x2dc   :  { %3392 = vmax.xlane.f32.xlu0 %v3391_v42  ;;  %3389 = vmax.xlane.f32.xlu1 %v3388_v25  ;;  %v7480_v41 = vld [vmem:[#allocation3 + $0x40] sm:$0xff]  ;;  %v7482_v42 = vld [vmem:[#allocation3 + $0x48] sm:$0xff] }
 0x2de   :  { %v7370_v26 = vpop.f32.mrb[12].mxu0  ;;  %v7372_v27 = vpop.f32.mrb[16].mxu1 }
 0x2df   :  { %v6205_v28 = vpop.f32.mrb[13].mxu0  ;;  %v6210_v43 = vpop.f32.mrb[17].mxu1  ;;  %v3397_v48 = vsel %vm3357_vm4, %v7372_v27, -inf  ;;  %v3394_v56 = vsel %vm3357_vm4, %v7370_v26, -inf }
 0x2e0   :  { %3398 = vmax.xlane.f32.xlu0 %v3397_v48  ;;  %3395 = vmax.xlane.f32.xlu1 %v3394_v56  ;;  %v7540_v28 = vld [vmem:[#allocation3 + $0x70] sm:$0xff] }
 0x2e1   :  { %8039 = vst [vmem:[#allocation27_spill] sm:$0xff] %v7540_v28 }
 0x2e2   :  { %v7378_v58 = vpop.f32.mrb[14].mxu0  ;;  %v7380_v63 = vpop.f32.mrb[18].mxu1 }
 0x2e3   :  { %v6215_v3 = vpop.f32.mrb[15].mxu0  ;;  %v6220_v4 = vpop.f32.mrb[19].mxu1  ;;  %v3403_v50 = vsel %vm3357_vm4, %v7380_v63, -inf  ;;  %v3400_v22 = vsel %vm3357_vm4, %v7378_v58, -inf }
 0x2e4   :  { %3404 = vmax.xlane.f32.xlu0 %v3403_v50  ;;  %3401 = vmax.xlane.f32.xlu1 %v3400_v22  ;;  %v7500_v4 = vld [vmem:[#allocation3 + $0x50] sm:$0xff]  ;;  %v7502_v50 = vld [vmem:[#allocation3 + $0x58] sm:$0xff] }
 0x2f5   :  { %1536 = vrot.lane.b32.xlu1 %v6878_v46, %s6618_s15  ;;  %v7402_v46 = vld [vmem:[#allocation3] sm:$0xff] }
 0x2f9   :  { %1544 = vrot.lane.b32.xlu1 %v6889_v57, %s6618_s15 }
 0x2fa   :  { %1532 = vrot.lane.b32.xlu0 %v6867_v36, %s6618_s15 }
 0x2fd   :  { %1522 = vrot.lane.b32.xlu1 %v6979_v5, %s6618_s15 }
 0x2fe   :  { %1540 = vrot.lane.b32.xlu0 %v6876_v45, %s6618_s15 }
 0x301   :  { %1530 = vrot.lane.b32.xlu1 %v6998_v54, %s6618_s15 }
 0x302   :  { %1518 = vrot.lane.b32.xlu0 %v6758_v16, %s6618_s15  ;;  %v7414_v16 = vld [vmem:[#allocation3 + $0x8] sm:$0xff] }
 0x306   :  { %1526 = vrot.lane.b32.xlu0 %v7010_v61, %s6618_s15 }
 0x338   :  { %v3360_v57 = vpop.xlane.xlu0 %3359 }
 0x339   :  { %v7405_v36 = vmax.f32 %v7402_v46, %v3360_v57 }
 0x33b   :  { %5023 = vst.msk [vmem:[#allocation3] sm:$0xff] %vm791_vm3, %v7405_v36  ;;  %3472 = vperm.xlu1 %6364, %v7405_v36  }
 0x33c   :  { %v3366_v5 = vpop.xlane.xlu0 %3365 }
 0x33d   :  { %v3363_v54 = vpop.xlane.xlu1 %3362  ;;  %v7417_v61 = vmax.f32 %v7407_v10, %v3366_v5 }
 0x33e   :  { %v7420_v12 = vmax.f32 %v7414_v16, %v3363_v54 }
 0x33f   :  { %5025 = vst.msk [vmem:[#allocation3 + $0x10] sm:$0xff] %vm791_vm3, %v7417_v61  ;;  %3482 = vperm.xlu1 %6364, %v7417_v61  }
 0x340   :  { %5024 = vst.msk [vmem:[#allocation3 + $0x8] sm:$0xff] %vm791_vm3, %v7420_v12  ;;  %3477 = vperm.xlu0 %6365, %v7420_v12  }
 0x341   :  { %v3369_v23 = vpop.xlane.xlu0 %3368 }
 0x342   :  { %v7435_v9 = vmax.f32 %v7427_v17, %v3369_v23 }
 0x343   :  { %1538 = vrot.lane.b32.xlu1 %v7050_v11, %s6618_s15 }
 0x344   :  { %5026 = vst.msk [vmem:[#allocation3 + $0x18] sm:$0xff] %vm791_vm3, %v7435_v9  ;;  %1534 = vrot.lane.b32.xlu0 %v7108_v38, %s6618_s15  ;;  %v7542_v38 = vld [vmem:[#allocation3 + $0x78] sm:$0xff] }
 0x345   :  { %8040 = vst [vmem:[#allocation28_spill] sm:$0xff] %v7542_v38 }
 0x347   :  { %1546 = vrot.lane.b32.xlu1 %v7102_v37, %s6618_s15 }
 0x348   :  { %1542 = vrot.lane.b32.xlu0 %v7127_v24, %s6618_s15  ;;  %v7470_v24 = vld [vmem:[#allocation3 + $0x30] sm:$0xff] }
 0x349   :  { %8032 = vst [vmem:[#allocation20_spill] sm:$0xff] %v7470_v24 }
 0x34a   :  { %v3372_v11 = vpop.xlane.xlu1 %3371 }
 0x34b   :  { %v7454_v60 = vmax.f32 %v7445_v20, %v3372_v11  ;;  %v3375_v2 = vpop.xlane.xlu0 %3374 }
 0x34c   :  { %v7457_v51 = vmax.f32 %v7449_v59, %v3375_v2  ;;  %v7520_v2 = vld [vmem:[#allocation3 + $0x60] sm:$0xff] }
 0x34d   :  { %5027 = vst.msk [vmem:[#allocation3 + $0x20] sm:$0xff] %vm791_vm3, %v7454_v60  ;;  %3492 = vperm.xlu1 %6364, %v7454_v60   ;;  %8035 = vst [vmem:[#allocation23_spill] sm:$0xff] %v7520_v2 }
 0x34e   :  { %5028 = vst.msk [vmem:[#allocation3 + $0x28] sm:$0xff] %vm791_vm3, %v7457_v51 }
 0x351   :  { %3487 = vperm.xlu1 %6364, %v7435_v9  }
 0x355   :  { %3497 = vperm.xlu1 %6364, %v7457_v51  }
 0x361   :  { %v3378_v34 = vpop.xlane.xlu1 %3377  ;;  %v3381_v47 = vpop.xlane.xlu0 %3380 }
 0x362   :  { %v7475_v35 = vmax.f32 %v7470_v24, %v3378_v34  ;;  %v7478_v15 = vmax.f32 %v7472_v32, %v3381_v47  ;;  %v7522_v34 = vld [vmem:[#allocation3 + $0x68] sm:$0xff] }
 0x363   :  { %8036 = vst [vmem:[#allocation24_spill] sm:$0xff] %v7522_v34 }
 0x364   :  { %8033 = vst [vmem:[#allocation21_spill] sm:$0xff] %v7475_v35  ;;  %8034 = vst [vmem:[#allocation22_spill] sm:$0xff] %v7478_v15  ;;  %3502 = vperm.xlu0 %6365, %v7475_v35   ;;  %3507 = vperm.xlu1 %6364, %v7478_v15  }
 0x365   :  { %5029 = vst.msk [vmem:[#allocation3 + $0x30] sm:$0xff] %vm791_vm3, %v7475_v35  ;;  %5030 = vst.msk [vmem:[#allocation3 + $0x38] sm:$0xff] %vm791_vm3, %v7478_v15  ;;  %v3384_v43 = vpop.xlane.xlu1 %3383  ;;  %v3387_v48 = vpop.xlane.xlu0 %3386 }
 0x366   :  { %v7495_v56 = vmax.f32 %v7480_v41, %v3384_v43  ;;  %v7498_v3 = vmax.f32 %v7482_v42, %v3387_v48 }
 0x368   :  { %5031 = vst.msk [vmem:[#allocation3 + $0x40] sm:$0xff] %vm791_vm3, %v7495_v56  ;;  %5032 = vst.msk [vmem:[#allocation3 + $0x48] sm:$0xff] %vm791_vm3, %v7498_v3  ;;  %3512 = vperm.xlu0 %6365, %v7495_v56   ;;  %3517 = vperm.xlu1 %6364, %v7498_v3  }
 0x369   :  { %v3390_v5 = vpop.xlane.xlu1 %3389  ;;  %v3393_v54 = vpop.xlane.xlu0 %3392 }
 0x36a   :  { %v7515_v23 = vmax.f32 %v7500_v4, %v3390_v5  ;;  %v7518_v11 = vmax.f32 %v7502_v50, %v3393_v54 }
 0x36c   :  { %5033 = vst.msk [vmem:[#allocation3 + $0x50] sm:$0xff] %vm791_vm3, %v7515_v23  ;;  %5034 = vst.msk [vmem:[#allocation3 + $0x58] sm:$0xff] %vm791_vm3, %v7518_v11  ;;  %3522 = vperm.xlu0 %6365, %v7515_v23   ;;  %3527 = vperm.xlu1 %6364, %v7518_v11  }
 0x36d   :  { %v3396_v48 = vpop.xlane.xlu1 %3395  ;;  %v3399_v5 = vpop.xlane.xlu0 %3398 }
 0x36e   :  { %v7535_v54 = vmax.f32 %v7520_v2, %v3396_v48  ;;  %v7538_v25 = vmax.f32 %v7522_v34, %v3399_v5 }
 0x370   :  { %8037 = vst [vmem:[#allocation25_spill] sm:$0xff] %v7535_v54  ;;  %8038 = vst [vmem:[#allocation26_spill] sm:$0xff] %v7538_v25  ;;  %3532 = vperm.xlu0 %6365, %v7535_v54   ;;  %3537 = vperm.xlu1 %6364, %v7538_v25  }
 0x371   :  { %5035 = vst.msk [vmem:[#allocation3 + $0x60] sm:$0xff] %vm791_vm3, %v7535_v54  ;;  %5036 = vst.msk [vmem:[#allocation3 + $0x68] sm:$0xff] %vm791_vm3, %v7538_v25  ;;  %v3402_v48 = vpop.xlane.xlu1 %3401  ;;  %v3405_v5 = vpop.xlane.xlu0 %3404 }
 0x372   :  { %v7555_v43 = vmax.f32 %v7540_v28, %v3402_v48  ;;  %v7558_v37 = vmax.f32 %v7542_v38, %v3405_v5 }
 0x374   :  { %8041 = vst [vmem:[#allocation29_spill] sm:$0xff] %v7555_v43  ;;  %8042 = vst [vmem:[#allocation30_spill] sm:$0xff] %v7558_v37  ;;  %3542 = vperm.xlu0 %6365, %v7555_v43   ;;  %3547 = vperm.xlu1 %6364, %v7558_v37  }
 0x375   :  { %5037 = vst.msk [vmem:[#allocation3 + $0x70] sm:$0xff] %vm791_vm3, %v7555_v43  ;;  %5038 = vst.msk [vmem:[#allocation3 + $0x78] sm:$0xff] %vm791_vm3, %v7558_v37  ;;  %v1537_v48 = vpop.permute.xlu1 %1536  ;;  %v1533_v57 = vpop.permute.xlu0 %1532 }
 0x379   :  { %v1545_v5 = vpop.permute.xlu1 %1544  ;;  %v1541_v19 = vpop.permute.xlu0 %1540 }
 0x37a   :  { %v1612_v29 = vcombine.low %v1537_v48, %v1545_v5  ;;  %v1596_v14 = vcombine.low %v1533_v57, %v1541_v19  ;;  %v1613_v22 = vcombine.high %v1537_v48, %v1545_v5  ;;  %v1597_v45 = vcombine.high %v1533_v57, %v1541_v19 }
 0x37c   :  { %v1620_v62 = vrot.slane %v1612_v29, %v6863_v33  ;;  %v1604_v21 = vrot.slane %v1596_v14, %v6863_v33  ;;  %v1627_v44 = vrot.slane %v1613_v22, %v6863_v33  ;;  %v1611_v43 = vrot.slane %v1597_v45, %v6863_v33 }
 0x37d   :  { %v7572_v47 = vpop.permute.xlu1 %1522  ;;  %v1519_v2 = vpop.permute.xlu0 %1518 }
 0x37e   :  { %v1660_v28 = vcombine.low %v1604_v21, %v1620_v62  ;;  %v1661_v37 = vcombine.high %v1604_v21, %v1620_v62  ;;  %v1676_v38 = vcombine.low %v1611_v43, %v1627_v44  ;;  %v1677_v54 = vcombine.high %v1611_v43, %v1627_v44 }
 0x380   :  { %v1668_v34 = vrot.slane %v1660_v28, %v6870_v40  ;;  %v1675_v19 = vrot.slane %v1661_v37, %v6870_v40  ;;  %v1684_v29 = vrot.slane %v1676_v38, %v6870_v40  ;;  %v1691_v14 = vrot.slane %v1677_v54, %v6870_v40 }
 0x381   :  { %v1531_v25 = vpop.permute.xlu1 %1530  ;;  %v1527_v48 = vpop.permute.xlu0 %1526 }
 0x382   :  { %v5955_v5 = vcombine.low %v1668_v34, %v1675_v19  ;;  %v5957_v45 = vcombine.high %v1668_v34, %v1675_v19  ;;  %v5959_v35 = vcombine.low %v1684_v29, %v1691_v14  ;;  %v5961_v21 = vcombine.high %v1684_v29, %v1691_v14 }
 0x384   :  { %v7583_v37 = vrot.slane %v5955_v5, %v6863_v33  ;;  %v7587_v54 = vrot.slane %v5957_v45, %v6863_v33  ;;  %v7593_v34 = vrot.slane %v5961_v21, %v6863_v33  ;;  %v8043_v21 = vcombine.low %v7263_v53, %v7266_v30 }
 0x3ba   :  { %v3473_v57 = vpop.permute.xlu1 %3472 }
 0x3bb   :  { %v3550_v22 = vsub.f32 %v7322_v0, %v3473_v57  ;;  %v7590_v0 = vrot.slane %v5959_v35, %v6863_v33 }
 0x3bd   :  { %v3566_v62 = vmul.f32 1.442695, %v3550_v22 }
 0x3be   :  { %v3483_v44 = vpop.permute.xlu1 %3482 }
 0x3bf   :  { %6366 = vpow2.f32 %v3566_v62  ;;  %v3552_v43 = vsub.f32 %v7326_v49, %v3483_v44  ;;  %v3478_v28 = vpop.permute.xlu0 %3477  ;;  %v1916_v49 = vcombine.low %v7583_v37, %v7587_v54  ;;  %v1716_v44 = vcombine.low %v7572_v47, %v1531_v25 }
 0x3c0   :  { %v3551_v38 = vsub.f32 %v7328_v7, %v3478_v28  ;;  %v1948_v7 = vcombine.low %v7590_v0, %v7593_v34  ;;  %v8044_v28 = vmov 0.0  }
 0x3c1   :  { %v3570_v19 = vmul.f32 1.442695, %v3552_v43  ;;  %v7604_v35 = vrot.slane %v1916_v49, %v6870_v40  ;;  %v1700_v43 = vcombine.low %v1519_v2, %v1527_v48 }
 0x3c2   :  { %v3568_v29 = vmul.f32 1.442695, %v3551_v38  ;;  %v7595_v14 = vpop.permute.xlu1 %1538  ;;  %v7607_v5 = vrot.slane %v1948_v7, %v6870_v40 }
 0x3c3   :  { %6368 = vpow2.f32 %v3570_v19  ;;  %v1717_v19 = vcombine.high %v7572_v47, %v1531_v25  ;;  %v1535_v49 = vpop.permute.xlu0 %1534  ;;  %v8045_v47 = vcombine.high %v7263_v53, %v7266_v30  ;;  %v1917_v53 = vcombine.high %v7583_v37, %v7587_v54 }
 0x3c4   :  { %6370 = vpow2.f32 %v3568_v29  ;;  %v1701_v29 = vcombine.high %v1519_v2, %v1527_v48  ;;  %v1724_v2 = vrot.slane %v1716_v44, %v6863_v33  ;;  %v1949_v30 = vcombine.high %v7590_v0, %v7593_v34 }
 0x3c5   :  { %v1731_v48 = vrot.slane %v1717_v19, %v6863_v33  ;;  %v1931_v34 = vrot.slane %v1917_v53, %v6870_v40 }
 0x3c6   :  { %v7601_v57 = vpop.permute.xlu1 %1546 }
 0x3c7   :  { %v1749_v54 = vcombine.high %v7595_v14, %v7601_v57 }
 0x3c9   :  { %v6367_v22 = vpop.eup %6366 }
 0x3ca   :  { %6224 = vmatmul.mubr.msk.f32.vlgmr.msra.gmra.mrb[16].mxu0 %vm3357_vm4, %v6367_v22  ;;  %v3630_v45 = vsel %vm3357_vm4, %v6367_v22, 0.0  ;;  %v1968_v22 = vcombine.low %v7604_v35, %v7607_v5 }
 0x3cb   :  { %6232 = vmatpush3.msra.mxu0 %v8043_v21  ;;  %3631 = vadd.xlane.f32.xlu0 %v3630_v45 }
 0x3cc   :  { %v3493_v62 = vpop.permute.xlu1 %3492  ;;  %6233 = vmatprep.mubr.msk.f32.mxu0 %vm6617_vm2, %v8044_v28  ;;  %6241 = vmatprep.subr.mxu0 %v8044_v28 }
 0x3cd   :  { %v6369_v38 = vpop.eup %6368  ;;  %v3554_v7 = vsub.f32 %v7338_v18, %v3493_v62  ;;  %v1708_v18 = vrot.slane %v1700_v43, %v6863_v33  ;;  %v1715_v62 = vrot.slane %v1701_v29, %v6863_v33  ;;  %v1748_v29 = vcombine.low %v7595_v14, %v7601_v57 }
 0x3ce   :  { %v6371_v21 = vpop.eup %6370  ;;  %6234 = vmatmul.mubr.msk.f32.vlgmr.msra.gmra.mrb[18].mxu0 %vm3357_vm4, %v6369_v38  ;;  %v3636_v15 = vsel %vm3357_vm4, %v6369_v38, 0.0  ;;  %v1543_v38 = vpop.permute.xlu0 %1542  ;;  %v1763_v14 = vrot.slane %v1749_v54, %v6863_v33 }
 0x3cf   :  { %v3574_v45 = vmul.f32 1.442695, %v3554_v7  ;;  %6229 = vmatmul.mubr.msk.f32.vlgmr.msra.gmra.mrb[20].mxu1 %vm3357_vm4, %v6371_v21  ;;  %6242 = vmatpush3.msra.mxu0 %v1968_v22  ;;  %v3633_v25 = vsel %vm3357_vm4, %v6371_v21, 0.0  ;;  %v1780_v43 = vcombine.low %v1715_v62, %v1731_v48  ;;  %v1781_v19 = vcombine.high %v1715_v62, %v1731_v48 }
 0x3d0   :  { %v3488_v24 = vpop.permute.xlu1 %3487  ;;  %6237 = vmatpush3.msra.mxu1 %v8045_v47  ;;  %3637 = vadd.xlane.f32.xlu0 %v3636_v15  ;;  %v1732_v21 = vcombine.low %v1535_v49, %v1543_v38  ;;  %v1733_v0 = vcombine.high %v1535_v49, %v1543_v38  ;;  %v1756_v47 = vrot.slane %v1748_v29, %v6863_v33 }
 0x3d1   :  { %6372 = vpow2.f32 %v3574_v45  ;;  %v3553_v7 = vsub.f32 %v7334_v13, %v3488_v24  ;;  %3634 = vadd.xlane.f32.xlu1 %v3633_v25  ;;  %6243 = vmatprep.mubr.msk.f32.mxu0 %vm6617_vm2, %v8044_v28  ;;  %v1764_v13 = vcombine.low %v1708_v18, %v1724_v2  ;;  %v1765_v24 = vcombine.high %v1708_v18, %v1724_v2 }
 0x3d2   :  { %6251 = vmatprep.subr.mxu0 %v8044_v28  ;;  %6238 = vmatprep.mubr.msk.f32.mxu1 %vm6617_vm2, %v8044_v28  ;;  %v1963_v45 = vrot.slane %v1949_v30, %v6870_v40  ;;  %v1788_v2 = vrot.slane %v1780_v43, %v6870_v40  ;;  %v1795_v18 = vrot.slane %v1781_v19, %v6870_v40 }
 0x3d3   :  { %v3572_v44 = vmul.f32 1.442695, %v3553_v7  ;;  %6246 = vmatprep.subr.mxu1 %v8044_v28  ;;  %v1779_v25 = vrot.slane %v1765_v24, %v6870_v40  ;;  %v1740_v48 = vrot.slane %v1732_v21, %v6863_v33  ;;  %v1747_v57 = vrot.slane %v1733_v0, %v6863_v33 }
 0x3d4   :  { %v3498_v22 = vpop.permute.xlu1 %3497  ;;  %v1970_v49 = vcombine.low %v1931_v34, %v1963_v45  ;;  %v5968_v53 = vcombine.high %v1788_v2, %v1795_v18  ;;  %v1969_v19 = vcombine.high %v7604_v35, %v7607_v5 }
 0x3d5   :  { %v3555_v15 = vsub.f32 %v7340_v8, %v3498_v22  ;;  %6374 = vpow2.f32 %v3572_v44  ;;  %v1772_v8 = vrot.slane %v1764_v13, %v6870_v40  ;;  %v5966_v22 = vcombine.low %v1788_v2, %v1795_v18 }
 0x3d6   :  { %v1796_v30 = vcombine.low %v1740_v48, %v1756_v47  ;;  %v1797_v24 = vcombine.high %v1740_v48, %v1756_v47  ;;  %v1813_v43 = vcombine.high %v1747_v57, %v1763_v14 }
 0x3d7   :  { %v3576_v37 = vmul.f32 1.442695, %v3555_v15  ;;  %v5962_v7 = vcombine.low %v1772_v8, %v1779_v25  ;;  %v5964_v44 = vcombine.high %v1772_v8, %v1779_v25  ;;  %v1812_v15 = vcombine.low %v1747_v57, %v1763_v14 }
 0x3d8   :  { %v2012_v0 = vrot.slane %v5966_v22, %v6863_v33  ;;  %v2028_v8 = vrot.slane %v5968_v53, %v6863_v33  ;;  %v1804_v35 = vrot.slane %v1796_v30, %v6870_v40  ;;  %v1827_v48 = vrot.slane %v1813_v43, %v6870_v40 }
 0x3d9   :  { %6376 = vpow2.f32 %v3576_v37  ;;  %v1980_v29 = vrot.slane %v5962_v7, %v6863_v33  ;;  %v1971_v37 = vcombine.high %v1931_v34, %v1963_v45  ;;  %v1996_v54 = vrot.slane %v5964_v44, %v6863_v33 }
 0x3da   :  { %v1811_v34 = vrot.slane %v1797_v24, %v6870_v40  ;;  %v1820_v45 = vrot.slane %v1812_v15, %v6870_v40  ;;  %v2068_v44 = vcombine.low %v2012_v0, %v2028_v8 }
 0x3db   :  { %v6373_v62 = vpop.eup %6372 }
 0x3dc   :  { %6244 = vmatmul.mubr.msk.f32.vlgmr.msra.gmra.mrb[20].mxu0 %vm3357_vm4, %v6373_v62  ;;  %v3642_v38 = vsel %vm3357_vm4, %v6373_v62, 0.0  ;;  %v5963_v22 = vcombine.low %v1804_v35, %v1811_v34  ;;  %v5965_v53 = vcombine.high %v1804_v35, %v1811_v34  ;;  %v5967_v30 = vcombine.low %v1820_v45, %v1827_v48 }
 0x3dd   :  { %6252 = vmatpush3.msra.mxu0 %v1970_v49  ;;  %3643 = vadd.xlane.f32.xlu1 %v3642_v38 }
 0x3de   :  { %6253 = vmatprep.mubr.msk.f32.mxu0 %vm6617_vm2, %v8044_v28  ;;  %6261 = vmatprep.subr.mxu0 %v8044_v28  ;;  %v2019_v35 = vrot.slane %v5967_v30, %v6863_v33 }
 0x3df   :  { %v6375_v13 = vpop.eup %6374 }
 0x3e0   :  { %6239 = vmatmul.mubr.msk.f32.vlgmr.msra.gmra.mrb[22].mxu1 %vm3357_vm4, %v6375_v13  ;;  %v3639_v21 = vsel %vm3357_vm4, %v6375_v13, 0.0  ;;  %v5969_v13 = vcombine.high %v1820_v45, %v1827_v48 }
 0x3e1   :  { %6247 = vmatpush3.msra.mxu1 %v1969_v19  ;;  %3640 = vadd.xlane.f32.xlu0 %v3639_v21  ;;  %v2037_v21 = vcombine.high %v1980_v29, %v1996_v54 }
 0x3e2   :  { %6248 = vmatprep.mubr.msk.f32.mxu1 %vm6617_vm2, %v8044_v28  ;;  %6256 = vmatprep.subr.mxu1 %v8044_v28 }
 0x3e3   :  { %v3503_v25 = vpop.permute.xlu0 %3502  ;;  %v3508_v2 = vpop.permute.xlu1 %3507 }
 0x3e4   :  { %v6377_v18 = vpop.eup %6376  ;;  %v3556_v5 = vsub.f32 %v7346_v31, %v3503_v25  ;;  %v3557_v47 = vsub.f32 %v7348_v1, %v3508_v2  ;;  %v2036_v1 = vcombine.low %v1980_v29, %v1996_v54  ;;  %v1987_v2 = vrot.slane %v5963_v22, %v6863_v33 }
 0x3e5   :  { %v3645_v62 = vsel %vm3357_vm4, %v6377_v18, 0.0  ;;  %6249 = vmatmul.mubr.msk.f32.vlgmr.msra.gmra.mrb[24].mxu1 %vm3357_vm4, %v6377_v18  ;;  %v2003_v18 = vrot.slane %v5965_v53, %v6863_v33 }
 0x3e6   :  { %v3578_v14 = vmul.f32 1.442695, %v3556_v5  ;;  %v3580_v57 = vmul.f32 1.442695, %v3557_v47  ;;  %6257 = vmatpush3.msra.mxu1 %v1971_v37  ;;  %3646 = vadd.xlane.f32.xlu0 %v3645_v62  ;;  %v2069_v37 = vcombine.high %v2012_v0, %v2028_v8  ;;  %v2044_v25 = vrot.slane %v2036_v1, %v6870_v40 }
 0x3e7   :  { %v3513_v31 = vpop.permute.xlu0 %3512  ;;  %v3518_v49 = vpop.permute.xlu1 %3517  ;;  %6258 = vmatprep.mubr.msk.f32.mxu1 %vm6617_vm2, %v8044_v28  ;;  %6266 = vmatprep.subr.mxu1 %v8044_v28  ;;  %v2076_v5 = vrot.slane %v2068_v44, %v6870_v40  ;;  %v2035_v47 = vrot.slane %v5969_v13, %v6863_v33  ;;  %v2052_v62 = vcombine.low %v1987_v2, %v2003_v18 }
 0x3e8   :  { %6378 = vpow2.f32 %v3578_v14  ;;  %v3558_v7 = vsub.f32 %v7354_v52, %v3513_v31  ;;  %v3559_v38 = vsub.f32 %v7356_v6, %v3518_v49 }
 0x3e9   :  { %6380 = vpow2.f32 %v3580_v57  ;;  %v2100_v48 = vcombine.low %v2044_v25, %v2076_v5  ;;  %v2084_v49 = vcombine.low %v2019_v35, %v2035_v47  ;;  %v2060_v13 = vrot.slane %v2052_v62, %v6870_v40 }
 0x3ea   :  { %v3582_v24 = vmul.f32 1.442695, %v3558_v7  ;;  %v3584_v15 = vmul.f32 1.442695, %v3559_v38 }
 0x3eb   :  { %v3523_v43 = vpop.permute.xlu0 %3522  ;;  %v3528_v19 = vpop.permute.xlu1 %3527 }
 0x3ec   :  { %6382 = vpow2.f32 %v3582_v24  ;;  %v3560_v52 = vsub.f32 %v7362_v55, %v3523_v43  ;;  %v3561_v6 = vsub.f32 %v7364_v39, %v3528_v19  ;;  %v7697_v55 = vrot.slane %v2037_v21, %v6870_v40 }
 0x3ed   :  { %6384 = vpow2.f32 %v3584_v15  ;;  %v7700_v39 = vrot.slane %v2069_v37, %v6870_v40  ;;  %v2053_v24 = vcombine.high %v1987_v2, %v2003_v18  ;;  %v2085_v15 = vcombine.high %v2019_v35, %v2035_v47 }
 0x3ee   :  { %v3586_v34 = vmul.f32 1.442695, %v3560_v52  ;;  %v3588_v29 = vmul.f32 1.442695, %v3561_v6 }
 0x3ef   :  { %v3533_v54 = vpop.permute.xlu0 %3532  ;;  %v3538_v0 = vpop.permute.xlu1 %3537  ;;  %v2102_v44 = vcombine.low %v7697_v55, %v7700_v39  ;;  %v2099_v2 = vrot.slane %v2085_v15, %v6870_v40  ;;  %v2103_v47 = vcombine.high %v7697_v55, %v7700_v39 }
 0x3f0   :  { %6386 = vpow2.f32 %v3586_v34  ;;  %v3562_v8 = vsub.f32 %v7370_v26, %v3533_v54  ;;  %v3563_v45 = vsub.f32 %v7372_v27, %v3538_v0  ;;  %v2101_v26 = vcombine.high %v2044_v25, %v2076_v5 }
 0x3f1   :  { %6388 = vpow2.f32 %v3588_v29  ;;  %v2067_v25 = vrot.slane %v2053_v24, %v6870_v40 }
 0x3f2   :  { %v6379_v14 = vpop.eup %6378  ;;  %v3590_v57 = vmul.f32 1.442695, %v3562_v8  ;;  %v3592_v31 = vmul.f32 1.442695, %v3563_v45 }
 0x3f3   :  { %v6381_v1 = vpop.eup %6380  ;;  %v3543_v7 = vpop.permute.xlu0 %3542  ;;  %6254 = vmatmul.mubr.msk.f32.vlgmr.msra.gmra.mrb[22].mxu0 %vm3357_vm4, %v6379_v14  ;;  %v3648_v38 = vsel %vm3357_vm4, %v6379_v14, 0.0  ;;  %v2106_v29 = vcombine.low %v2067_v25, %v2099_v2  ;;  %v2107_v14 = vcombine.high %v2067_v25, %v2099_v2 }
 0x3f4   :  { %v3548_v22 = vpop.permute.xlu1 %3547  ;;  %6390 = vpow2.f32 %v3590_v57  ;;  %v3564_v27 = vsub.f32 %v7378_v58, %v3543_v7  ;;  %6262 = vmatpush3.msra.mxu0 %v2100_v48  ;;  %3649 = vadd.xlane.f32.xlu1 %v3648_v38  ;;  %v3651_v30 = vsel %vm3357_vm4, %v6381_v1, 0.0  ;;  %v2092_v58 = vrot.slane %v2084_v49, %v6870_v40 }
 0x3f5   :  { %v3565_v53 = vsub.f32 %v7380_v63, %v3548_v22  ;;  %6263 = vmatprep.mubr.msk.f32.mxu0 %vm6617_vm2, %v8044_v28  ;;  %6271 = vmatprep.subr.mxu0 %v8044_v28  ;;  %6392 = vpow2.f32 %v3592_v31  ;;  %v8046_v57 = vsub.f32 %v7402_v46, %v7405_v36  ;;  %v8048_v46 = vsub.f32 %v7427_v17, %v7435_v9 }
 0x3f6   :  { %v6383_v43 = vpop.eup %6382  ;;  %v3594_v19 = vmul.f32 1.442695, %v3564_v27  ;;  %6259 = vmatmul.mubr.msk.f32.vlgmr.msra.gmra.mrb[26].mxu1 %vm3357_vm4, %v6381_v1  ;;  %3652 = vadd.xlane.f32.xlu0 %v3651_v30  ;;  %v2104_v6 = vcombine.low %v2060_v13, %v2092_v58  ;;  %v2105_v55 = vcombine.high %v2060_v13, %v2092_v58  ;;  %v8047_v1 = vsub.f32 %v7407_v10, %v7417_v61  ;;  %v8065_v58 = vld [vmem:[#allocation25_spill] sm:$0xff] }
 0x3f7   :  { %v3596_v21 = vmul.f32 1.442695, %v3565_v53  ;;  %6264 = vmatmul.mubr.msk.f32.vlgmr.msra.gmra.mrb[24].mxu0 %vm3357_vm4, %v6383_v43  ;;  %v3654_v63 = vsel %vm3357_vm4, %v6383_v43, 0.0  ;;  %6267 = vmatpush3.msra.mxu1 %v2101_v26  ;;  %v6385_v37 = vpop.eup %6384  ;;  %v3438_v31 = vmul.f32 1.442695, %v8046_v57  ;;  %v8049_v38 = vsub.f32 %v7414_v16, %v7420_v12 }
 0x3f8   :  { %6394 = vpow2.f32 %v3594_v19  ;;  %6272 = vmatpush3.msra.mxu0 %v2102_v44  ;;  %3655 = vadd.xlane.f32.xlu1 %v3654_v63  ;;  %v3657_v35 = vsel %vm3357_vm4, %v6385_v37, 0.0  ;;  %v3442_v7 = vmul.f32 1.442695, %v8047_v1  ;;  %v3444_v36 = vmul.f32 1.442695, %v8048_v46  ;;  %v3600_v1 = vld [vmem:[#allocation4 + $0x10] sm:$0xff] }
 0x3f9   :  { %6273 = vmatprep.mubr.msk.f32.mxu0 %vm6617_vm2, %v8044_v28  ;;  %6281 = vmatprep.subr.mxu0 %v8044_v28  ;;  %6396 = vpow2.f32 %v3596_v21  ;;  %v3440_v44 = vmul.f32 1.442695, %v8049_v38  ;;  %v8051_v10 = vsub.f32 %v7480_v41, %v7495_v56  ;;  %v8052_v17 = vsub.f32 %v7502_v50, %v7518_v11  ;;  %v8056_v50 = vld [vmem:[#allocation22_spill] sm:$0xff]  ;;  %v8064_v21 = vld [vmem:[#allocation23_spill] sm:$0xff] }
 0x3fa   :  { %v6387_v52 = vpop.eup %6386  ;;  %6268 = vmatprep.mubr.msk.f32.mxu1 %vm6617_vm2, %v8044_v28  ;;  %6276 = vmatprep.subr.mxu1 %v8044_v28  ;;  %6398 = vpow2.f32 %v3438_v31  ;;  %v8053_v16 = vsub.f32 %v7500_v4, %v7515_v23  ;;  %v8055_v56 = vsub.f32 %v7445_v20, %v7454_v60  ;;  %v8057_v4 = vsub.f32 %v7472_v32, %v8056_v50  ;;  %v8061_v20 = vld [vmem:[#allocation24_spill] sm:$0xff]  ;;  %v8062_v60 = vld [vmem:[#allocation26_spill] sm:$0xff] }
 0x3fb   :  { %6274 = vmatmul.mubr.msk.f32.vlgmr.msra.gmra.mrb[26].mxu0 %vm3357_vm4, %v6387_v52  ;;  %v3660_v18 = vsel %vm3357_vm4, %v6387_v52, 0.0  ;;  %6269 = vmatmul.mubr.msk.f32.vlgmr.msra.gmra.mrb[28].mxu1 %vm3357_vm4, %v6385_v37  ;;  %v6389_v5 = vpop.eup %6388  ;;  %6400 = vpow2.f32 %v3442_v7  ;;  %v3454_v61 = vmul.f32 1.442695, %v8051_v10  ;;  %v3460_v9 = vmul.f32 1.442695, %v8052_v17  ;;  %v8067_v52 = vld [vmem:[#allocation28_spill] sm:$0xff] }
 0x3fc   :  { %6282 = vmatpush3.msra.mxu0 %v2104_v6  ;;  %3661 = vadd.xlane.f32.xlu1 %v3660_v18  ;;  %v3663_v0 = vsel %vm3357_vm4, %v6389_v5, 0.0  ;;  %6402 = vpow2.f32 %v3444_v36  ;;  %v3458_v12 = vmul.f32 1.442695, %v8053_v16  ;;  %v3446_v53 = vmul.f32 1.442695, %v8055_v56  ;;  %v8068_v6 = vld [vmem:[#allocation30_spill] sm:$0xff] }
 0x3fd   :  { %6283 = vmatprep.mubr.msk.f32.mxu0 %vm6617_vm2, %v8044_v28  ;;  %6291 = vmatprep.subr.mxu0 %v8044_v28  ;;  %6404 = vpow2.f32 %v3440_v44  ;;  %v3452_v23 = vmul.f32 1.442695, %v8057_v4  ;;  %v8063_v15 = vsub.f32 %v8061_v20, %v8062_v60  ;;  %v8066_v63 = vsub.f32 %v8064_v21, %v8065_v58  ;;  %v3602_v10 = vld [vmem:[#allocation4 + $0x20] sm:$0xff]  ;;  %v3601_v16 = vld [vmem:[#allocation4 + $0x18] sm:$0xff]  ;;  %v3603_v56 = vld [vmem:[#allocation4 + $0x28] sm:$0xff] }
 0x3fe   :  { %v6391_v34 = vpop.eup %6390  ;;  %6277 = vmatpush3.msra.mxu1 %v2103_v47  ;;  %3658 = vadd.xlane.f32.xlu0 %v3657_v35  ;;  %v8069_v25 = vsub.f32 %v8067_v52, %v8068_v6  ;;  %v8071_v47 = vld [vmem:[#allocation29_spill] sm:$0xff]  ;;  %v3606_v21 = vld [vmem:[#allocation4 + $0x40] sm:$0xff] }
 0x3ff   :  { %6284 = vmatmul.mubr.msk.f32.vlgmr.msra.gmra.mrb[28].mxu0 %vm3357_vm4, %v6391_v34  ;;  %v3666_v54 = vsel %vm3357_vm4, %v6391_v34, 0.0  ;;  %6278 = vmatprep.mubr.msk.f32.mxu1 %vm6617_vm2, %v8044_v28  ;;  %v6393_v8 = vpop.eup %6392  ;;  %v3464_v43 = vmul.f32 1.442695, %v8063_v15  ;;  %v3462_v37 = vmul.f32 1.442695, %v8066_v63  ;;  %v3605_v20 = vld [vmem:[#allocation4 + $0x38] sm:$0xff] }
 0x400   :  { %6292 = vmatpush3.msra.mxu0 %v2106_v29  ;;  %3667 = vadd.xlane.f32.xlu1 %v3666_v54  ;;  %v3669_v48 = vsel %vm3357_vm4, %v6393_v8, 0.0  ;;  %v3468_v2 = vmul.f32 1.442695, %v8069_v25 }
 0x401   :  { %6286 = vmatprep.subr.mxu1 %v8044_v28  ;;  %6293 = vmatprep.mubr.msk.f32.mxu0 %vm6617_vm2, %v8044_v28 }
 0x402   :  { %v6395_v39 = vpop.eup %6394  ;;  %6279 = vmatmul.mubr.msk.f32.vlgmr.msra.gmra.mrb[30].mxu1 %vm3357_vm4, %v6389_v5  ;;  %3664 = vadd.xlane.f32.xlu0 %v3663_v0  ;;  %v8070_v5 = vld [vmem:[#allocation27_spill] sm:$0xff] }
 0x403   :  { %6287 = vmatpush3.msra.mxu1 %v2105_v55  ;;  %6294 = vmatmul.mubr.msk.f32.vlgmr.msra.gmra.mrb[30].mxu0 %vm3357_vm4, %v6395_v39  ;;  %v3672_v45 = vsel %vm3357_vm4, %v6395_v39, 0.0  ;;  %v6397_v62 = vpop.eup %6396  ;;  %v8072_v34 = vsub.f32 %v8070_v5, %v8071_v47  ;;  %v3607_v47 = vld [vmem:[#allocation4 + $0x48] sm:$0xff] }
 0x404   :  { %3673 = vadd.xlane.f32.xlu1 %v3672_v45  ;;  %6288 = vmatprep.mubr.msk.f32.mxu1 %vm6617_vm2, %v8044_v28  ;;  %v3675_v49 = vsel %vm3357_vm4, %v6397_v62, 0.0  ;;  %v6399_v26 = vpop.eup %6398 }
 0x405   :  { %6296 = vmatprep.subr.mxu1 %v8044_v28  ;;  %v6401_v27 = vpop.eup %6400  ;;  %v3466_v29 = vmul.f32 1.442695, %v8072_v34 }
 0x406   :  { %6289 = vmatmul.mubr.msk.f32.vlgmr.msra.gmra.mrb[32].mxu1 %vm3357_vm4, %v6393_v8  ;;  %3670 = vadd.xlane.f32.xlu0 %v3669_v48  ;;  %v7783_v41 = vpop.eup %6402  ;;  %v3616_v46 = vmul.f32 %v6401_v27, %v3600_v1 }
 0x407   :  { %6297 = vmatpush3.msra.mxu1 %v2107_v14  ;;  %6298 = vmatprep.mubr.msk.f32.mxu1 %vm6617_vm2, %v8044_v28  ;;  %v8050_v28 = vsub.f32 %v7482_v42, %v7498_v3  ;;  %v8054_v42 = vsub.f32 %v7449_v59, %v7457_v51  ;;  %v6405_v11 = vpop.eup %6404  ;;  %v8058_v59 = vld [vmem:[#allocation20_spill] sm:$0xff]  ;;  %v8059_v51 = vld [vmem:[#allocation21_spill] sm:$0xff] }
 0x408   :  { %v8060_v13 = vsub.f32 %v8058_v59, %v8059_v51 }
 0x409   :  { %v3456_v22 = vmul.f32 1.442695, %v8050_v28  ;;  %v3448_v3 = vmul.f32 1.442695, %v8054_v42  ;;  %v3617_v42 = vmul.f32 %v7783_v41, %v3601_v16 }
 0x40a   :  { %6299 = vmatmul.mubr.msk.f32.vlgmr.msra.gmra.mrb[34].mxu1 %vm3357_vm4, %v6397_v62  ;;  %3676 = vadd.xlane.f32.xlu0 %v3675_v49  ;;  %v3450_v24 = vmul.f32 1.442695, %v8060_v13  ;;  %v3598_v62 = vld [vmem:[#allocation4] sm:$0xff]  ;;  %v3599_v49 = vld [vmem:[#allocation4 + $0x8] sm:$0xff] }
 0x40b   :  { %6406 = vpow2.f32 %v3456_v22  ;;  %v3614_v14 = vmul.f32 %v6399_v26, %v3598_v62  ;;  %v3615_v7 = vmul.f32 %v6405_v11, %v3599_v49 }
 0x40c   :  { %6408 = vpow2.f32 %v3454_v61 }
 0x40d   :  { %6410 = vpow2.f32 %v3460_v9 }
 0x40e   :  { %6412 = vpow2.f32 %v3458_v12 }
 0x40f   :  { %6414 = vpow2.f32 %v3448_v3 }
 0x410   :  { %6416 = vpow2.f32 %v3446_v53 }
 0x411   :  { %6418 = vpow2.f32 %v3452_v23 }
 0x412   :  { %6420 = vpow2.f32 %v3450_v24 }
 0x413   :  { %6422 = vpow2.f32 %v3464_v43 }
 0x414   :  { %6424 = vpow2.f32 %v3462_v37 }
 0x415   :  { %3729 = vperm.xlu1 %6364, %v6399_v26   ;;  %v7792_v30 = vpop.eup %6406  ;;  %6426 = vpow2.f32 %v3468_v2 }
 0x416   :  { %v7801_v19 = vpop.eup %6408  ;;  %6428 = vpow2.f32 %v3466_v29  ;;  %v3623_v62 = vmul.f32 %v7792_v30, %v3607_v47 }
 0x417   :  { %v7803_v32 = vpop.eup %6410  ;;  %v3622_v52 = vmul.f32 %v7801_v19, %v3606_v21 }
 0x418   :  { %v7813_v18 = vpop.eup %6412 }
 0x419   :  { %3739 = vperm.xlu1 %6364, %v6401_v27   ;;  %v6415_v35 = vpop.eup %6414 }
 0x41a   :  { %v6417_v54 = vpop.eup %6416  ;;  %v3619_v50 = vmul.f32 %v6415_v35, %v3603_v56 }
 0x41b   :  { %v7819_v0 = vpop.eup %6418  ;;  %v3618_v17 = vmul.f32 %v6417_v54, %v3602_v10 }
 0x41c   :  { %v6421_v8 = vpop.eup %6420  ;;  %v3621_v63 = vmul.f32 %v7819_v0, %v3605_v20 }
 0x41d   :  { %3744 = vperm.xlu1 %6364, %v7783_v41   ;;  %v7822_v55 = vpop.eup %6422  ;;  %v3604_v41 = vld [vmem:[#allocation4 + $0x30] sm:$0xff] }
 0x41e   :  { %v7825_v39 = vpop.eup %6424  ;;  %v3620_v60 = vmul.f32 %v6421_v8, %v3604_v41 }
 0x41f   :  { %v7827_v45 = vpop.eup %6426 }
 0x420   :  { %3734 = vperm.xlu0 %6365, %v6405_v11   ;;  %v7831_v48 = vpop.eup %6428 }
 0x421   :  { %3774 = vperm.xlu1 %6364, %v7792_v30  }
 0x424   :  { %3769 = vperm.xlu0 %6365, %v7801_v19  }
 0x425   :  { %3784 = vperm.xlu1 %6364, %v7803_v32  }
 0x428   :  { %3779 = vperm.xlu0 %6365, %v7813_v18  }
 0x429   :  { %3754 = vperm.xlu1 %6364, %v6415_v35   ;;  %v3608_v35 = vld [vmem:[#allocation4 + $0x50] sm:$0xff] }
 0x42a   :  { %v3624_v34 = vmul.f32 %v7813_v18, %v3608_v35 }
 0x42c   :  { %3749 = vperm.xlu0 %6365, %v6417_v54  }
 0x42d   :  { %3764 = vperm.xlu1 %6364, %v7819_v0   ;;  %v3610_v0 = vld [vmem:[#allocation4 + $0x60] sm:$0xff] }
 0x430   :  { %3759 = vperm.xlu0 %6365, %v6421_v8  }
 0x431   :  { %3794 = vperm.xlu1 %6364, %v7822_v55  }
 0x434   :  { %3789 = vperm.xlu0 %6365, %v7825_v39  }
 0x435   :  { %3804 = vperm.xlu1 %6364, %v7827_v45  }
 0x438   :  { %3799 = vperm.xlu0 %6365, %v7831_v48  }
 0x458   :  { %v3632_v57 = vpop.xlane.xlu0 %3631 }
 0x459   :  { %v3678_v31 = vadd.f32 %v3632_v57, %v3614_v14  ;;  %v3609_v57 = vld [vmem:[#allocation4 + $0x58] sm:$0xff] }
 0x45b   :  { %3695 = vst.msk [vmem:[#allocation4] sm:$0xff] %vm791_vm3, %v3678_v31  ;;  %v3626_v31 = vmul.f32 %v7825_v39, %v3610_v0 }
 0x45d   :  { %v3638_v38 = vpop.xlane.xlu0 %3637 }
 0x45e   :  { %v3635_v36 = vpop.xlane.xlu1 %3634  ;;  %v3680_v28 = vadd.f32 %v3638_v38, %v3616_v46  ;;  %v3612_v46 = vld [vmem:[#allocation4 + $0x70] sm:$0xff] }
 0x45f   :  { %v3679_v44 = vadd.f32 %v3635_v36, %v3615_v7  ;;  %v3625_v36 = vmul.f32 %v7803_v32, %v3609_v57 }
 0x460   :  { %3697 = vst.msk [vmem:[#allocation4 + $0x10] sm:$0xff] %vm791_vm3, %v3680_v28  ;;  %v3628_v28 = vmul.f32 %v7831_v48, %v3612_v46 }
 0x461   :  { %3696 = vst.msk [vmem:[#allocation4 + $0x8] sm:$0xff] %vm791_vm3, %v3679_v44  ;;  %v3611_v44 = vld [vmem:[#allocation4 + $0x68] sm:$0xff] }
 0x462   :  { %v5058_v22 = vld [vmem:[#allocation4] sm:$0xff] }
 0x463   :  { %6430 = vrcp.f32 %v5058_v22 }
 0x467   :  { %v5060_v61 = vld [vmem:[#allocation4 + $0x10] sm:$0xff] }
 0x468   :  { %v5059_v26 = vld [vmem:[#allocation4 + $0x8] sm:$0xff] }
 0x469   :  { %6432 = vrcp.f32 %v5059_v26  ;;  %v3627_v26 = vmul.f32 %v7822_v55, %v3611_v44 }
 0x46a   :  { %6434 = vrcp.f32 %v5060_v61  ;;  %v3644_v9 = vpop.xlane.xlu1 %3643 }
 0x46b   :  { %v3682_v12 = vadd.f32 %v3644_v9, %v3618_v17  ;;  %v3613_v9 = vld [vmem:[#allocation4 + $0x78] sm:$0xff] }
 0x46c   :  { %v3629_v48 = vmul.f32 %v7827_v45, %v3613_v9 }
 0x46d   :  { %v6431_v27 = vpop.eup %6430  ;;  %3699 = vst.msk [vmem:[#allocation4 + $0x20] sm:$0xff] %vm791_vm3, %v3682_v12 }
 0x46e   :  { %v3641_v3 = vpop.xlane.xlu0 %3640  ;;  %5092 = vperm.xlu0 %6365, %v6431_v27  }
 0x46f   :  { %v3681_v53 = vadd.f32 %v3641_v3, %v3617_v42 }
 0x471   :  { %3698 = vst.msk [vmem:[#allocation4 + $0x18] sm:$0xff] %vm791_vm3, %v3681_v53 }
 0x473   :  { %v3647_v4 = vpop.xlane.xlu0 %3646  ;;  %v6433_v23 = vpop.eup %6432 }
 0x474   :  { %v3683_v11 = vadd.f32 %v3647_v4, %v3619_v50  ;;  %v6435_v59 = vpop.eup %6434  ;;  %v5062_v51 = vld [vmem:[#allocation4 + $0x20] sm:$0xff]  ;;  %5097 = vperm.xlu1 %6364, %v6433_v23  }
 0x475   :  { %6436 = vrcp.f32 %v5062_v51  ;;  %5102 = vperm.xlu0 %6365, %v6435_v59   ;;  %v3711_v23 = vld [vmem:[#allocation5] sm:$0xff] }
 0x476   :  { %3700 = vst.msk [vmem:[#allocation4 + $0x28] sm:$0xff] %vm791_vm3, %v3683_v11 }
 0x478   :  { %v5061_v13 = vld [vmem:[#allocation4 + $0x18] sm:$0xff] }
 0x479   :  { %6438 = vrcp.f32 %v5061_v13  ;;  %v3713_v13 = vld [vmem:[#allocation5 + $0x10] sm:$0xff] }
 0x47d   :  { %v5063_v24 = vld [vmem:[#allocation4 + $0x28] sm:$0xff] }
 0x47e   :  { %6440 = vrcp.f32 %v5063_v24 }
 0x47f   :  { %v6437_v15 = vpop.eup %6436 }
 0x480   :  { %5112 = vperm.xlu0 %6365, %v6437_v15  }
 0x481   :  { %v3650_v43 = vpop.xlane.xlu1 %3649 }
 0x482   :  { %v3684_v58 = vadd.f32 %v3650_v43, %v3620_v60  ;;  %v3712_v60 = vld [vmem:[#allocation5 + $0x8] sm:$0xff] }
 0x483   :  { %v3653_v37 = vpop.xlane.xlu0 %3652  ;;  %v6439_v25 = vpop.eup %6438 }
 0x484   :  { %3701 = vst.msk [vmem:[#allocation4 + $0x30] sm:$0xff] %vm791_vm3, %v3684_v58  ;;  %v3685_v6 = vadd.f32 %v3653_v37, %v3621_v63  ;;  %5107 = vperm.xlu1 %6364, %v6439_v25  }
 0x485   :  { %v3656_v2 = vpop.xlane.xlu1 %3655 }
 0x486   :  { %v3686_v5 = vadd.f32 %v3656_v2, %v3622_v52  ;;  %3702 = vst.msk [vmem:[#allocation4 + $0x38] sm:$0xff] %vm791_vm3, %v3685_v6 }
 0x488   :  { %3703 = vst.msk [vmem:[#allocation4 + $0x40] sm:$0xff] %vm791_vm3, %v3686_v5  ;;  %v6441_v29 = vpop.eup %6440 }
 0x489   :  { %v3662_v54 = vpop.xlane.xlu1 %3661  ;;  %5117 = vperm.xlu1 %6364, %v6441_v29  }
 0x48a   :  { %v3688_v8 = vadd.f32 %v3662_v54, %v3624_v34 }
 0x48b   :  { %v5064_v19 = vld [vmem:[#allocation4 + $0x30] sm:$0xff]  ;;  %v3659_v14 = vpop.xlane.xlu0 %3658 }
 0x48c   :  { %6442 = vrcp.f32 %v5064_v19  ;;  %3705 = vst.msk [vmem:[#allocation4 + $0x50] sm:$0xff] %vm791_vm3, %v3688_v8  ;;  %v3687_v49 = vadd.f32 %v3659_v14, %v3623_v62  ;;  %v3715_v14 = vld [vmem:[#allocation5 + $0x20] sm:$0xff] }
 0x48d   :  { %v5065_v1 = vld [vmem:[#allocation4 + $0x38] sm:$0xff]  ;;  %v3668_v7 = vpop.xlane.xlu1 %3667 }
 0x48e   :  { %6444 = vrcp.f32 %v5065_v1  ;;  %v3690_v18 = vadd.f32 %v3668_v7, %v3626_v31  ;;  %3704 = vst.msk [vmem:[#allocation4 + $0x48] sm:$0xff] %vm791_vm3, %v3687_v49  ;;  %v3714_v1 = vld [vmem:[#allocation5 + $0x18] sm:$0xff] }
 0x48f   :  { %v5066_v30 = vld [vmem:[#allocation4 + $0x40] sm:$0xff]  ;;  %v3665_v38 = vpop.xlane.xlu0 %3664 }
 0x490   :  { %6446 = vrcp.f32 %v5066_v30  ;;  %3707 = vst.msk [vmem:[#allocation4 + $0x60] sm:$0xff] %vm791_vm3, %v3690_v18  ;;  %v3689_v22 = vadd.f32 %v3665_v38, %v3625_v36  ;;  %v3716_v30 = vld [vmem:[#allocation5 + $0x28] sm:$0xff] }
 0x491   :  { %v3674_v39 = vpop.xlane.xlu1 %3673 }
 0x492   :  { %v3692_v10 = vadd.f32 %v3674_v39, %v3628_v28  ;;  %3706 = vst.msk [vmem:[#allocation4 + $0x58] sm:$0xff] %vm791_vm3, %v3689_v22 }
 0x493   :  { %v5068_v61 = vld [vmem:[#allocation4 + $0x50] sm:$0xff]  ;;  %v3671_v17 = vpop.xlane.xlu0 %3670 }
 0x494   :  { %6448 = vrcp.f32 %v5068_v61  ;;  %3709 = vst.msk [vmem:[#allocation4 + $0x70] sm:$0xff] %vm791_vm3, %v3692_v10  ;;  %v3691_v32 = vadd.f32 %v3671_v17, %v3627_v26  ;;  %v3717_v17 = vld [vmem:[#allocation5 + $0x30] sm:$0xff] }
 0x495   :  { %v5067_v16 = vld [vmem:[#allocation4 + $0x48] sm:$0xff]  ;;  %v3730_v27 = vpop.permute.xlu1 %3729 }
 0x496   :  { %v6443_v12 = vpop.eup %6442  ;;  %6450 = vrcp.f32 %v5067_v16  ;;  %3708 = vst.msk [vmem:[#allocation4 + $0x68] sm:$0xff] %vm791_vm3, %v3691_v32  ;;  %v3807_v45 = vmul.f32 %v3730_v27, %v3711_v23  ;;  %v3718_v32 = vld [vmem:[#allocation5 + $0x38] sm:$0xff]  ;;  %v3719_v27 = vld [vmem:[#allocation5 + $0x40] sm:$0xff] }
 0x497   :  { %v5070_v42 = vld [vmem:[#allocation4 + $0x60] sm:$0xff]  ;;  %5122 = vperm.xlu0 %6365, %v6443_v12   ;;  %v3677_v3 = vpop.xlane.xlu0 %3676 }
 0x498   :  { %v6445_v56 = vpop.eup %6444  ;;  %6452 = vrcp.f32 %v5070_v42  ;;  %v3693_v55 = vadd.f32 %v3677_v3, %v3629_v48 }
 0x499   :  { %v5069_v53 = vld [vmem:[#allocation4 + $0x58] sm:$0xff]  ;;  %5127 = vperm.xlu1 %6364, %v6445_v56   ;;  %v3740_v11 = vpop.permute.xlu1 %3739 }
 0x49a   :  { %v6447_v50 = vpop.eup %6446  ;;  %6454 = vrcp.f32 %v5069_v53  ;;  %3710 = vst.msk [vmem:[#allocation4 + $0x78] sm:$0xff] %vm791_vm3, %v3693_v55  ;;  %v3809_v63 = vmul.f32 %v3740_v11, %v3713_v13 }
 0x49b   :  { %v5072_v4 = vld [vmem:[#allocation4 + $0x70] sm:$0xff]  ;;  %5132 = vperm.xlu0 %6365, %v6447_v50   ;;  %v3720_v50 = vld [vmem:[#allocation5 + $0x48] sm:$0xff] }
 0x49c   :  { %6456 = vrcp.f32 %v5072_v4  ;;  %v3721_v4 = vld [vmem:[#allocation5 + $0x50] sm:$0xff] }
 0x49d   :  { %v5071_v59 = vld [vmem:[#allocation4 + $0x68] sm:$0xff]  ;;  %v3892_v24 = vpop.f32.mrb[16].mxu0  ;;  %v3745_v37 = vpop.permute.xlu1 %3744 }
 0x49e   :  { %v6449_v51 = vpop.eup %6448  ;;  %6458 = vrcp.f32 %v5071_v59  ;;  %v4991_v15 = vadd.f32 %v3892_v24, %v3807_v45  ;;  %v6225_v43 = vpop.f32.mrb[17].mxu0  ;;  %v3810_v36 = vmul.f32 %v3745_v37, %v3714_v1  ;;  %v3722_v37 = vld [vmem:[#allocation5 + $0x58] sm:$0xff] }
 0x49f   :  { %5142 = vperm.xlu0 %6365, %v6449_v51   ;;  %v3735_v41 = vpop.permute.xlu0 %3734  ;;  %v3726_v1 = vld [vmem:[#allocation5 + $0x78] sm:$0xff] }
 0x4a0   :  { %v6451_v20 = vpop.eup %6450  ;;  %5007 = vst.msk [vmem:[#allocation5] sm:$0xff] %vm774_vm1, %v4991_v15  ;;  %v3808_v52 = vmul.f32 %v3735_v41, %v3712_v60 }
 0x4a1   :  { %v5073_v21 = vld [vmem:[#allocation4 + $0x78] sm:$0xff]  ;;  %5137 = vperm.xlu1 %6364, %v6451_v20   ;;  %v4038_v25 = vpop.f32.mrb[18].mxu0  ;;  %v3775_v62 = vpop.permute.xlu1 %3774  ;;  %v3723_v20 = vld [vmem:[#allocation5 + $0x60] sm:$0xff] }
 0x4a2   :  { %v6453_v58 = vpop.eup %6452  ;;  %6460 = vrcp.f32 %v5073_v21  ;;  %v3965_v35 = vpop.f32.mrb[20].mxu1  ;;  %v4993_v5 = vadd.f32 %v4038_v25, %v3809_v63  ;;  %v3816_v41 = vmul.f32 %v3775_v62, %v3720_v50 }
 0x4a3   :  { %5152 = vperm.xlu0 %6365, %v6453_v58   ;;  %v3770_v6 = vpop.permute.xlu0 %3769  ;;  %v6235_v47 = vpop.f32.mrb[19].mxu0  ;;  %v4992_v34 = vadd.f32 %v3965_v35, %v3808_v52 }
 0x4a4   :  { %v6455_v2 = vpop.eup %6454  ;;  %v6230_v29 = vpop.f32.mrb[21].mxu1  ;;  %5009 = vst.msk [vmem:[#allocation5 + $0x10] sm:$0xff] %vm774_vm1, %v4993_v5  ;;  %v3815_v55 = vmul.f32 %v3770_v6, %v3719_v27  ;;  %v3725_v6 = vld [vmem:[#allocation5 + $0x70] sm:$0xff] }
 0x4a5   :  { %5147 = vperm.xlu1 %6364, %v6455_v2   ;;  %5008 = vst.msk [vmem:[#allocation5 + $0x8] sm:$0xff] %vm774_vm1, %v4992_v34  ;;  %v3785_v31 = vpop.permute.xlu1 %3784  ;;  %v3724_v29 = vld [vmem:[#allocation5 + $0x68] sm:$0xff] }
 0x4a6   :  { %v6457_v54 = vpop.eup %6456  ;;  %v3818_v34 = vmul.f32 %v3785_v31, %v3722_v37 }
 0x4a7   :  { %5162 = vperm.xlu0 %6365, %v6457_v54   ;;  %v3780_v0 = vpop.permute.xlu0 %3779 }
 0x4a8   :  { %v6459_v8 = vpop.eup %6458  ;;  %v3817_v24 = vmul.f32 %v3780_v0, %v3721_v4 }
 0x4a9   :  { %5157 = vperm.xlu1 %6364, %v6459_v8   ;;  %v3755_v38 = vpop.permute.xlu1 %3754 }
 0x4aa   :  { %v3812_v39 = vmul.f32 %v3755_v38, %v3716_v30 }
 0x4ab   :  { %v3750_v57 = vpop.permute.xlu0 %3749 }
 0x4ac   :  { %v6461_v19 = vpop.eup %6460  ;;  %v3811_v49 = vmul.f32 %v3750_v57, %v3715_v14 }
 0x4ad   :  { %5167 = vperm.xlu1 %6364, %v6461_v19   ;;  %v3765_v16 = vpop.permute.xlu1 %3764 }
 0x4ae   :  { %v3814_v56 = vmul.f32 %v3765_v16, %v3718_v32 }
 0x4af   :  { %v4184_v7 = vpop.f32.mrb[20].mxu0  ;;  %v3760_v9 = vpop.permute.xlu0 %3759 }
 0x4b0   :  { %v4995_v46 = vadd.f32 %v4184_v7, %v3811_v49  ;;  %v6245_v18 = vpop.f32.mrb[21].mxu0  ;;  %v3813_v12 = vmul.f32 %v3760_v9, %v3717_v17  ;;  %v5043_v9 = vld [vmem:[#allocation5 + $0x8] sm:$0xff] }
 0x4b1   :  { %v3795_v35 = vpop.permute.xlu1 %3794 }
 0x4b2   :  { %5011 = vst.msk [vmem:[#allocation5 + $0x20] sm:$0xff] %vm774_vm1, %v4995_v46  ;;  %v3820_v49 = vmul.f32 %v3795_v35, %v3724_v29 }
 0x4b3   :  { %v4111_v44 = vpop.f32.mrb[22].mxu1  ;;  %v3790_v13 = vpop.permute.xlu0 %3789 }
 0x4b4   :  { %v4994_v28 = vadd.f32 %v4111_v44, %v3810_v36  ;;  %v6240_v22 = vpop.f32.mrb[23].mxu1  ;;  %v3819_v52 = vmul.f32 %v3790_v13, %v3723_v20 }
 0x4b5   :  { %v3805_v7 = vpop.permute.xlu1 %3804 }
 0x4b6   :  { %5010 = vst.msk [vmem:[#allocation5 + $0x18] sm:$0xff] %vm774_vm1, %v4994_v28  ;;  %v3822_v36 = vmul.f32 %v3805_v7, %v3726_v1 }
 0x4b7   :  { %v3800_v25 = vpop.permute.xlu0 %3799 }
 0x4b8   :  { %v4257_v10 = vpop.f32.mrb[24].mxu1  ;;  %v3821_v54 = vmul.f32 %v3800_v25, %v3725_v6 }
 0x4b9   :  { %v4996_v26 = vadd.f32 %v4257_v10, %v3812_v39  ;;  %v6250_v61 = vpop.f32.mrb[25].mxu1  ;;  %v5044_v10 = vld [vmem:[#allocation5 + $0x10] sm:$0xff] }
 0x4ba   :  { %v5042_v61 = vld [vmem:[#allocation5] sm:$0xff] }
 0x4bb   :  { %5012 = vst.msk [vmem:[#allocation5 + $0x28] sm:$0xff] %vm774_vm1, %v4996_v26 }
 0x4bd   :  { %v5045_v32 = vld [vmem:[#allocation5 + $0x18] sm:$0xff] }
 0x4c6   :  { %v4330_v48 = vpop.f32.mrb[22].mxu0 }
 0x4c7   :  { %v4997_v42 = vadd.f32 %v4330_v48, %v3813_v12  ;;  %v6255_v3 = vpop.f32.mrb[23].mxu0 }
 0x4c9   :  { %5013 = vst.msk [vmem:[#allocation5 + $0x30] sm:$0xff] %vm774_vm1, %v4997_v42  ;;  %v4403_v53 = vpop.f32.mrb[26].mxu1 }
 0x4ca   :  { %v4476_v23 = vpop.f32.mrb[24].mxu0  ;;  %v4998_v11 = vadd.f32 %v4403_v53, %v3814_v56  ;;  %v6260_v59 = vpop.f32.mrb[27].mxu1 }
 0x4cb   :  { %v4999_v51 = vadd.f32 %v4476_v23, %v3815_v55  ;;  %v6265_v45 = vpop.f32.mrb[25].mxu0 }
 0x4cc   :  { %5014 = vst.msk [vmem:[#allocation5 + $0x38] sm:$0xff] %vm774_vm1, %v4998_v11 }
 0x4cd   :  { %5015 = vst.msk [vmem:[#allocation5 + $0x40] sm:$0xff] %vm774_vm1, %v4999_v51 }
 0x4ce   :  { %v4622_v60 = vpop.f32.mrb[26].mxu0  ;;  %v4549_v15 = vpop.f32.mrb[28].mxu1 }
 0x4cf   :  { %v5001_v43 = vadd.f32 %v4622_v60, %v3817_v24  ;;  %v6275_v21 = vpop.f32.mrb[27].mxu0  ;;  %v5000_v58 = vadd.f32 %v4549_v15, %v3816_v41  ;;  %v6270_v63 = vpop.f32.mrb[29].mxu1 }
 0x4d1   :  { %5017 = vst.msk [vmem:[#allocation5 + $0x50] sm:$0xff] %vm774_vm1, %v5001_v43  ;;  %5016 = vst.msk [vmem:[#allocation5 + $0x48] sm:$0xff] %vm774_vm1, %v5000_v58 }
 0x4d2   :  { %v4768_v2 = vpop.f32.mrb[28].mxu0 }
 0x4d3   :  { %v5003_v5 = vadd.f32 %v4768_v2, %v3819_v52  ;;  %v6285_v47 = vpop.f32.mrb[29].mxu0 }
 0x4d4   :  { %v5046_v47 = vld [vmem:[#allocation5 + $0x20] sm:$0xff] }
 0x4d5   :  { %5019 = vst.msk [vmem:[#allocation5 + $0x60] sm:$0xff] %vm774_vm1, %v5003_v5  ;;  %v4695_v0 = vpop.f32.mrb[30].mxu1 }
 0x4d6   :  { %v5002_v8 = vadd.f32 %v4695_v0, %v3818_v34  ;;  %v4914_v62 = vpop.f32.mrb[30].mxu0  ;;  %v6280_v19 = vpop.f32.mrb[31].mxu1  ;;  %v5048_v34 = vld [vmem:[#allocation5 + $0x30] sm:$0xff] }
 0x4d7   :  { %v5005_v14 = vadd.f32 %v4914_v62, %v3821_v54  ;;  %v6295_v57 = vpop.f32.mrb[31].mxu0  ;;  %v5047_v19 = vld [vmem:[#allocation5 + $0x28] sm:$0xff] }
 0x4d8   :  { %5018 = vst.msk [vmem:[#allocation5 + $0x58] sm:$0xff] %vm774_vm1, %v5002_v8 }
 0x4d9   :  { %5021 = vst.msk [vmem:[#allocation5 + $0x70] sm:$0xff] %vm774_vm1, %v5005_v14  ;;  %v4841_v46 = vpop.f32.mrb[32].mxu1  ;;  %v5049_v14 = vld [vmem:[#allocation5 + $0x38] sm:$0xff] }
 0x4da   :  { %v5004_v18 = vadd.f32 %v4841_v46, %v3820_v49  ;;  %v6290_v31 = vpop.f32.mrb[33].mxu1 }
 0x4dc   :  { %5020 = vst.msk [vmem:[#allocation5 + $0x68] sm:$0xff] %vm774_vm1, %v5004_v18 }
 0x4dd   :  { %v4987_v30 = vpop.f32.mrb[34].mxu1 }
 0x4de   :  { %v5006_v38 = vadd.f32 %v4987_v30, %v3822_v36  ;;  %v6300_v44 = vpop.f32.mrb[35].mxu1 }
 0x4e0   :  { %5022 = vst.msk [vmem:[#allocation5 + $0x78] sm:$0xff] %vm774_vm1, %v5006_v38 }
 0x4ed   :  { %v5093_v28 = vpop.permute.xlu0 %5092 }
 0x4ee   :  { %v5170_v17 = vmul.f32 %v5093_v28, %v5042_v61 }
 0x4f3   :  { %v5098_v39 = vpop.permute.xlu1 %5097 }
 0x4f4   :  { %v5103_v22 = vpop.permute.xlu0 %5102  ;;  %v5171_v12 = vmul.f32 %v5098_v39, %v5043_v9 }
 0x4f5   :  { %v5172_v26 = vmul.f32 %v5103_v22, %v5044_v10 }
 0x4f7   :  { %v5186_v27 = vcombine.low %v5170_v17, %v5172_v26  ;;  %v5187_v48 = vcombine.high %v5170_v17, %v5172_v26 }
 0x4f9   :  { %v5194_v55 = vrot.slane %v5186_v27, %v6863_v33  ;;  %v5201_v53 = vrot.slane %v5187_v48, %v6863_v33 }
 0x4ff   :  { %v5113_v20 = vpop.permute.xlu0 %5112 }
 0x500   :  { %v5174_v8 = vmul.f32 %v5113_v20, %v5046_v47  ;;  %v5051_v20 = vld [vmem:[#allocation5 + $0x48] sm:$0xff] }
 0x503   :  { %v5108_v16 = vpop.permute.xlu1 %5107 }
 0x504   :  { %v5173_v42 = vmul.f32 %v5108_v16, %v5045_v32  ;;  %v5052_v16 = vld [vmem:[#allocation5 + $0x50] sm:$0xff] }
 0x506   :  { %v5202_v3 = vcombine.low %v5171_v12, %v5173_v42  ;;  %v5203_v56 = vcombine.high %v5171_v12, %v5173_v42 }
 0x508   :  { %v5210_v50 = vrot.slane %v5202_v3, %v6863_v33  ;;  %v5217_v4 = vrot.slane %v5203_v56, %v6863_v33  ;;  %v5118_v6 = vpop.permute.xlu1 %5117  ;;  %v5050_v56 = vld [vmem:[#allocation5 + $0x40] sm:$0xff] }
 0x509   :  { %v5175_v31 = vmul.f32 %v5118_v6, %v5047_v19 }
 0x50a   :  { %v5250_v23 = vcombine.low %v5194_v55, %v5210_v50  ;;  %v5251_v11 = vcombine.high %v5194_v55, %v5210_v50  ;;  %v5266_v59 = vcombine.low %v5201_v53, %v5217_v4  ;;  %v5267_v51 = vcombine.high %v5201_v53, %v5217_v4 }
 0x50c   :  { %v5258_v45 = vrot.slane %v5250_v23, %v6870_v40  ;;  %v5265_v13 = vrot.slane %v5251_v11, %v6870_v40  ;;  %v5274_v41 = vrot.slane %v5266_v59, %v6870_v40  ;;  %v5281_v24 = vrot.slane %v5267_v51, %v6870_v40 }
 0x50e   :  { %v6018_v60 = vcombine.low %v5258_v45, %v5265_v13  ;;  %v6020_v15 = vcombine.high %v5258_v45, %v5265_v13  ;;  %v6022_v43 = vcombine.low %v5274_v41, %v5281_v24  ;;  %v6024_v21 = vcombine.high %v5274_v41, %v5281_v24 }
 0x510   :  { %v5466_v58 = vrot.slane %v6018_v60, %v6863_v33  ;;  %v5482_v63 = vrot.slane %v6020_v15, %v6863_v33  ;;  %v5498_v37 = vrot.slane %v6022_v43, %v6863_v33  ;;  %v5514_v52 = vrot.slane %v6024_v21, %v6863_v33  ;;  %v5053_v60 = vld [vmem:[#allocation5 + $0x58] sm:$0xff] }
 0x512   :  { %v5522_v25 = vcombine.low %v5466_v58, %v5482_v63  ;;  %v5554_v2 = vcombine.low %v5498_v37, %v5514_v52  ;;  %v5523_v35 = vcombine.high %v5466_v58, %v5482_v63  ;;  %v5555_v5 = vcombine.high %v5498_v37, %v5514_v52 }
 0x514   :  { %v7889_v54 = vrot.slane %v5522_v25, %v6870_v40  ;;  %v7892_v0 = vrot.slane %v5554_v2, %v6870_v40  ;;  %v5537_v1 = vrot.slane %v5523_v35, %v6870_v40  ;;  %v5569_v7 = vrot.slane %v5555_v5, %v6870_v40  ;;  %v5056_v35 = vld [vmem:[#allocation5 + $0x70] sm:$0xff] }
 0x516   :  { %v5123_v29 = vpop.permute.xlu0 %5122  ;;  %v5587_v49 = vcombine.high %v7889_v54, %v7892_v0  ;;  %v5586_v46 = vcombine.low %v7889_v54, %v7892_v0  ;;  %v5588_v22 = vcombine.low %v5537_v1, %v5569_v7  ;;  %v5589_v3 = vcombine.high %v5537_v1, %v5569_v7 }
 0x517   :  { %v5176_v62 = vmul.f32 %v5123_v29, %v5048_v34  ;;  %v5054_v34 = vld [vmem:[#allocation5 + $0x60] sm:$0xff] }
 0x518   :  { %v5128_v57 = vpop.permute.xlu1 %5127  ;;  %5732 = vrot.lane.b32.xlu0 %v5587_v49, %s6623_s16 }
 0x519   :  { %v5218_v18 = vcombine.low %v5174_v8, %v5176_v62  ;;  %v5177_v36 = vmul.f32 %v5128_v57, %v5049_v14  ;;  %v5219_v30 = vcombine.high %v5174_v8, %v5176_v62 }
 0x51a   :  { %v5133_v38 = vpop.permute.xlu0 %5132 }
 0x51b   :  { %v5234_v44 = vcombine.low %v5175_v31, %v5177_v36  ;;  %v5235_v28 = vcombine.high %v5175_v31, %v5177_v36  ;;  %v5226_v39 = vrot.slane %v5218_v18, %v6863_v33  ;;  %v5233_v26 = vrot.slane %v5219_v30, %v6863_v33 }
 0x51c   :  { %5740 = vrot.lane.b32.xlu0 %v5588_v22, %s6605_s10  ;;  %v5178_v50 = vmul.f32 %v5133_v38, %v5050_v56 }
 0x51d   :  { %v5242_v10 = vrot.slane %v5234_v44, %v6863_v33  ;;  %v5249_v61 = vrot.slane %v5235_v28, %v6863_v33 }
 0x51e   :  { %v5143_v17 = vpop.permute.xlu0 %5142 }
 0x51f   :  { %v5282_v9 = vcombine.low %v5226_v39, %v5242_v10  ;;  %v5283_v32 = vcombine.high %v5226_v39, %v5242_v10  ;;  %v5298_v12 = vcombine.low %v5233_v26, %v5249_v61  ;;  %v5299_v27 = vcombine.high %v5233_v26, %v5249_v61 }
 0x520   :  { %v5180_v48 = vmul.f32 %v5143_v17, %v5052_v16  ;;  %v5138_v42 = vpop.permute.xlu1 %5137  ;;  %5748 = vrot.lane.b32.xlu0 %v5589_v3, %s6624_s17  ;;  %v5057_v16 = vld [vmem:[#allocation5 + $0x78] sm:$0xff] }
 0x521   :  { %v5290_v55 = vrot.slane %v5282_v9, %v6870_v40  ;;  %v5297_v53 = vrot.slane %v5283_v32, %v6870_v40  ;;  %v5306_v4 = vrot.slane %v5298_v12, %v6870_v40  ;;  %v5313_v23 = vrot.slane %v5299_v27, %v6870_v40  ;;  %v5055_v32 = vld [vmem:[#allocation5 + $0x68] sm:$0xff] }
 0x522   :  { %v5153_v11 = vpop.permute.xlu0 %5152  ;;  %v5322_v41 = vcombine.low %v5178_v50, %v5180_v48  ;;  %v5323_v24 = vcombine.high %v5178_v50, %v5180_v48  ;;  %v5179_v58 = vmul.f32 %v5138_v42, %v5051_v20 }
 0x523   :  { %v6019_v59 = vcombine.low %v5290_v55, %v5297_v53  ;;  %v6021_v51 = vcombine.high %v5290_v55, %v5297_v53  ;;  %v6023_v45 = vcombine.low %v5306_v4, %v5313_v23  ;;  %v6025_v13 = vcombine.high %v5306_v4, %v5313_v23 }
 0x524   :  { %v5148_v15 = vpop.permute.xlu1 %5147  ;;  %v5330_v47 = vrot.slane %v5322_v41, %v6863_v33  ;;  %v5337_v19 = vrot.slane %v5323_v24, %v6863_v33  ;;  %v5182_v14 = vmul.f32 %v5153_v11, %v5054_v34 }
 0x525   :  { %v5473_v43 = vrot.slane %v6019_v59, %v6863_v33  ;;  %v5489_v21 = vrot.slane %v6021_v51, %v6863_v33  ;;  %v5181_v63 = vmul.f32 %v5148_v15, %v5053_v60  ;;  %v5505_v37 = vrot.slane %v6023_v45, %v6863_v33 }
 0x526   :  { %v5521_v52 = vrot.slane %v6025_v13, %v6863_v33  ;;  %v5163_v6 = vpop.permute.xlu0 %5162 }
 0x527   :  { %v5338_v25 = vcombine.low %v5179_v58, %v5181_v63  ;;  %v5339_v2 = vcombine.high %v5179_v58, %v5181_v63  ;;  %v5538_v5 = vcombine.low %v5473_v43, %v5489_v21  ;;  %v5184_v29 = vmul.f32 %v5163_v6, %v5056_v35 }
 0x528   :  { %v5158_v8 = vpop.permute.xlu1 %5157  ;;  %v5570_v62 = vcombine.low %v5505_v37, %v5521_v52  ;;  %v5539_v18 = vcombine.high %v5473_v43, %v5489_v21  ;;  %v5571_v31 = vcombine.high %v5505_v37, %v5521_v52 }
 0x529   :  { %v5346_v57 = vrot.slane %v5338_v25, %v6863_v33  ;;  %v5353_v49 = vrot.slane %v5339_v2, %v6863_v33  ;;  %v5546_v1 = vrot.slane %v5538_v5, %v6870_v40  ;;  %v5354_v28 = vcombine.low %v5182_v14, %v5184_v29 }
 0x52a   :  { %v5578_v7 = vrot.slane %v5570_v62, %v6870_v40  ;;  %v5355_v22 = vcombine.high %v5182_v14, %v5184_v29  ;;  %v5183_v12 = vmul.f32 %v5158_v8, %v5055_v32  ;;  %v5553_v48 = vrot.slane %v5539_v18, %v6870_v40 }
 0x52b   :  { %v5386_v36 = vcombine.low %v5330_v47, %v5346_v57  ;;  %v5387_v30 = vcombine.high %v5330_v47, %v5346_v57  ;;  %v5402_v38 = vcombine.low %v5337_v19, %v5353_v49  ;;  %v5403_v44 = vcombine.high %v5337_v19, %v5353_v49 }
 0x52c   :  { %v5168_v39 = vpop.permute.xlu1 %5167  ;;  %v5590_v10 = vcombine.low %v5546_v1, %v5578_v7  ;;  %v5585_v42 = vrot.slane %v5571_v31, %v6870_v40  ;;  %v5362_v50 = vrot.slane %v5354_v28, %v6863_v33  ;;  %v5591_v11 = vcombine.high %v5546_v1, %v5578_v7 }
 0x52d   :  { %v5394_v26 = vrot.slane %v5386_v36, %v6870_v40  ;;  %v5401_v61 = vrot.slane %v5387_v30, %v6870_v40  ;;  %v5410_v17 = vrot.slane %v5402_v38, %v6870_v40  ;;  %v5417_v9 = vrot.slane %v5403_v44, %v6870_v40 }
 0x52e   :  { %v5185_v27 = vmul.f32 %v5168_v39, %v5057_v16  ;;  %5756 = vrot.lane.b32.xlu0 %v5590_v10, %s6625_s18  ;;  %v5369_v41 = vrot.slane %v5355_v22, %v6863_v33  ;;  %v5592_v60 = vcombine.low %v5553_v48, %v5585_v42  ;;  %v5593_v35 = vcombine.high %v5553_v48, %v5585_v42  ;;  %v5805_v22 = vld [vmem:[#allocation14] sm:$0xff]  ;;  %v5806_v39 = vld [vmem:[#allocation14 + $0x8] sm:$0xff] }
 0x52f   :  { %v6026_v3 = vcombine.low %v5394_v26, %v5401_v61  ;;  %v6028_v56 = vcombine.high %v5394_v26, %v5401_v61  ;;  %v6030_v55 = vcombine.low %v5410_v17, %v5417_v9  ;;  %v6032_v53 = vcombine.high %v5410_v17, %v5417_v9  ;;  %v5807_v9 = vld [vmem:[#allocation14 + $0x10] sm:$0xff] }
 0x530   :  { %v5370_v4 = vcombine.low %v5183_v12, %v5185_v27  ;;  %v5371_v23 = vcombine.high %v5183_v12, %v5185_v27  ;;  %v6328_v10 = vpack.c.bf16 %v5806_v39, %v5805_v22 }
 0x531   :  { %v5602_v59 = vrot.slane %v6026_v3, %v6863_v33  ;;  %v5618_v51 = vrot.slane %v6028_v56, %v6863_v33  ;;  %v5634_v45 = vrot.slane %v6030_v55, %v6863_v33  ;;  %v5650_v13 = vrot.slane %v6032_v53, %v6863_v33 }
 0x532   :  { %v5378_v24 = vrot.slane %v5370_v4, %v6863_v33  ;;  %v5385_v20 = vrot.slane %v5371_v23, %v6863_v33  ;;  %5764 = vrot.lane.b32.xlu0 %v5591_v11, %s6626_s19  ;;  %6329 = vmatprep.subr.bf16.mxu0 %v6328_v10 }
 0x533   :  { %v5658_v15 = vcombine.low %v5602_v59, %v5618_v51  ;;  %v5690_v43 = vcombine.low %v5634_v45, %v5650_v13  ;;  %v5659_v21 = vcombine.high %v5602_v59, %v5618_v51  ;;  %v5691_v58 = vcombine.high %v5634_v45, %v5650_v13  ;;  %6331 = vmatpush3.bf16.msra.mxu0 %v6328_v10 }
 0x534   :  { %v5418_v63 = vcombine.low %v5362_v50, %v5378_v24  ;;  %v5419_v37 = vcombine.high %v5362_v50, %v5378_v24  ;;  %v5434_v52 = vcombine.low %v5369_v41, %v5385_v20  ;;  %v5435_v6 = vcombine.high %v5369_v41, %v5385_v20 }
 0x535   :  { %v7938_v25 = vrot.slane %v5658_v15, %v6870_v40  ;;  %v7941_v2 = vrot.slane %v5690_v43, %v6870_v40  ;;  %v5673_v62 = vrot.slane %v5659_v21, %v6870_v40  ;;  %v5705_v19 = vrot.slane %v5691_v58, %v6870_v40 }
 0x536   :  { %v5426_v5 = vrot.slane %v5418_v63, %v6870_v40  ;;  %v5433_v47 = vrot.slane %v5419_v37, %v6870_v40  ;;  %v5442_v34 = vrot.slane %v5434_v52, %v6870_v40  ;;  %v5449_v29 = vrot.slane %v5435_v6, %v6870_v40  ;;  %5772 = vrot.lane.b32.xlu0 %v5592_v60, %s6627_s20 }
 0x537   :  { %v5723_v8 = vcombine.high %v7938_v25, %v7941_v2  ;;  %v5722_v14 = vcombine.low %v7938_v25, %v7941_v2  ;;  %v5724_v38 = vcombine.low %v5673_v62, %v5705_v19  ;;  %v5725_v26 = vcombine.high %v5673_v62, %v5705_v19  ;;  %v6034_v25 = vld [vmem:[%s8017_s5] ss:$0 sm:$0xff] }
 0x538   :  { %v6027_v57 = vcombine.low %v5426_v5, %v5433_v47  ;;  %v6029_v49 = vcombine.high %v5426_v5, %v5433_v47  ;;  %v6031_v1 = vcombine.low %v5442_v34, %v5449_v29  ;;  %v6033_v7 = vcombine.high %v5442_v34, %v5449_v29 }
 0x539   :  { %5734 = vrot.lane.b32.xlu1 %v5723_v8, %s6623_s16 }
 0x53a   :  { %v5609_v18 = vrot.slane %v6027_v57, %v6863_v33  ;;  %v5625_v31 = vrot.slane %v6029_v49, %v6863_v33  ;;  %v5641_v36 = vrot.slane %v6031_v1, %v6863_v33  ;;  %v5657_v30 = vrot.slane %v6033_v7, %v6863_v33  ;;  %5780 = vrot.lane.b32.xlu0 %v5593_v35, %s6628_s0  ;;  %v5808_v33 = vld [vmem:[#allocation14 + $0x18] sm:$0xff] }
 0x53b   :  { %v6332_v32 = vpack.c.bf16 %v5808_v33, %v5807_v9 }
 0x53c   :  { %v5674_v44 = vcombine.low %v5609_v18, %v5625_v31  ;;  %v5706_v28 = vcombine.low %v5641_v36, %v5657_v30  ;;  %v5675_v12 = vcombine.high %v5609_v18, %v5625_v31  ;;  %v5707_v27 = vcombine.high %v5641_v36, %v5657_v30 }
 0x53d   :  { %5742 = vrot.lane.b32.xlu1 %v5724_v38, %s6605_s10  ;;  %6333 = vmatprep.subr.bf16.mxu0 %v6332_v32 }
 0x53e   :  { %v5682_v61 = vrot.slane %v5674_v44, %v6870_v40  ;;  %v5714_v17 = vrot.slane %v5706_v28, %v6870_v40  ;;  %6335 = vmatpush3.bf16.msra.mxu0 %v6332_v32  ;;  %v5689_v42 = vrot.slane %v5675_v12, %v6870_v40  ;;  %v5721_v3 = vrot.slane %v5707_v27, %v6870_v40 }
 0x540   :  { %v5726_v16 = vcombine.low %v5682_v61, %v5714_v17  ;;  %v5727_v48 = vcombine.high %v5682_v61, %v5714_v17  ;;  %v5728_v56 = vcombine.low %v5689_v42, %v5721_v3  ;;  %v5729_v55 = vcombine.high %v5689_v42, %v5721_v3 }
 0x541   :  { %5750 = vrot.lane.b32.xlu1 %v5725_v26, %s6624_s17 }
 0x545   :  { %5758 = vrot.lane.b32.xlu1 %v5726_v16, %s6625_s18 }
 0x549   :  { %5766 = vrot.lane.b32.xlu1 %v5727_v48, %s6626_s19 }
 0x54d   :  { %5774 = vrot.lane.b32.xlu1 %v5728_v56, %s6627_s20 }
 0x551   :  { %5782 = vrot.lane.b32.xlu1 %v5729_v55, %s6628_s0 }
 0x58a   :  { %v5733_v53 = vpop.permute.xlu0 %5732 }
 0x58b   :  { %v5786_v59 = vsel %vm774_vm1, %v5586_v46, %v5733_v53 }
 0x58e   :  { %v5741_v50 = vpop.permute.xlu0 %5740 }
 0x58f   :  { %v5788_v40 = vsel %vm3357_vm4, %v5786_v59, %v5741_v50 }
 0x592   :  { %v5749_v4 = vpop.permute.xlu0 %5748 }
 0x593   :  { %v5791_v45 = vsel %vm5790_vm5, %v5788_v40, %v5749_v4 }
 0x5a0   :  { %v5757_v23 = vpop.permute.xlu0 %5756 }
 0x5a1   :  { %v5794_v13 = vsel %vm5793_vm6, %v5791_v45, %v5757_v23 }
 0x5a4   :  { %v5765_v11 = vpop.permute.xlu0 %5764 }
 0x5a5   :  { %v5797_v24 = vsel %vm5796_vm7, %v5794_v13, %v5765_v11 }
 0x5a8   :  { %v5773_v51 = vpop.permute.xlu0 %5772 }
 0x5a9   :  { %v5800_v20 = vsel %vm5799_vm8, %v5797_v24, %v5773_v51 }
 0x5ab   :  { %v5735_v41 = vpop.permute.xlu1 %5734 }
 0x5ac   :  { %v5781_v60 = vpop.permute.xlu0 %5780  ;;  %v5787_v21 = vsel %vm774_vm1, %v5722_v14, %v5735_v41 }
 0x5ad   :  { %v5803_v54 = vsel %vm5802_vm9, %v5800_v20, %v5781_v60 }
 0x5ae   :  { %6309 = vmatprep.mubr.msk.f32.mxu0 %vm102_vm0, %v5803_v54 }
 0x5af   :  { %v5743_v0 = vpop.permute.xlu1 %5742 }
 0x5b0   :  { %v5789_v58 = vsel %vm3357_vm4, %v5787_v21, %v5743_v0 }
 0x5b3   :  { %v5751_v46 = vpop.permute.xlu1 %5750 }
 0x5b4   :  { %v5792_v37 = vsel %vm5790_vm5, %v5789_v58, %v5751_v46 }
 0x5b7   :  { %v5759_v15 = vpop.permute.xlu1 %5758 }
 0x5b8   :  { %v5795_v52 = vsel %vm5793_vm6, %v5792_v37, %v5759_v15 }
 0x5bb   :  { %v5767_v43 = vpop.permute.xlu1 %5766 }
 0x5bc   :  { %v5798_v6 = vsel %vm5796_vm7, %v5795_v52, %v5767_v43 }
 0x5bf   :  { %v5775_v63 = vpop.permute.xlu1 %5774 }
 0x5c0   :  { %v5801_v35 = vsel %vm5799_vm8, %v5798_v6, %v5775_v63 }
 0x5c3   :  { %v5783_v5 = vpop.permute.xlu1 %5782 }
 0x5c4   :  { %v5804_v47 = vsel %vm5802_vm9, %v5801_v35, %v5783_v5 }
 0x5c5   :  { %6310 = vmatmul.mubr.msk.f32.vlgmr.msra.gmra.mrb[32].mxu0 %vm102_vm0, %v5804_v47 }
 0x698   :  { %v6311_v2 = vpop.f32.mrb[32].mxu0 }
 0x699   :  { %v5894_v34 = vadd.f32 %v6311_v2, %v6034_v25  ;;  %v5888_v29 = vpop.f32.mrb[33].mxu0 }
 0x69a   :  { %v5889_v8 = vadd.f32 %v6034_v25, %v5888_v29 }
 0x69b   :  { %5898 = vst.msk [vmem:[#allocation15 + $0x8] sm:$0xff] %vm102_vm0, %v5894_v34 }
 0x69c   :  { %5897 = vst.msk [vmem:[#allocation15] sm:$0xff] %vm102_vm0, %v5889_v8 }
 0x69d   :  { %6583 = shalt.err (!%p6580_p2)
}
 0x69e   :  { %s6584_s28 = scalar_lea.hbm %s8018_s6, 256 }
 0x69f   :  { %p6585_p3 = scmp.ne.s32.totalorder %s8018_s6, %s6584_s28  ;;  %p6588_p4 = scmp.lt.u32.totalorder %s6584_s28, %s8018_s6 }
 0x6a1   :  { %p6590_p5 = pnand %p6588_p4, %p6585_p3 }
 0x6a3   :  { %6593 = shalt.err (!%p6590_p5)
}
 0x6a4   :  { %5910 = dma.vmem_to_hbm [thread:$0]  %s5905_s23, 256, %s8018_s6, [#allocation8], %s6604_s9, %s6604_s9, %s6605_s10  }
 0x6a5   :  { %6600 = dma.done.wait [#allocation8], 256  }
 0x6a6   :  { %6601 = vsyncadd [#allocation8], 4294967040 }
 0x6a7   :  { %5914 = vsyncpa [#allocation7], 1 }
 0x6a8   :  { %5915 = vsyncpa [#allocation10], 1 }
 0x6a9   :  { %5916 = vsyncpa [#allocation13], 1 }
 0x6aa   :  { %5917 = vsyncpa [#allocation8], 1 }

</bundles_post_ra>
